<compile_context>
chip_gen: v5e
topology: v5e:2x2
jax: 0.10.0
libtpu: 0.0.40
codegen_flags: <defaults>
</compile_context>

<pallas_src>
import functools

import jax
import jax.numpy as jnp
from jax import lax
from jax.experimental import pallas as pl
from jax.experimental.pallas import tpu as pltpu

LANE = 128
GEMM_DTYPE = jnp.bfloat16          # MXU inputs; accumulation stays f32.


def _round_up(x, m):
    return (x + m - 1) // m * m


def _tpu_caps():
    """Per-generation tile / VMEM caps (v5e/v6e: 128 MiB VMEM, v7x: 64 MiB)."""
    vmem_phys = 64 * 1024 * 1024
    try:
        vmem_phys = int(getattr(pltpu.get_tpu_info(), "vmem_capacity_bytes",
                                vmem_phys))
    except Exception:
        pass
    if vmem_phys >= 96 * 1024 * 1024:          # v5e / v6e
        return {"max_col_tile": 2048,
                "vmem_limit": 64 * 1024 * 1024,
                "fused_budget": 20 * 1024 * 1024}
    # v7x (64 MiB physical) or unknown backend: stay conservative.
    return {"max_col_tile": 1024,
            "vmem_limit": 40 * 1024 * 1024,
            "fused_budget": 10 * 1024 * 1024}


_CAPS = _tpu_caps()


def _cparams(*semantics):
    return pltpu.CompilerParams(dimension_semantics=semantics,
                                vmem_limit_bytes=_CAPS["vmem_limit"])


def _pick_tile(mp, cap):
    """Largest multiple of 128 that divides mp and is <= cap (tiled fallback)."""
    blocks = mp // LANE
    g = max(1, min(blocks, cap // LANE))
    while blocks % g:
        g -= 1
    return g * LANE


# ----------------------------------------------------------------------------
# im2col (XLA strided-slice glue feeding the Pallas GEMM)
# ----------------------------------------------------------------------------
def _im2col(x, KH, KW, stride, padding, OH, OW):
    # TODO(synk): stride-2 window taps are not expressible with BlockSpec
    # index_maps, so patch extraction stays as XLA strided-slice glue.
    Cin, N, H, W = x.shape
    xp = x.astype(GEMM_DTYPE)                  # bf16 is the only materialized copy
    if padding:
        xp = jnp.pad(xp, ((0, 0), (0, 0),
                          (padding, padding), (padding, padding)))
    M = N * OH * OW
    rows = []
    for kh in range(KH):
        for kw in range(KW):
            tap = xp[:, :,
                     kh:kh + stride * (OH - 1) + 1:stride,
                     kw:kw + stride * (OW - 1) + 1:stride]
            rows.append(tap.reshape(Cin, M))
    return jnp.concatenate(rows, axis=0)       # (KH*KW*Cin, M), rows = (kh,kw,cin)


# ----------------------------------------------------------------------------
# Fully fused conv GEMM + BatchNorm (+ residual) (+ ReLU): single grid step.
# ----------------------------------------------------------------------------
def _conv_bn_fused_kernel(*refs, count, eps, relu, has_res):
    if has_res:
        w_ref, a_ref, g_ref, b_ref, r_ref, o_ref = refs
    else:
        w_ref, a_ref, g_ref, b_ref, o_ref = refs
        r_ref = None
    y = jnp.dot(w_ref[...], a_ref[...],
                preferred_element_type=jnp.float32)          # (Cout, M) f32
    inv_n = 1.0 / count
    mean = jnp.sum(y, axis=1, keepdims=True) * inv_n
    var = jnp.sum(y * y, axis=1, keepdims=True) * inv_n - mean * mean
    var = jnp.maximum(var, 0.0)                              # one-pass var guard
    scale = g_ref[...] * lax.rsqrt(var + eps)
    shift = b_ref[...] - mean * scale
    z = y * scale + shift
    if has_res:
        z = z + r_ref[...]
    if relu:
        z = jnp.maximum(z, 0.0)
    o_ref[...] = z


def _fused_conv_bn(w2d, A, gamma2, beta2, M, *, relu, residual, eps):
    Cout, K = w2d.shape
    has_res = residual is not None
    in_specs = [pl.BlockSpec((Cout, K), lambda i: (0, 0)),
                pl.BlockSpec((K, M), lambda i: (0, 0)),
                pl.BlockSpec((Cout, 1), lambda i: (0, 0)),
                pl.BlockSpec((Cout, 1), lambda i: (0, 0))]
    args = [w2d, A, gamma2, beta2]
    if has_res:
        in_specs.append(pl.BlockSpec((Cout, M), lambda i: (0, 0)))
        args.append(residual)
    return pl.pallas_call(
        functools.partial(_conv_bn_fused_kernel, count=M, eps=eps,
                          relu=relu, has_res=has_res),
        out_shape=jax.ShapeDtypeStruct((Cout, M), jnp.float32),
        grid=(1,),
        in_specs=in_specs,
        out_specs=pl.BlockSpec((Cout, M), lambda i: (0, 0)),
        compiler_params=_cparams("arbitrary"),
    )(*args)


# ----------------------------------------------------------------------------
# Tiled fallback (large activations only; not hit at the test shapes)
# ----------------------------------------------------------------------------
def _matmul_kernel_1k(w_ref, a_ref, o_ref):
    o_ref[...] = jnp.dot(w_ref[...], a_ref[...],
                         preferred_element_type=jnp.float32)


def _matmul_kernel(w_ref, a_ref, o_ref, acc_ref):
    @pl.when(pl.program_id(1) == 0)
    def _():
        acc_ref[...] = jnp.zeros_like(acc_ref)

    acc_ref[...] += jnp.dot(w_ref[...], a_ref[...],
                            preferred_element_type=jnp.float32)

    @pl.when(pl.program_id(1) == pl.num_programs(1) - 1)
    def _():
        o_ref[...] = acc_ref[...]


def _bn_stats_kernel(y_ref, sum_ref, ssq_ref):
    @pl.when(pl.program_id(0) == 0)
    def _():
        sum_ref[...] = jnp.zeros_like(sum_ref)
        ssq_ref[...] = jnp.zeros_like(ssq_ref)

    y = y_ref[...]
    sum_ref[...] += jnp.sum(y, axis=1, keepdims=True)
    ssq_ref[...] += jnp.sum(y * y, axis=1, keepdims=True)


def _bn_stats(y_p, tn):
    C, Np = y_p.shape
    return pl.pallas_call(
        _bn_stats_kernel,
        out_shape=(jax.ShapeDtypeStruct((C, 1), jnp.float32),
                   jax.ShapeDtypeStruct((C, 1), jnp.float32)),
        grid=(Np // tn,),
        in_specs=[pl.BlockSpec((C, tn), lambda i: (0, i))],
        out_specs=(pl.BlockSpec((C, 1), lambda i: (0, 0)),
                   pl.BlockSpec((C, 1), lambda i: (0, 0))),
        compiler_params=_cparams("arbitrary"),
    )(y_p)


def _bn_apply_kernel(*refs, count, eps, relu, has_res):
    if has_res:
        y_ref, r_ref, sum_ref, ssq_ref, g_ref, b_ref, o_ref = refs
    else:
        y_ref, sum_ref, ssq_ref, g_ref, b_ref, o_ref = refs
        r_ref = None
    inv_n = 1.0 / count
    mean = sum_ref[...] * inv_n
    var = jnp.maximum(ssq_ref[...] * inv_n - mean * mean, 0.0)
    scale = g_ref[...] * lax.rsqrt(var + eps)
    shift = b_ref[...] - mean * scale
    z = y_ref[...] * scale + shift
    if has_res:
        z = z + r_ref[...]
    if relu:
        z = jnp.maximum(z, 0.0)
    o_ref[...] = z


def _bn_apply(y_p, stats, gamma2, beta2, count, tn, *, relu, residual, eps):
    C, Np = y_p.shape
    col_spec = pl.BlockSpec((C, tn), lambda i: (0, i))
    vec_spec = pl.BlockSpec((C, 1), lambda i: (0, 0))
    s, ss = stats
    args, in_specs = [y_p], [col_spec]
    if residual is not None:
        args.append(residual)
        in_specs.append(col_spec)
    args += [s, ss, gamma2, beta2]
    in_specs += [vec_spec] * 4
    return pl.pallas_call(
        functools.partial(_bn_apply_kernel, count=count, eps=eps, relu=relu,
                          has_res=residual is not None),
        out_shape=jax.ShapeDtypeStruct((C, Np), jnp.float32),
        grid=(Np // tn,),
        in_specs=in_specs,
        out_specs=col_spec,
        compiler_params=_cparams("parallel"),
    )(*args)


def _tiled_conv_bn(w2d, A, gamma2, beta2, M, *, relu, residual, eps):
    # TODO(synk): fold the per-channel stats into the GEMM epilogue (per-lane
    # block partials) to drop one activation read; only matters for this
    # large-M fallback path.
    Cout, K = w2d.shape
    cap = _CAPS["max_col_tile"]
    Mp = _round_up(M, LANE)
    tn = _pick_tile(Mp, cap)
    if Mp != M:
        A = jnp.pad(A, ((0, 0), (0, Mp - M)))
    max_k_tile = 512
    if K <= max_k_tile:
        tk, Kp = K, K
    else:
        tk = max_k_tile
        Kp = _round_up(K, tk)
        A = jnp.pad(A, ((0, Kp - K), (0, 0)))
        w2d = jnp.pad(w2d, ((0, 0), (0, Kp - K)))
    nk = Kp // tk
    if nk == 1:
        y_p = pl.pallas_call(
            _matmul_kernel_1k,
            out_shape=jax.ShapeDtypeStruct((Cout, Mp), jnp.float32),
            grid=(Mp // tn,),
            in_specs=[pl.BlockSpec((Cout, tk), lambda j: (0, 0)),
                      pl.BlockSpec((tk, tn), lambda j: (0, j))],
            out_specs=pl.BlockSpec((Cout, tn), lambda j: (0, j)),
            compiler_params=_cparams("parallel"),
        )(w2d, A)
    else:
        y_p = pl.pallas_call(
            _matmul_kernel,
            out_shape=jax.ShapeDtypeStruct((Cout, Mp), jnp.float32),
            grid=(Mp // tn, nk),
            in_specs=[pl.BlockSpec((Cout, tk), lambda j, k: (0, k)),
                      pl.BlockSpec((tk, tn), lambda j, k: (k, j))],
            out_specs=pl.BlockSpec((Cout, tn), lambda j, k: (0, j)),
            scratch_shapes=[pltpu.VMEM((Cout, tn), jnp.float32)],
            compiler_params=_cparams("parallel", "arbitrary"),
        )(w2d, A)
    stats = _bn_stats(y_p, tn)
    res_p = None
    if residual is not None:
        res_p = residual
        if Mp != M:
            res_p = jnp.pad(res_p, ((0, 0), (0, Mp - M)))
    out_p = _bn_apply(y_p, stats, gamma2, beta2, M, tn,
                      relu=relu, residual=res_p, eps=eps)
    return out_p[:, :M]


# ----------------------------------------------------------------------------
# Conv GEMM + BN (+ residual) (+ ReLU) dispatcher
# ----------------------------------------------------------------------------
def matmul_bn_act(w2d, A, gamma, beta, *, relu, residual=None, eps=1e-5):
    """(Cout,K) @ (K,M) conv GEMM -> train-mode BN -> [+res] -> [ReLU].

    A: (K, M) bf16 im2col matrix. residual: (Cout, M) f32 or None.
    Returns (Cout, M) f32.
    """
    Cout, K = w2d.shape
    K2, M = A.shape
    assert K == K2
    w2d = w2d.astype(GEMM_DTYPE)
    gamma2 = gamma.reshape(Cout, 1).astype(jnp.float32)
    beta2 = beta.reshape(Cout, 1).astype(jnp.float32)
    if residual is not None:
        residual = residual.astype(jnp.float32)
    # Single-shot fused-kernel footprint (double-buffered I/O + f32 temp).
    fused_bytes = (2 * K * M * 2 + 4 * Cout * M * 4
                   + (2 * Cout * M * 4 if residual is not None else 0))
    if fused_bytes <= _CAPS["fused_budget"]:
        return _fused_conv_bn(w2d, A, gamma2, beta2, M,
                              relu=relu, residual=residual, eps=eps)
    return _tiled_conv_bn(w2d, A, gamma2, beta2, M,
                          relu=relu, residual=residual, eps=eps)


def conv_bn_act(x, w, gamma, beta, *, stride, padding, relu):
    """conv2d(bias=False) -> train-mode BatchNorm -> [ReLU] on (Cin,N,H,W)."""
    Cin, N, H, W = x.shape
    Cout, KH, KW, _ = w.shape
    OH = (H + 2 * padding - KH) // stride + 1
    OW = (W + 2 * padding - KW) // stride + 1
    A = _im2col(x, KH, KW, stride, padding, OH, OW)
    out = matmul_bn_act(w.reshape(Cout, KH * KW * Cin), A, gamma, beta,
                        relu=relu)
    return out.reshape(Cout, N, OH, OW)


# ----------------------------------------------------------------------------
# MaxPool 3x3 / stride 2 / pad 1 (9 taps as 9 inputs, no stacked tensor)
# ----------------------------------------------------------------------------
def _max_taps_kernel(*refs):
    o_ref = refs[-1]
    r = refs[0][...]
    for t_ref in refs[1:-1]:
        r = jnp.maximum(r, t_ref[...])
    o_ref[...] = r


def maxpool_3x3_s2_p1(x):
    C, N, H, W = x.shape
    k, s, pad = 3, 2, 1
    OH = (H + 2 * pad - k) // s + 1
    OW = (W + 2 * pad - k) // s + 1
    M = N * OH * OW
    xp = jnp.pad(x, ((0, 0), (0, 0), (pad, pad), (pad, pad)),
                 constant_values=-jnp.inf)
    taps = [xp[:, :,
               kh:kh + s * (OH - 1) + 1:s,
               kw:kw + s * (OW - 1) + 1:s].reshape(C, M)
            for kh in range(k) for kw in range(k)]
    fused_bytes = 2 * (len(taps) + 1) * C * M * 4
    if fused_bytes <= _CAPS["fused_budget"]:
        Mp, grid = M, (1,)
        spec = pl.BlockSpec((C, M), lambda i: (0, 0))
    else:
        Mp = _round_up(M, LANE)
        tn = _pick_tile(Mp, _CAPS["max_col_tile"])
        if Mp != M:
            taps = [jnp.pad(t, ((0, 0), (0, Mp - M))) for t in taps]
        grid = (Mp // tn,)
        spec = pl.BlockSpec((C, tn), lambda i: (0, i))
    out = pl.pallas_call(
        _max_taps_kernel,
        out_shape=jax.ShapeDtypeStruct((C, Mp), jnp.float32),
        grid=grid,
        in_specs=[spec] * (k * k),
        out_specs=spec,
        compiler_params=_cparams("parallel"),
    )(*taps)
    return out[:, :M].reshape(C, N, OH, OW)


# ----------------------------------------------------------------------------
# Fused AvgPool(4) + Linear  (group3 output is 4x4 for 28x28 inputs)
# ----------------------------------------------------------------------------
def _pool_fc_kernel(x_ref, w_ref, b_ref, o_ref):
    pooled = jnp.mean(x_ref[...], axis=2)           # (C, N)
    o_ref[...] = jnp.dot(w_ref[...], pooled,
                         preferred_element_type=jnp.float32) + b_ref[...]


def avgpool_fc(x, w, b):
    C, N, H, W = x.shape
    K = w.shape[0]
    x3 = x.reshape(C, N, H * W)
    out_t = pl.pallas_call(
        _pool_fc_kernel,
        out_shape=jax.ShapeDtypeStruct((K, N), jnp.float32),
        grid=(1,),
        in_specs=[pl.BlockSpec((C, N, H * W), lambda i: (0, 0, 0)),
                  pl.BlockSpec((K, C), lambda i: (0, 0)),
                  pl.BlockSpec((K, 1), lambda i: (0, 0))],
        out_specs=pl.BlockSpec((K, N), lambda i: (0, 0)),
        compiler_params=_cparams("arbitrary"),
    )(x3, w, b.reshape(K, 1))
    return out_t.T                                   # (N, num_classes)


# ----------------------------------------------------------------------------
# Parameter construction (deterministic, mirrors the PyTorch __init__)
# ----------------------------------------------------------------------------
def init_conv(key, cout, kh, kw, cin):
    std = (2.0 / (kh * kw * cout)) ** 0.5            # normal_(0, sqrt(2/n))
    return std * jax.random.normal(key, (cout, kh, kw, cin), jnp.float32)


def init_bn(c):
    return jnp.ones((c,), jnp.float32), jnp.zeros((c,), jnp.float32)


def make_block_params(key, cin, cout, stride):
    k1, k2, k3 = jax.random.split(key, 3)
    p = {
        "conv1": init_conv(k1, cout, 3, 3, cin),
        "bn1": init_bn(cout),
        "conv2": init_conv(k2, cout, 3, 3, cout),
        "bn2": init_bn(cout),
        "stride": stride,
        "has_skip": not (cin == cout and stride == 1),
    }
    if p["has_skip"]:
        p["skip_conv"] = init_conv(k3, cout, 1, 1, cin)
        p["skip_bn"] = init_bn(cout)
    return p


def make_group_params(key, cin, cout, n_blocks, stride):
    keys = jax.random.split(key, n_blocks)
    blocks = [make_block_params(keys[0], cin, cout, stride)]
    for i in range(1, n_blocks):
        blocks.append(make_block_params(keys[i], cout, cout, 1))
    return blocks


def make_resnet_params(key, n_blocks, n_channels, num_classes):
    assert len(n_blocks) == 3, "The number of groups should be three."
    keys = jax.random.split(key, 6)
    fc_in = 4 * n_channels
    bound = 1.0 / (fc_in ** 0.5)                     # default nn.Linear init
    return {
        "conv1": init_conv(keys[0], n_channels, 5, 5, 1),
        "bn1": init_bn(n_channels),
        "group1": make_group_params(keys[1], n_channels, n_channels,
                                    n_blocks[0], 1),
        "group2": make_group_params(keys[2], n_channels, 2 * n_channels,
                                    n_blocks[1], 2),
        "group3": make_group_params(keys[3], 2 * n_channels, 4 * n_channels,
                                    n_blocks[2], 2),
        "fc_w": jax.random.uniform(keys[4], (num_classes, fc_in),
                                   jnp.float32, -bound, bound),
        "fc_b": jax.random.uniform(keys[5], (num_classes,),
                                   jnp.float32, -bound, bound),
    }


# ----------------------------------------------------------------------------
# Forward pass
# ----------------------------------------------------------------------------
def block_forward(p, x):
    Cin, N, H, W = x.shape
    stride = p["stride"]
    Cout = p["conv1"].shape[0]
    OH = (H + 2 - 3) // stride + 1
    OW = (W + 2 - 3) // stride + 1
    M = N * OH * OW

    # conv1 (3x3/stride/pad1): one im2col pass; its center-tap rows are exactly
    # the 1x1/stride/pad0 skip conv's im2col, so the skip path reuses them.
    A3 = _im2col(x, 3, 3, stride, 1, OH, OW)                     # (9*Cin, M)
    y = matmul_bn_act(p["conv1"].reshape(Cout, 9 * Cin), A3,
                      *p["bn1"], relu=True)                      # (Cout, M)

    if p["has_skip"]:
        A1 = A3[4 * Cin:5 * Cin]                                 # center tap
        a = matmul_bn_act(p["skip_conv"].reshape(Cout, Cin), A1,
                          *p["skip_bn"], relu=False)             # (Cout, M)
    else:
        a = x.reshape(Cin, M)                                    # identity skip

    # conv2 (3x3/1/pad1) + bn2 + skip-add + ReLU fused in one kernel.
    A2 = _im2col(y.reshape(Cout, N, OH, OW), 3, 3, 1, 1, OH, OW)  # (9*Cout, M)
    out = matmul_bn_act(p["conv2"].reshape(Cout, 9 * Cout), A2,
                        *p["bn2"], relu=True, residual=a)
    return out.reshape(Cout, N, OH, OW)


def resnet_forward(params, x_nchw):
    # NCHW -> channel-major (C, N, H, W): flattened N*H*W becomes the lane axis.
    x = jnp.transpose(x_nchw, (1, 0, 2, 3)).astype(jnp.float32)
    x = conv_bn_act(x, params["conv1"], *params["bn1"],
                    stride=1, padding=2, relu=True)
    x = maxpool_3x3_s2_p1(x)
    for blk in params["group1"] + params["group2"] + params["group3"]:
        x = block_forward(blk, x)
    return avgpool_fc(x, params["fc_w"], params["fc_b"])


# ----------------------------------------------------------------------------
if __name__ == "__main__":
    key = jax.random.PRNGKey(0)
    kp, kx = jax.random.split(key)

    n_blocks = [1, 1, 1]      # one Block per group (small test config)
    n_channels = 8            # small channel count for the synthetic test
    num_classes = 7

    params = make_resnet_params(kp, n_blocks, n_channels, num_classes)
    x = jax.random.normal(kx, (2, 1, 28, 28), jnp.float32)  # MNIST-like input

    fwd = jax.jit(lambda inp: resnet_forward(params, inp))
    y = jax.block_until_ready(fwd(x))
    assert y.shape == (2, num_classes), y.shape
    assert bool(jnp.all(jnp.isfinite(y)))
    print("KERNEL_OK")
</pallas_src>

<mosaic_0001>
module attributes {stable_mosaic.version = 11 : i64} {
  func.func @_conv_bn_fused_kernel(%arg0: i32, %arg1: memref<8x25xbf16, #tpu.memory_space<vmem>>, %arg2: memref<25x1568xbf16, #tpu.memory_space<vmem>>, %arg3: memref<8x1xf32, #tpu.memory_space<vmem>>, %arg4: memref<8x1xf32, #tpu.memory_space<vmem>>, %arg5: memref<8x1568xf32, #tpu.memory_space<vmem>>) attributes {dimension_semantics = [#tpu.dimension_semantics<arbitrary>], iteration_bounds = array<i64: 1>, scalar_prefetch = 0 : i64, scratch_operands = 0 : i64, tpu.core_type = #tpu.core_type<tc>, window_params = [{pipeline_mode = #tpu.pipeline_mode<synchronous>, transform_indices = @transform_0, window_bounds = array<i64: 8, 25>}, {pipeline_mode = #tpu.pipeline_mode<synchronous>, transform_indices = @transform_1, window_bounds = array<i64: 25, 1568>}, {pipeline_mode = #tpu.pipeline_mode<synchronous>, transform_indices = @transform_2, window_bounds = array<i64: 8, 1>}, {pipeline_mode = #tpu.pipeline_mode<synchronous>, transform_indices = @transform_3, window_bounds = array<i64: 8, 1>}, {pipeline_mode = #tpu.pipeline_mode<synchronous>, transform_indices = @transform_4, window_bounds = array<i64: 8, 1568>}]} {
    %c0 = arith.constant 0 : index
    %c0_0 = arith.constant 0 : index
    %0 = vector.load %arg1[%c0, %c0_0] : memref<8x25xbf16, #tpu.memory_space<vmem>>, vector<8x25xbf16>
    %c0_1 = arith.constant 0 : index
    %c0_2 = arith.constant 0 : index
    %1 = vector.load %arg2[%c0_1, %c0_2] : memref<25x1568xbf16, #tpu.memory_space<vmem>>, vector<25x1568xbf16>
    %cst = arith.constant dense<0.000000e+00> : vector<8x1568xf32>
    %2 = tpu.matmul %0, %1, %cst {dimension_numbers = #tpu.dot_dimension_numbers<[1], [0], [0], [1], [0, 0, 1, 1], [], []>} : vector<8x25xbf16>, vector<25x1568xbf16>, vector<8x1568xf32> -> vector<8x1568xf32>
    %cst_3 = arith.constant dense<0.000000e+00> : vector<8xf32>
    %3 = vector.multi_reduction <add>, %2, %cst_3 [1] : vector<8x1568xf32> to vector<8xf32>
    %4 = vector.shape_cast %3 : vector<8xf32> to vector<8x1xf32>
    %cst_4 = arith.constant 6.37755089E-4 : f32
    %5 = vector.broadcast %cst_4 : f32 to vector<8x1xf32>
    %6 = arith.mulf %4, %5 : vector<8x1xf32>
    %7 = arith.mulf %2, %2 : vector<8x1568xf32>
    %cst_5 = arith.constant dense<0.000000e+00> : vector<8xf32>
    %8 = vector.multi_reduction <add>, %7, %cst_5 [1] : vector<8x1568xf32> to vector<8xf32>
    %9 = vector.shape_cast %8 : vector<8xf32> to vector<8x1xf32>
    %cst_6 = arith.constant 6.37755089E-4 : f32
    %10 = vector.broadcast %cst_6 : f32 to vector<8x1xf32>
    %11 = arith.mulf %9, %10 : vector<8x1xf32>
    %12 = arith.mulf %6, %6 : vector<8x1xf32>
    %13 = arith.subf %11, %12 : vector<8x1xf32>
    %cst_7 = arith.constant 0.000000e+00 : f32
    %14 = vector.broadcast %cst_7 : f32 to vector<8x1xf32>
    %15 = arith.maximumf %13, %14 : vector<8x1xf32>
    %c0_8 = arith.constant 0 : index
    %c0_9 = arith.constant 0 : index
    %16 = vector.load %arg3[%c0_8, %c0_9] : memref<8x1xf32, #tpu.memory_space<vmem>>, vector<8x1xf32>
    %cst_10 = arith.constant 9.99999974E-6 : f32
    %17 = vector.broadcast %cst_10 : f32 to vector<8x1xf32>
    %18 = arith.addf %15, %17 : vector<8x1xf32>
    %19 = math.rsqrt %18 : vector<8x1xf32>
    %20 = arith.mulf %16, %19 : vector<8x1xf32>
    %c0_11 = arith.constant 0 : index
    %c0_12 = arith.constant 0 : index
    %21 = vector.load %arg4[%c0_11, %c0_12] : memref<8x1xf32, #tpu.memory_space<vmem>>, vector<8x1xf32>
    %22 = arith.mulf %6, %20 : vector<8x1xf32>
    %23 = arith.subf %21, %22 : vector<8x1xf32>
    %24 = vector.broadcast %20 : vector<8x1xf32> to vector<8x1568xf32>
    %25 = arith.mulf %2, %24 : vector<8x1568xf32>
    %26 = vector.broadcast %23 : vector<8x1xf32> to vector<8x1568xf32>
    %27 = arith.addf %25, %26 : vector<8x1568xf32>
    %cst_13 = arith.constant 0.000000e+00 : f32
    %28 = vector.broadcast %cst_13 : f32 to vector<8x1568xf32>
    %29 = arith.maximumf %27, %28 : vector<8x1568xf32>
    %c0_14 = arith.constant 0 : index
    %c0_15 = arith.constant 0 : index
    %30 = vector.load %arg5[%c0_14, %c0_15] : memref<8x1568xf32, #tpu.memory_space<vmem>>, vector<8x1568xf32>
    tpu.vector_store %arg5[%c0_14, %c0_15], %29 {strides = array<i32>} : memref<8x1568xf32, #tpu.memory_space<vmem>>, vector<8x1568xf32>,
    return
  }
  func.func @transform_0(%arg0: i32) -> (i32, i32) {
    %c0_i32 = arith.constant 0 : i32
    %c0_i32_0 = arith.constant 0 : i32
    %c0_i32_1 = arith.constant 0 : i32
    return %c0_i32, %c0_i32_0 : i32, i32
  }
  func.func @transform_1(%arg0: i32) -> (i32, i32) {
    %c0_i32 = arith.constant 0 : i32
    %c0_i32_0 = arith.constant 0 : i32
    %c0_i32_1 = arith.constant 0 : i32
    return %c0_i32, %c0_i32_0 : i32, i32
  }
  func.func @transform_2(%arg0: i32) -> (i32, i32) {
    %c0_i32 = arith.constant 0 : i32
    %c0_i32_0 = arith.constant 0 : i32
    %c0_i32_1 = arith.constant 0 : i32
    return %c0_i32, %c0_i32_0 : i32, i32
  }
  func.func @transform_3(%arg0: i32) -> (i32, i32) {
    %c0_i32 = arith.constant 0 : i32
    %c0_i32_0 = arith.constant 0 : i32
    %c0_i32_1 = arith.constant 0 : i32
    return %c0_i32, %c0_i32_0 : i32, i32
  }
  func.func @transform_4(%arg0: i32) -> (i32, i32) {
    %c0_i32 = arith.constant 0 : i32
    %c0_i32_0 = arith.constant 0 : i32
    %c0_i32_1 = arith.constant 0 : i32
    return %c0_i32, %c0_i32_0 : i32, i32
  }
}

module attributes {stable_mosaic.version = 11 : i64} {
  func.func @_max_taps_kernel(%arg0: i32, %arg1: memref<8x392xf32, #tpu.memory_space<vmem>>, %arg2: memref<8x392xf32, #tpu.memory_space<vmem>>, %arg3: memref<8x392xf32, #tpu.memory_space<vmem>>, %arg4: memref<8x392xf32, #tpu.memory_space<vmem>>, %arg5: memref<8x392xf32, #tpu.memory_space<vmem>>, %arg6: memref<8x392xf32, #tpu.memory_space<vmem>>, %arg7: memref<8x392xf32, #tpu.memory_space<vmem>>, %arg8: memref<8x392xf32, #tpu.memory_space<vmem>>, %arg9: memref<8x392xf32, #tpu.memory_space<vmem>>, %arg10: memref<8x392xf32, #tpu.memory_space<vmem>>) attributes {dimension_semantics = [#tpu.dimension_semantics<parallel>], iteration_bounds = array<i64: 1>, scalar_prefetch = 0 : i64, scratch_operands = 0 : i64, tpu.core_type = #tpu.core_type<tc>, window_params = [{pipeline_mode = #tpu.pipeline_mode<synchronous>, transform_indices = @transform_0, window_bounds = array<i64: 8, 392>}, {pipeline_mode = #tpu.pipeline_mode<synchronous>, transform_indices = @transform_1, window_bounds = array<i64: 8, 392>}, {pipeline_mode = #tpu.pipeline_mode<synchronous>, transform_indices = @transform_2, window_bounds = array<i64: 8, 392>}, {pipeline_mode = #tpu.pipeline_mode<synchronous>, transform_indices = @transform_3, window_bounds = array<i64: 8, 392>}, {pipeline_mode = #tpu.pipeline_mode<synchronous>, transform_indices = @transform_4, window_bounds = array<i64: 8, 392>}, {pipeline_mode = #tpu.pipeline_mode<synchronous>, transform_indices = @transform_5, window_bounds = array<i64: 8, 392>}, {pipeline_mode = #tpu.pipeline_mode<synchronous>, transform_indices = @transform_6, window_bounds = array<i64: 8, 392>}, {pipeline_mode = #tpu.pipeline_mode<synchronous>, transform_indices = @transform_7, window_bounds = array<i64: 8, 392>}, {pipeline_mode = #tpu.pipeline_mode<synchronous>, transform_indices = @transform_8, window_bounds = array<i64: 8, 392>}, {pipeline_mode = #tpu.pipeline_mode<synchronous>, transform_indices = @transform_9, window_bounds = array<i64: 8, 392>}]} {
    %c0 = arith.constant 0 : index
    %c0_0 = arith.constant 0 : index
    %0 = vector.load %arg1[%c0, %c0_0] : memref<8x392xf32, #tpu.memory_space<vmem>>, vector<8x392xf32>
    %c0_1 = arith.constant 0 : index
    %c0_2 = arith.constant 0 : index
    %1 = vector.load %arg2[%c0_1, %c0_2] : memref<8x392xf32, #tpu.memory_space<vmem>>, vector<8x392xf32>
    %2 = arith.maximumf %0, %1 : vector<8x392xf32>
    %c0_3 = arith.constant 0 : index
    %c0_4 = arith.constant 0 : index
    %3 = vector.load %arg3[%c0_3, %c0_4] : memref<8x392xf32, #tpu.memory_space<vmem>>, vector<8x392xf32>
    %4 = arith.maximumf %2, %3 : vector<8x392xf32>
    %c0_5 = arith.constant 0 : index
    %c0_6 = arith.constant 0 : index
    %5 = vector.load %arg4[%c0_5, %c0_6] : memref<8x392xf32, #tpu.memory_space<vmem>>, vector<8x392xf32>
    %6 = arith.maximumf %4, %5 : vector<8x392xf32>
    %c0_7 = arith.constant 0 : index
    %c0_8 = arith.constant 0 : index
    %7 = vector.load %arg5[%c0_7, %c0_8] : memref<8x392xf32, #tpu.memory_space<vmem>>, vector<8x392xf32>
    %8 = arith.maximumf %6, %7 : vector<8x392xf32>
    %c0_9 = arith.constant 0 : index
    %c0_10 = arith.constant 0 : index
    %9 = vector.load %arg6[%c0_9, %c0_10] : memref<8x392xf32, #tpu.memory_space<vmem>>, vector<8x392xf32>
    %10 = arith.maximumf %8, %9 : vector<8x392xf32>
    %c0_11 = arith.constant 0 : index
    %c0_12 = arith.constant 0 : index
    %11 = vector.load %arg7[%c0_11, %c0_12] : memref<8x392xf32, #tpu.memory_space<vmem>>, vector<8x392xf32>
    %12 = arith.maximumf %10, %11 : vector<8x392xf32>
    %c0_13 = arith.constant 0 : index
    %c0_14 = arith.constant 0 : index
    %13 = vector.load %arg8[%c0_13, %c0_14] : memref<8x392xf32, #tpu.memory_space<vmem>>, vector<8x392xf32>
    %14 = arith.maximumf %12, %13 : vector<8x392xf32>
    %c0_15 = arith.constant 0 : index
    %c0_16 = arith.constant 0 : index
    %15 = vector.load %arg9[%c0_15, %c0_16] : memref<8x392xf32, #tpu.memory_space<vmem>>, vector<8x392xf32>
    %16 = arith.maximumf %14, %15 : vector<8x392xf32>
    %c0_17 = arith.constant 0 : index
    %c0_18 = arith.constant 0 : index
    %17 = vector.load %arg10[%c0_17, %c0_18] : memref<8x392xf32, #tpu.memory_space<vmem>>, vector<8x392xf32>
    tpu.vector_store %arg10[%c0_17, %c0_18], %16 {strides = array<i32>} : memref<8x392xf32, #tpu.memory_space<vmem>>, vector<8x392xf32>,
    return
  }
  func.func @transform_0(%arg0: i32) -> (i32, i32) {
    %c0_i32 = arith.constant 0 : i32
    %c0_i32_0 = arith.constant 0 : i32
    %c0_i32_1 = arith.constant 0 : i32
    return %c0_i32, %c0_i32_0 : i32, i32
  }
  func.func @transform_1(%arg0: i32) -> (i32, i32) {
    %c0_i32 = arith.constant 0 : i32
    %c0_i32_0 = arith.constant 0 : i32
    %c0_i32_1 = arith.constant 0 : i32
    return %c0_i32, %c0_i32_0 : i32, i32
  }
  func.func @transform_2(%arg0: i32) -> (i32, i32) {
    %c0_i32 = arith.constant 0 : i32
    %c0_i32_0 = arith.constant 0 : i32
    %c0_i32_1 = arith.constant 0 : i32
    return %c0_i32, %c0_i32_0 : i32, i32
  }
  func.func @transform_3(%arg0: i32) -> (i32, i32) {
    %c0_i32 = arith.constant 0 : i32
    %c0_i32_0 = arith.constant 0 : i32
    %c0_i32_1 = arith.constant 0 : i32
    return %c0_i32, %c0_i32_0 : i32, i32
  }
  func.func @transform_4(%arg0: i32) -> (i32, i32) {
    %c0_i32 = arith.constant 0 : i32
    %c0_i32_0 = arith.constant 0 : i32
    %c0_i32_1 = arith.constant 0 : i32
    return %c0_i32, %c0_i32_0 : i32, i32
  }
  func.func @transform_5(%arg0: i32) -> (i32, i32) {
    %c0_i32 = arith.constant 0 : i32
    %c0_i32_0 = arith.constant 0 : i32
    %c0_i32_1 = arith.constant 0 : i32
    return %c0_i32, %c0_i32_0 : i32, i32
  }
  func.func @transform_6(%arg0: i32) -> (i32, i32) {
    %c0_i32 = arith.constant 0 : i32
    %c0_i32_0 = arith.constant 0 : i32
    %c0_i32_1 = arith.constant 0 : i32
    return %c0_i32, %c0_i32_0 : i32, i32
  }
  func.func @transform_7(%arg0: i32) -> (i32, i32) {
    %c0_i32 = arith.constant 0 : i32
    %c0_i32_0 = arith.constant 0 : i32
    %c0_i32_1 = arith.constant 0 : i32
    return %c0_i32, %c0_i32_0 : i32, i32
  }
  func.func @transform_8(%arg0: i32) -> (i32, i32) {
    %c0_i32 = arith.constant 0 : i32
    %c0_i32_0 = arith.constant 0 : i32
    %c0_i32_1 = arith.constant 0 : i32
    return %c0_i32, %c0_i32_0 : i32, i32
  }
  func.func @transform_9(%arg0: i32) -> (i32, i32) {
    %c0_i32 = arith.constant 0 : i32
    %c0_i32_0 = arith.constant 0 : i32
    %c0_i32_1 = arith.constant 0 : i32
    return %c0_i32, %c0_i32_0 : i32, i32
  }
}

module attributes {stable_mosaic.version = 11 : i64} {
  func.func @_conv_bn_fused_kernel(%arg0: i32, %arg1: memref<8x72xbf16, #tpu.memory_space<vmem>>, %arg2: memref<72x392xbf16, #tpu.memory_space<vmem>>, %arg3: memref<8x1xf32, #tpu.memory_space<vmem>>, %arg4: memref<8x1xf32, #tpu.memory_space<vmem>>, %arg5: memref<8x392xf32, #tpu.memory_space<vmem>>) attributes {dimension_semantics = [#tpu.dimension_semantics<arbitrary>], iteration_bounds = array<i64: 1>, scalar_prefetch = 0 : i64, scratch_operands = 0 : i64, tpu.core_type = #tpu.core_type<tc>, window_params = [{pipeline_mode = #tpu.pipeline_mode<synchronous>, transform_indices = @transform_0, window_bounds = array<i64: 8, 72>}, {pipeline_mode = #tpu.pipeline_mode<synchronous>, transform_indices = @transform_1, window_bounds = array<i64: 72, 392>}, {pipeline_mode = #tpu.pipeline_mode<synchronous>, transform_indices = @transform_2, window_bounds = array<i64: 8, 1>}, {pipeline_mode = #tpu.pipeline_mode<synchronous>, transform_indices = @transform_3, window_bounds = array<i64: 8, 1>}, {pipeline_mode = #tpu.pipeline_mode<synchronous>, transform_indices = @transform_4, window_bounds = array<i64: 8, 392>}]} {
    %c0 = arith.constant 0 : index
    %c0_0 = arith.constant 0 : index
    %0 = vector.load %arg1[%c0, %c0_0] : memref<8x72xbf16, #tpu.memory_space<vmem>>, vector<8x72xbf16>
    %c0_1 = arith.constant 0 : index
    %c0_2 = arith.constant 0 : index
    %1 = vector.load %arg2[%c0_1, %c0_2] : memref<72x392xbf16, #tpu.memory_space<vmem>>, vector<72x392xbf16>
    %cst = arith.constant dense<0.000000e+00> : vector<8x392xf32>
    %2 = tpu.matmul %0, %1, %cst {dimension_numbers = #tpu.dot_dimension_numbers<[1], [0], [0], [1], [0, 0, 1, 1], [], []>} : vector<8x72xbf16>, vector<72x392xbf16>, vector<8x392xf32> -> vector<8x392xf32>
    %cst_3 = arith.constant dense<0.000000e+00> : vector<8xf32>
    %3 = vector.multi_reduction <add>, %2, %cst_3 [1] : vector<8x392xf32> to vector<8xf32>
    %4 = vector.shape_cast %3 : vector<8xf32> to vector<8x1xf32>
    %cst_4 = arith.constant 0.00255102036 : f32
    %5 = vector.broadcast %cst_4 : f32 to vector<8x1xf32>
    %6 = arith.mulf %4, %5 : vector<8x1xf32>
    %7 = arith.mulf %2, %2 : vector<8x392xf32>
    %cst_5 = arith.constant dense<0.000000e+00> : vector<8xf32>
    %8 = vector.multi_reduction <add>, %7, %cst_5 [1] : vector<8x392xf32> to vector<8xf32>
    %9 = vector.shape_cast %8 : vector<8xf32> to vector<8x1xf32>
    %cst_6 = arith.constant 0.00255102036 : f32
    %10 = vector.broadcast %cst_6 : f32 to vector<8x1xf32>
    %11 = arith.mulf %9, %10 : vector<8x1xf32>
    %12 = arith.mulf %6, %6 : vector<8x1xf32>
    %13 = arith.subf %11, %12 : vector<8x1xf32>
    %cst_7 = arith.constant 0.000000e+00 : f32
    %14 = vector.broadcast %cst_7 : f32 to vector<8x1xf32>
    %15 = arith.maximumf %13, %14 : vector<8x1xf32>
    %c0_8 = arith.constant 0 : index
    %c0_9 = arith.constant 0 : index
    %16 = vector.load %arg3[%c0_8, %c0_9] : memref<8x1xf32, #tpu.memory_space<vmem>>, vector<8x1xf32>
    %cst_10 = arith.constant 9.99999974E-6 : f32
    %17 = vector.broadcast %cst_10 : f32 to vector<8x1xf32>
    %18 = arith.addf %15, %17 : vector<8x1xf32>
    %19 = math.rsqrt %18 : vector<8x1xf32>
    %20 = arith.mulf %16, %19 : vector<8x1xf32>
    %c0_11 = arith.constant 0 : index
    %c0_12 = arith.constant 0 : index
    %21 = vector.load %arg4[%c0_11, %c0_12] : memref<8x1xf32, #tpu.memory_space<vmem>>, vector<8x1xf32>
    %22 = arith.mulf %6, %20 : vector<8x1xf32>
    %23 = arith.subf %21, %22 : vector<8x1xf32>
    %24 = vector.broadcast %20 : vector<8x1xf32> to vector<8x392xf32>
    %25 = arith.mulf %2, %24 : vector<8x392xf32>
    %26 = vector.broadcast %23 : vector<8x1xf32> to vector<8x392xf32>
    %27 = arith.addf %25, %26 : vector<8x392xf32>
    %cst_13 = arith.constant 0.000000e+00 : f32
    %28 = vector.broadcast %cst_13 : f32 to vector<8x392xf32>
    %29 = arith.maximumf %27, %28 : vector<8x392xf32>
    %c0_14 = arith.constant 0 : index
    %c0_15 = arith.constant 0 : index
    %30 = vector.load %arg5[%c0_14, %c0_15] : memref<8x392xf32, #tpu.memory_space<vmem>>, vector<8x392xf32>
    tpu.vector_store %arg5[%c0_14, %c0_15], %29 {strides = array<i32>} : memref<8x392xf32, #tpu.memory_space<vmem>>, vector<8x392xf32>,
    return
  }
  func.func @transform_0(%arg0: i32) -> (i32, i32) {
    %c0_i32 = arith.constant 0 : i32
    %c0_i32_0 = arith.constant 0 : i32
    %c0_i32_1 = arith.constant 0 : i32
    return %c0_i32, %c0_i32_0 : i32, i32
  }
  func.func @transform_1(%arg0: i32) -> (i32, i32) {
    %c0_i32 = arith.constant 0 : i32
    %c0_i32_0 = arith.constant 0 : i32
    %c0_i32_1 = arith.constant 0 : i32
    return %c0_i32, %c0_i32_0 : i32, i32
  }
  func.func @transform_2(%arg0: i32) -> (i32, i32) {
    %c0_i32 = arith.constant 0 : i32
    %c0_i32_0 = arith.constant 0 : i32
    %c0_i32_1 = arith.constant 0 : i32
    return %c0_i32, %c0_i32_0 : i32, i32
  }
  func.func @transform_3(%arg0: i32) -> (i32, i32) {
    %c0_i32 = arith.constant 0 : i32
    %c0_i32_0 = arith.constant 0 : i32
    %c0_i32_1 = arith.constant 0 : i32
    return %c0_i32, %c0_i32_0 : i32, i32
  }
  func.func @transform_4(%arg0: i32) -> (i32, i32) {
    %c0_i32 = arith.constant 0 : i32
    %c0_i32_0 = arith.constant 0 : i32
    %c0_i32_1 = arith.constant 0 : i32
    return %c0_i32, %c0_i32_0 : i32, i32
  }
}

module attributes {stable_mosaic.version = 11 : i64} {
  func.func @_conv_bn_fused_kernel(%arg0: i32, %arg1: memref<8x72xbf16, #tpu.memory_space<vmem>>, %arg2: memref<72x392xbf16, #tpu.memory_space<vmem>>, %arg3: memref<8x1xf32, #tpu.memory_space<vmem>>, %arg4: memref<8x1xf32, #tpu.memory_space<vmem>>, %arg5: memref<8x392xf32, #tpu.memory_space<vmem>>, %arg6: memref<8x392xf32, #tpu.memory_space<vmem>>) attributes {dimension_semantics = [#tpu.dimension_semantics<arbitrary>], iteration_bounds = array<i64: 1>, scalar_prefetch = 0 : i64, scratch_operands = 0 : i64, tpu.core_type = #tpu.core_type<tc>, window_params = [{pipeline_mode = #tpu.pipeline_mode<synchronous>, transform_indices = @transform_0, window_bounds = array<i64: 8, 72>}, {pipeline_mode = #tpu.pipeline_mode<synchronous>, transform_indices = @transform_1, window_bounds = array<i64: 72, 392>}, {pipeline_mode = #tpu.pipeline_mode<synchronous>, transform_indices = @transform_2, window_bounds = array<i64: 8, 1>}, {pipeline_mode = #tpu.pipeline_mode<synchronous>, transform_indices = @transform_3, window_bounds = array<i64: 8, 1>}, {pipeline_mode = #tpu.pipeline_mode<synchronous>, transform_indices = @transform_4, window_bounds = array<i64: 8, 392>}, {pipeline_mode = #tpu.pipeline_mode<synchronous>, transform_indices = @transform_5, window_bounds = array<i64: 8, 392>}]} {
    %c0 = arith.constant 0 : index
    %c0_0 = arith.constant 0 : index
    %0 = vector.load %arg1[%c0, %c0_0] : memref<8x72xbf16, #tpu.memory_space<vmem>>, vector<8x72xbf16>
    %c0_1 = arith.constant 0 : index
    %c0_2 = arith.constant 0 : index
    %1 = vector.load %arg2[%c0_1, %c0_2] : memref<72x392xbf16, #tpu.memory_space<vmem>>, vector<72x392xbf16>
    %cst = arith.constant dense<0.000000e+00> : vector<8x392xf32>
    %2 = tpu.matmul %0, %1, %cst {dimension_numbers = #tpu.dot_dimension_numbers<[1], [0], [0], [1], [0, 0, 1, 1], [], []>} : vector<8x72xbf16>, vector<72x392xbf16>, vector<8x392xf32> -> vector<8x392xf32>
    %cst_3 = arith.constant dense<0.000000e+00> : vector<8xf32>
    %3 = vector.multi_reduction <add>, %2, %cst_3 [1] : vector<8x392xf32> to vector<8xf32>
    %4 = vector.shape_cast %3 : vector<8xf32> to vector<8x1xf32>
    %cst_4 = arith.constant 0.00255102036 : f32
    %5 = vector.broadcast %cst_4 : f32 to vector<8x1xf32>
    %6 = arith.mulf %4, %5 : vector<8x1xf32>
    %7 = arith.mulf %2, %2 : vector<8x392xf32>
    %cst_5 = arith.constant dense<0.000000e+00> : vector<8xf32>
    %8 = vector.multi_reduction <add>, %7, %cst_5 [1] : vector<8x392xf32> to vector<8xf32>
    %9 = vector.shape_cast %8 : vector<8xf32> to vector<8x1xf32>
    %cst_6 = arith.constant 0.00255102036 : f32
    %10 = vector.broadcast %cst_6 : f32 to vector<8x1xf32>
    %11 = arith.mulf %9, %10 : vector<8x1xf32>
    %12 = arith.mulf %6, %6 : vector<8x1xf32>
    %13 = arith.subf %11, %12 : vector<8x1xf32>
    %cst_7 = arith.constant 0.000000e+00 : f32
    %14 = vector.broadcast %cst_7 : f32 to vector<8x1xf32>
    %15 = arith.maximumf %13, %14 : vector<8x1xf32>
    %c0_8 = arith.constant 0 : index
    %c0_9 = arith.constant 0 : index
    %16 = vector.load %arg3[%c0_8, %c0_9] : memref<8x1xf32, #tpu.memory_space<vmem>>, vector<8x1xf32>
    %cst_10 = arith.constant 9.99999974E-6 : f32
    %17 = vector.broadcast %cst_10 : f32 to vector<8x1xf32>
    %18 = arith.addf %15, %17 : vector<8x1xf32>
    %19 = math.rsqrt %18 : vector<8x1xf32>
    %20 = arith.mulf %16, %19 : vector<8x1xf32>
    %c0_11 = arith.constant 0 : index
    %c0_12 = arith.constant 0 : index
    %21 = vector.load %arg4[%c0_11, %c0_12] : memref<8x1xf32, #tpu.memory_space<vmem>>, vector<8x1xf32>
    %22 = arith.mulf %6, %20 : vector<8x1xf32>
    %23 = arith.subf %21, %22 : vector<8x1xf32>
    %24 = vector.broadcast %20 : vector<8x1xf32> to vector<8x392xf32>
    %25 = arith.mulf %2, %24 : vector<8x392xf32>
    %26 = vector.broadcast %23 : vector<8x1xf32> to vector<8x392xf32>
    %27 = arith.addf %25, %26 : vector<8x392xf32>
    %c0_13 = arith.constant 0 : index
    %c0_14 = arith.constant 0 : index
    %28 = vector.load %arg5[%c0_13, %c0_14] : memref<8x392xf32, #tpu.memory_space<vmem>>, vector<8x392xf32>
    %29 = arith.addf %27, %28 : vector<8x392xf32>
    %cst_15 = arith.constant 0.000000e+00 : f32
    %30 = vector.broadcast %cst_15 : f32 to vector<8x392xf32>
    %31 = arith.maximumf %29, %30 : vector<8x392xf32>
    %c0_16 = arith.constant 0 : index
    %c0_17 = arith.constant 0 : index
    %32 = vector.load %arg6[%c0_16, %c0_17] : memref<8x392xf32, #tpu.memory_space<vmem>>, vector<8x392xf32>
    tpu.vector_store %arg6[%c0_16, %c0_17], %31 {strides = array<i32>} : memref<8x392xf32, #tpu.memory_space<vmem>>, vector<8x392xf32>,
    return
  }
  func.func @transform_0(%arg0: i32) -> (i32, i32) {
    %c0_i32 = arith.constant 0 : i32
    %c0_i32_0 = arith.constant 0 : i32
    %c0_i32_1 = arith.constant 0 : i32
    return %c0_i32, %c0_i32_0 : i32, i32
  }
  func.func @transform_1(%arg0: i32) -> (i32, i32) {
    %c0_i32 = arith.constant 0 : i32
    %c0_i32_0 = arith.constant 0 : i32
    %c0_i32_1 = arith.constant 0 : i32
    return %c0_i32, %c0_i32_0 : i32, i32
  }
  func.func @transform_2(%arg0: i32) -> (i32, i32) {
    %c0_i32 = arith.constant 0 : i32
    %c0_i32_0 = arith.constant 0 : i32
    %c0_i32_1 = arith.constant 0 : i32
    return %c0_i32, %c0_i32_0 : i32, i32
  }
  func.func @transform_3(%arg0: i32) -> (i32, i32) {
    %c0_i32 = arith.constant 0 : i32
    %c0_i32_0 = arith.constant 0 : i32
    %c0_i32_1 = arith.constant 0 : i32
    return %c0_i32, %c0_i32_0 : i32, i32
  }
  func.func @transform_4(%arg0: i32) -> (i32, i32) {
    %c0_i32 = arith.constant 0 : i32
    %c0_i32_0 = arith.constant 0 : i32
    %c0_i32_1 = arith.constant 0 : i32
    return %c0_i32, %c0_i32_0 : i32, i32
  }
  func.func @transform_5(%arg0: i32) -> (i32, i32) {
    %c0_i32 = arith.constant 0 : i32
    %c0_i32_0 = arith.constant 0 : i32
    %c0_i32_1 = arith.constant 0 : i32
    return %c0_i32, %c0_i32_0 : i32, i32
  }
}

module attributes {stable_mosaic.version = 11 : i64} {
  func.func @_conv_bn_fused_kernel(%arg0: i32, %arg1: memref<16x72xbf16, #tpu.memory_space<vmem>>, %arg2: memref<72x98xbf16, #tpu.memory_space<vmem>>, %arg3: memref<16x1xf32, #tpu.memory_space<vmem>>, %arg4: memref<16x1xf32, #tpu.memory_space<vmem>>, %arg5: memref<16x98xf32, #tpu.memory_space<vmem>>) attributes {dimension_semantics = [#tpu.dimension_semantics<arbitrary>], iteration_bounds = array<i64: 1>, scalar_prefetch = 0 : i64, scratch_operands = 0 : i64, tpu.core_type = #tpu.core_type<tc>, window_params = [{pipeline_mode = #tpu.pipeline_mode<synchronous>, transform_indices = @transform_0, window_bounds = array<i64: 16, 72>}, {pipeline_mode = #tpu.pipeline_mode<synchronous>, transform_indices = @transform_1, window_bounds = array<i64: 72, 98>}, {pipeline_mode = #tpu.pipeline_mode<synchronous>, transform_indices = @transform_2, window_bounds = array<i64: 16, 1>}, {pipeline_mode = #tpu.pipeline_mode<synchronous>, transform_indices = @transform_3, window_bounds = array<i64: 16, 1>}, {pipeline_mode = #tpu.pipeline_mode<synchronous>, transform_indices = @transform_4, window_bounds = array<i64: 16, 98>}]} {
    %c0 = arith.constant 0 : index
    %c0_0 = arith.constant 0 : index
    %0 = vector.load %arg1[%c0, %c0_0] : memref<16x72xbf16, #tpu.memory_space<vmem>>, vector<16x72xbf16>
    %c0_1 = arith.constant 0 : index
    %c0_2 = arith.constant 0 : index
    %1 = vector.load %arg2[%c0_1, %c0_2] : memref<72x98xbf16, #tpu.memory_space<vmem>>, vector<72x98xbf16>
    %cst = arith.constant dense<0.000000e+00> : vector<16x98xf32>
    %2 = tpu.matmul %0, %1, %cst {dimension_numbers = #tpu.dot_dimension_numbers<[1], [0], [0], [1], [0, 0, 1, 1], [], []>} : vector<16x72xbf16>, vector<72x98xbf16>, vector<16x98xf32> -> vector<16x98xf32>
    %cst_3 = arith.constant dense<0.000000e+00> : vector<16xf32>
    %3 = vector.multi_reduction <add>, %2, %cst_3 [1] : vector<16x98xf32> to vector<16xf32>
    %4 = vector.shape_cast %3 : vector<16xf32> to vector<16x1xf32>
    %cst_4 = arith.constant 0.0102040814 : f32
    %5 = vector.broadcast %cst_4 : f32 to vector<16x1xf32>
    %6 = arith.mulf %4, %5 : vector<16x1xf32>
    %7 = arith.mulf %2, %2 : vector<16x98xf32>
    %cst_5 = arith.constant dense<0.000000e+00> : vector<16xf32>
    %8 = vector.multi_reduction <add>, %7, %cst_5 [1] : vector<16x98xf32> to vector<16xf32>
    %9 = vector.shape_cast %8 : vector<16xf32> to vector<16x1xf32>
    %cst_6 = arith.constant 0.0102040814 : f32
    %10 = vector.broadcast %cst_6 : f32 to vector<16x1xf32>
    %11 = arith.mulf %9, %10 : vector<16x1xf32>
    %12 = arith.mulf %6, %6 : vector<16x1xf32>
    %13 = arith.subf %11, %12 : vector<16x1xf32>
    %cst_7 = arith.constant 0.000000e+00 : f32
    %14 = vector.broadcast %cst_7 : f32 to vector<16x1xf32>
    %15 = arith.maximumf %13, %14 : vector<16x1xf32>
    %c0_8 = arith.constant 0 : index
    %c0_9 = arith.constant 0 : index
    %16 = vector.load %arg3[%c0_8, %c0_9] : memref<16x1xf32, #tpu.memory_space<vmem>>, vector<16x1xf32>
    %cst_10 = arith.constant 9.99999974E-6 : f32
    %17 = vector.broadcast %cst_10 : f32 to vector<16x1xf32>
    %18 = arith.addf %15, %17 : vector<16x1xf32>
    %19 = math.rsqrt %18 : vector<16x1xf32>
    %20 = arith.mulf %16, %19 : vector<16x1xf32>
    %c0_11 = arith.constant 0 : index
    %c0_12 = arith.constant 0 : index
    %21 = vector.load %arg4[%c0_11, %c0_12] : memref<16x1xf32, #tpu.memory_space<vmem>>, vector<16x1xf32>
    %22 = arith.mulf %6, %20 : vector<16x1xf32>
    %23 = arith.subf %21, %22 : vector<16x1xf32>
    %24 = vector.broadcast %20 : vector<16x1xf32> to vector<16x98xf32>
    %25 = arith.mulf %2, %24 : vector<16x98xf32>
    %26 = vector.broadcast %23 : vector<16x1xf32> to vector<16x98xf32>
    %27 = arith.addf %25, %26 : vector<16x98xf32>
    %cst_13 = arith.constant 0.000000e+00 : f32
    %28 = vector.broadcast %cst_13 : f32 to vector<16x98xf32>
    %29 = arith.maximumf %27, %28 : vector<16x98xf32>
    %c0_14 = arith.constant 0 : index
    %c0_15 = arith.constant 0 : index
    %30 = vector.load %arg5[%c0_14, %c0_15] : memref<16x98xf32, #tpu.memory_space<vmem>>, vector<16x98xf32>
    tpu.vector_store %arg5[%c0_14, %c0_15], %29 {strides = array<i32>} : memref<16x98xf32, #tpu.memory_space<vmem>>, vector<16x98xf32>,
    return
  }
  func.func @transform_0(%arg0: i32) -> (i32, i32) {
    %c0_i32 = arith.constant 0 : i32
    %c0_i32_0 = arith.constant 0 : i32
    %c0_i32_1 = arith.constant 0 : i32
    return %c0_i32, %c0_i32_0 : i32, i32
  }
  func.func @transform_1(%arg0: i32) -> (i32, i32) {
    %c0_i32 = arith.constant 0 : i32
    %c0_i32_0 = arith.constant 0 : i32
    %c0_i32_1 = arith.constant 0 : i32
    return %c0_i32, %c0_i32_0 : i32, i32
  }
  func.func @transform_2(%arg0: i32) -> (i32, i32) {
    %c0_i32 = arith.constant 0 : i32
    %c0_i32_0 = arith.constant 0 : i32
    %c0_i32_1 = arith.constant 0 : i32
    return %c0_i32, %c0_i32_0 : i32, i32
  }
  func.func @transform_3(%arg0: i32) -> (i32, i32) {
    %c0_i32 = arith.constant 0 : i32
    %c0_i32_0 = arith.constant 0 : i32
    %c0_i32_1 = arith.constant 0 : i32
    return %c0_i32, %c0_i32_0 : i32, i32
  }
  func.func @transform_4(%arg0: i32) -> (i32, i32) {
    %c0_i32 = arith.constant 0 : i32
    %c0_i32_0 = arith.constant 0 : i32
    %c0_i32_1 = arith.constant 0 : i32
    return %c0_i32, %c0_i32_0 : i32, i32
  }
}

module attributes {stable_mosaic.version = 11 : i64} {
  func.func @_conv_bn_fused_kernel(%arg0: i32, %arg1: memref<16x8xbf16, #tpu.memory_space<vmem>>, %arg2: memref<8x98xbf16, #tpu.memory_space<vmem>>, %arg3: memref<16x1xf32, #tpu.memory_space<vmem>>, %arg4: memref<16x1xf32, #tpu.memory_space<vmem>>, %arg5: memref<16x98xf32, #tpu.memory_space<vmem>>) attributes {dimension_semantics = [#tpu.dimension_semantics<arbitrary>], iteration_bounds = array<i64: 1>, scalar_prefetch = 0 : i64, scratch_operands = 0 : i64, tpu.core_type = #tpu.core_type<tc>, window_params = [{pipeline_mode = #tpu.pipeline_mode<synchronous>, transform_indices = @transform_0, window_bounds = array<i64: 16, 8>}, {pipeline_mode = #tpu.pipeline_mode<synchronous>, transform_indices = @transform_1, window_bounds = array<i64: 8, 98>}, {pipeline_mode = #tpu.pipeline_mode<synchronous>, transform_indices = @transform_2, window_bounds = array<i64: 16, 1>}, {pipeline_mode = #tpu.pipeline_mode<synchronous>, transform_indices = @transform_3, window_bounds = array<i64: 16, 1>}, {pipeline_mode = #tpu.pipeline_mode<synchronous>, transform_indices = @transform_4, window_bounds = array<i64: 16, 98>}]} {
    %c0 = arith.constant 0 : index
    %c0_0 = arith.constant 0 : index
    %0 = vector.load %arg1[%c0, %c0_0] : memref<16x8xbf16, #tpu.memory_space<vmem>>, vector<16x8xbf16>
    %c0_1 = arith.constant 0 : index
    %c0_2 = arith.constant 0 : index
    %1 = vector.load %arg2[%c0_1, %c0_2] : memref<8x98xbf16, #tpu.memory_space<vmem>>, vector<8x98xbf16>
    %cst = arith.constant dense<0.000000e+00> : vector<16x98xf32>
    %2 = tpu.matmul %0, %1, %cst {dimension_numbers = #tpu.dot_dimension_numbers<[1], [0], [0], [1], [0, 0, 1, 1], [], []>} : vector<16x8xbf16>, vector<8x98xbf16>, vector<16x98xf32> -> vector<16x98xf32>
    %cst_3 = arith.constant dense<0.000000e+00> : vector<16xf32>
    %3 = vector.multi_reduction <add>, %2, %cst_3 [1] : vector<16x98xf32> to vector<16xf32>
    %4 = vector.shape_cast %3 : vector<16xf32> to vector<16x1xf32>
    %cst_4 = arith.constant 0.0102040814 : f32
    %5 = vector.broadcast %cst_4 : f32 to vector<16x1xf32>
    %6 = arith.mulf %4, %5 : vector<16x1xf32>
    %7 = arith.mulf %2, %2 : vector<16x98xf32>
    %cst_5 = arith.constant dense<0.000000e+00> : vector<16xf32>
    %8 = vector.multi_reduction <add>, %7, %cst_5 [1] : vector<16x98xf32> to vector<16xf32>
    %9 = vector.shape_cast %8 : vector<16xf32> to vector<16x1xf32>
    %cst_6 = arith.constant 0.0102040814 : f32
    %10 = vector.broadcast %cst_6 : f32 to vector<16x1xf32>
    %11 = arith.mulf %9, %10 : vector<16x1xf32>
    %12 = arith.mulf %6, %6 : vector<16x1xf32>
    %13 = arith.subf %11, %12 : vector<16x1xf32>
    %cst_7 = arith.constant 0.000000e+00 : f32
    %14 = vector.broadcast %cst_7 : f32 to vector<16x1xf32>
    %15 = arith.maximumf %13, %14 : vector<16x1xf32>
    %c0_8 = arith.constant 0 : index
    %c0_9 = arith.constant 0 : index
    %16 = vector.load %arg3[%c0_8, %c0_9] : memref<16x1xf32, #tpu.memory_space<vmem>>, vector<16x1xf32>
    %cst_10 = arith.constant 9.99999974E-6 : f32
    %17 = vector.broadcast %cst_10 : f32 to vector<16x1xf32>
    %18 = arith.addf %15, %17 : vector<16x1xf32>
    %19 = math.rsqrt %18 : vector<16x1xf32>
    %20 = arith.mulf %16, %19 : vector<16x1xf32>
    %c0_11 = arith.constant 0 : index
    %c0_12 = arith.constant 0 : index
    %21 = vector.load %arg4[%c0_11, %c0_12] : memref<16x1xf32, #tpu.memory_space<vmem>>, vector<16x1xf32>
    %22 = arith.mulf %6, %20 : vector<16x1xf32>
    %23 = arith.subf %21, %22 : vector<16x1xf32>
    %24 = vector.broadcast %20 : vector<16x1xf32> to vector<16x98xf32>
    %25 = arith.mulf %2, %24 : vector<16x98xf32>
    %26 = vector.broadcast %23 : vector<16x1xf32> to vector<16x98xf32>
    %27 = arith.addf %25, %26 : vector<16x98xf32>
    %c0_13 = arith.constant 0 : index
    %c0_14 = arith.constant 0 : index
    %28 = vector.load %arg5[%c0_13, %c0_14] : memref<16x98xf32, #tpu.memory_space<vmem>>, vector<16x98xf32>
    tpu.vector_store %arg5[%c0_13, %c0_14], %27 {strides = array<i32>} : memref<16x98xf32, #tpu.memory_space<vmem>>, vector<16x98xf32>,
    return
  }
  func.func @transform_0(%arg0: i32) -> (i32, i32) {
    %c0_i32 = arith.constant 0 : i32
    %c0_i32_0 = arith.constant 0 : i32
    %c0_i32_1 = arith.constant 0 : i32
    return %c0_i32, %c0_i32_0 : i32, i32
  }
  func.func @transform_1(%arg0: i32) -> (i32, i32) {
    %c0_i32 = arith.constant 0 : i32
    %c0_i32_0 = arith.constant 0 : i32
    %c0_i32_1 = arith.constant 0 : i32
    return %c0_i32, %c0_i32_0 : i32, i32
  }
  func.func @transform_2(%arg0: i32) -> (i32, i32) {
    %c0_i32 = arith.constant 0 : i32
    %c0_i32_0 = arith.constant 0 : i32
    %c0_i32_1 = arith.constant 0 : i32
    return %c0_i32, %c0_i32_0 : i32, i32
  }
  func.func @transform_3(%arg0: i32) -> (i32, i32) {
    %c0_i32 = arith.constant 0 : i32
    %c0_i32_0 = arith.constant 0 : i32
    %c0_i32_1 = arith.constant 0 : i32
    return %c0_i32, %c0_i32_0 : i32, i32
  }
  func.func @transform_4(%arg0: i32) -> (i32, i32) {
    %c0_i32 = arith.constant 0 : i32
    %c0_i32_0 = arith.constant 0 : i32
    %c0_i32_1 = arith.constant 0 : i32
    return %c0_i32, %c0_i32_0 : i32, i32
  }
}

module attributes {stable_mosaic.version = 11 : i64} {
  func.func @_conv_bn_fused_kernel(%arg0: i32, %arg1: memref<16x144xbf16, #tpu.memory_space<vmem>>, %arg2: memref<144x98xbf16, #tpu.memory_space<vmem>>, %arg3: memref<16x1xf32, #tpu.memory_space<vmem>>, %arg4: memref<16x1xf32, #tpu.memory_space<vmem>>, %arg5: memref<16x98xf32, #tpu.memory_space<vmem>>, %arg6: memref<16x98xf32, #tpu.memory_space<vmem>>) attributes {dimension_semantics = [#tpu.dimension_semantics<arbitrary>], iteration_bounds = array<i64: 1>, scalar_prefetch = 0 : i64, scratch_operands = 0 : i64, tpu.core_type = #tpu.core_type<tc>, window_params = [{pipeline_mode = #tpu.pipeline_mode<synchronous>, transform_indices = @transform_0, window_bounds = array<i64: 16, 144>}, {pipeline_mode = #tpu.pipeline_mode<synchronous>, transform_indices = @transform_1, window_bounds = array<i64: 144, 98>}, {pipeline_mode = #tpu.pipeline_mode<synchronous>, transform_indices = @transform_2, window_bounds = array<i64: 16, 1>}, {pipeline_mode = #tpu.pipeline_mode<synchronous>, transform_indices = @transform_3, window_bounds = array<i64: 16, 1>}, {pipeline_mode = #tpu.pipeline_mode<synchronous>, transform_indices = @transform_4, window_bounds = array<i64: 16, 98>}, {pipeline_mode = #tpu.pipeline_mode<synchronous>, transform_indices = @transform_5, window_bounds = array<i64: 16, 98>}]} {
    %c0 = arith.constant 0 : index
    %c0_0 = arith.constant 0 : index
    %0 = vector.load %arg1[%c0, %c0_0] : memref<16x144xbf16, #tpu.memory_space<vmem>>, vector<16x144xbf16>
    %c0_1 = arith.constant 0 : index
    %c0_2 = arith.constant 0 : index
    %1 = vector.load %arg2[%c0_1, %c0_2] : memref<144x98xbf16, #tpu.memory_space<vmem>>, vector<144x98xbf16>
    %cst = arith.constant dense<0.000000e+00> : vector<16x98xf32>
    %2 = tpu.matmul %0, %1, %cst {dimension_numbers = #tpu.dot_dimension_numbers<[1], [0], [0], [1], [0, 0, 1, 1], [], []>} : vector<16x144xbf16>, vector<144x98xbf16>, vector<16x98xf32> -> vector<16x98xf32>
    %cst_3 = arith.constant dense<0.000000e+00> : vector<16xf32>
    %3 = vector.multi_reduction <add>, %2, %cst_3 [1] : vector<16x98xf32> to vector<16xf32>
    %4 = vector.shape_cast %3 : vector<16xf32> to vector<16x1xf32>
    %cst_4 = arith.constant 0.0102040814 : f32
    %5 = vector.broadcast %cst_4 : f32 to vector<16x1xf32>
    %6 = arith.mulf %4, %5 : vector<16x1xf32>
    %7 = arith.mulf %2, %2 : vector<16x98xf32>
    %cst_5 = arith.constant dense<0.000000e+00> : vector<16xf32>
    %8 = vector.multi_reduction <add>, %7, %cst_5 [1] : vector<16x98xf32> to vector<16xf32>
    %9 = vector.shape_cast %8 : vector<16xf32> to vector<16x1xf32>
    %cst_6 = arith.constant 0.0102040814 : f32
    %10 = vector.broadcast %cst_6 : f32 to vector<16x1xf32>
    %11 = arith.mulf %9, %10 : vector<16x1xf32>
    %12 = arith.mulf %6, %6 : vector<16x1xf32>
    %13 = arith.subf %11, %12 : vector<16x1xf32>
    %cst_7 = arith.constant 0.000000e+00 : f32
    %14 = vector.broadcast %cst_7 : f32 to vector<16x1xf32>
    %15 = arith.maximumf %13, %14 : vector<16x1xf32>
    %c0_8 = arith.constant 0 : index
    %c0_9 = arith.constant 0 : index
    %16 = vector.load %arg3[%c0_8, %c0_9] : memref<16x1xf32, #tpu.memory_space<vmem>>, vector<16x1xf32>
    %cst_10 = arith.constant 9.99999974E-6 : f32
    %17 = vector.broadcast %cst_10 : f32 to vector<16x1xf32>
    %18 = arith.addf %15, %17 : vector<16x1xf32>
    %19 = math.rsqrt %18 : vector<16x1xf32>
    %20 = arith.mulf %16, %19 : vector<16x1xf32>
    %c0_11 = arith.constant 0 : index
    %c0_12 = arith.constant 0 : index
    %21 = vector.load %arg4[%c0_11, %c0_12] : memref<16x1xf32, #tpu.memory_space<vmem>>, vector<16x1xf32>
    %22 = arith.mulf %6, %20 : vector<16x1xf32>
    %23 = arith.subf %21, %22 : vector<16x1xf32>
    %24 = vector.broadcast %20 : vector<16x1xf32> to vector<16x98xf32>
    %25 = arith.mulf %2, %24 : vector<16x98xf32>
    %26 = vector.broadcast %23 : vector<16x1xf32> to vector<16x98xf32>
    %27 = arith.addf %25, %26 : vector<16x98xf32>
    %c0_13 = arith.constant 0 : index
    %c0_14 = arith.constant 0 : index
    %28 = vector.load %arg5[%c0_13, %c0_14] : memref<16x98xf32, #tpu.memory_space<vmem>>, vector<16x98xf32>
    %29 = arith.addf %27, %28 : vector<16x98xf32>
    %cst_15 = arith.constant 0.000000e+00 : f32
    %30 = vector.broadcast %cst_15 : f32 to vector<16x98xf32>
    %31 = arith.maximumf %29, %30 : vector<16x98xf32>
    %c0_16 = arith.constant 0 : index
    %c0_17 = arith.constant 0 : index
    %32 = vector.load %arg6[%c0_16, %c0_17] : memref<16x98xf32, #tpu.memory_space<vmem>>, vector<16x98xf32>
    tpu.vector_store %arg6[%c0_16, %c0_17], %31 {strides = array<i32>} : memref<16x98xf32, #tpu.memory_space<vmem>>, vector<16x98xf32>,
    return
  }
  func.func @transform_0(%arg0: i32) -> (i32, i32) {
    %c0_i32 = arith.constant 0 : i32
    %c0_i32_0 = arith.constant 0 : i32
    %c0_i32_1 = arith.constant 0 : i32
    return %c0_i32, %c0_i32_0 : i32, i32
  }
  func.func @transform_1(%arg0: i32) -> (i32, i32) {
    %c0_i32 = arith.constant 0 : i32
    %c0_i32_0 = arith.constant 0 : i32
    %c0_i32_1 = arith.constant 0 : i32
    return %c0_i32, %c0_i32_0 : i32, i32
  }
  func.func @transform_2(%arg0: i32) -> (i32, i32) {
    %c0_i32 = arith.constant 0 : i32
    %c0_i32_0 = arith.constant 0 : i32
    %c0_i32_1 = arith.constant 0 : i32
    return %c0_i32, %c0_i32_0 : i32, i32
  }
  func.func @transform_3(%arg0: i32) -> (i32, i32) {
    %c0_i32 = arith.constant 0 : i32
    %c0_i32_0 = arith.constant 0 : i32
    %c0_i32_1 = arith.constant 0 : i32
    return %c0_i32, %c0_i32_0 : i32, i32
  }
  func.func @transform_4(%arg0: i32) -> (i32, i32) {
    %c0_i32 = arith.constant 0 : i32
    %c0_i32_0 = arith.constant 0 : i32
    %c0_i32_1 = arith.constant 0 : i32
    return %c0_i32, %c0_i32_0 : i32, i32
  }
  func.func @transform_5(%arg0: i32) -> (i32, i32) {
    %c0_i32 = arith.constant 0 : i32
    %c0_i32_0 = arith.constant 0 : i32
    %c0_i32_1 = arith.constant 0 : i32
    return %c0_i32, %c0_i32_0 : i32, i32
  }
}

module attributes {stable_mosaic.version = 11 : i64} {
  func.func @_conv_bn_fused_kernel(%arg0: i32, %arg1: memref<32x144xbf16, #tpu.memory_space<vmem>>, %arg2: memref<144x32xbf16, #tpu.memory_space<vmem>>, %arg3: memref<32x1xf32, #tpu.memory_space<vmem>>, %arg4: memref<32x1xf32, #tpu.memory_space<vmem>>, %arg5: memref<32x32xf32, #tpu.memory_space<vmem>>) attributes {dimension_semantics = [#tpu.dimension_semantics<arbitrary>], iteration_bounds = array<i64: 1>, scalar_prefetch = 0 : i64, scratch_operands = 0 : i64, tpu.core_type = #tpu.core_type<tc>, window_params = [{pipeline_mode = #tpu.pipeline_mode<synchronous>, transform_indices = @transform_0, window_bounds = array<i64: 32, 144>}, {pipeline_mode = #tpu.pipeline_mode<synchronous>, transform_indices = @transform_1, window_bounds = array<i64: 144, 32>}, {pipeline_mode = #tpu.pipeline_mode<synchronous>, transform_indices = @transform_2, window_bounds = array<i64: 32, 1>}, {pipeline_mode = #tpu.pipeline_mode<synchronous>, transform_indices = @transform_3, window_bounds = array<i64: 32, 1>}, {pipeline_mode = #tpu.pipeline_mode<synchronous>, transform_indices = @transform_4, window_bounds = array<i64: 32, 32>}]} {
    %c0 = arith.constant 0 : index
    %c0_0 = arith.constant 0 : index
    %0 = vector.load %arg1[%c0, %c0_0] : memref<32x144xbf16, #tpu.memory_space<vmem>>, vector<32x144xbf16>
    %c0_1 = arith.constant 0 : index
    %c0_2 = arith.constant 0 : index
    %1 = vector.load %arg2[%c0_1, %c0_2] : memref<144x32xbf16, #tpu.memory_space<vmem>>, vector<144x32xbf16>
    %cst = arith.constant dense<0.000000e+00> : vector<32x32xf32>
    %2 = tpu.matmul %0, %1, %cst {dimension_numbers = #tpu.dot_dimension_numbers<[1], [0], [0], [1], [0, 0, 1, 1], [], []>} : vector<32x144xbf16>, vector<144x32xbf16>, vector<32x32xf32> -> vector<32x32xf32>
    %cst_3 = arith.constant dense<0.000000e+00> : vector<32xf32>
    %3 = vector.multi_reduction <add>, %2, %cst_3 [1] : vector<32x32xf32> to vector<32xf32>
    %4 = vector.shape_cast %3 : vector<32xf32> to vector<32x1xf32>
    %cst_4 = arith.constant 3.125000e-02 : f32
    %5 = vector.broadcast %cst_4 : f32 to vector<32x1xf32>
    %6 = arith.mulf %4, %5 : vector<32x1xf32>
    %7 = arith.mulf %2, %2 : vector<32x32xf32>
    %cst_5 = arith.constant dense<0.000000e+00> : vector<32xf32>
    %8 = vector.multi_reduction <add>, %7, %cst_5 [1] : vector<32x32xf32> to vector<32xf32>
    %9 = vector.shape_cast %8 : vector<32xf32> to vector<32x1xf32>
    %cst_6 = arith.constant 3.125000e-02 : f32
    %10 = vector.broadcast %cst_6 : f32 to vector<32x1xf32>
    %11 = arith.mulf %9, %10 : vector<32x1xf32>
    %12 = arith.mulf %6, %6 : vector<32x1xf32>
    %13 = arith.subf %11, %12 : vector<32x1xf32>
    %cst_7 = arith.constant 0.000000e+00 : f32
    %14 = vector.broadcast %cst_7 : f32 to vector<32x1xf32>
    %15 = arith.maximumf %13, %14 : vector<32x1xf32>
    %c0_8 = arith.constant 0 : index
    %c0_9 = arith.constant 0 : index
    %16 = vector.load %arg3[%c0_8, %c0_9] : memref<32x1xf32, #tpu.memory_space<vmem>>, vector<32x1xf32>
    %cst_10 = arith.constant 9.99999974E-6 : f32
    %17 = vector.broadcast %cst_10 : f32 to vector<32x1xf32>
    %18 = arith.addf %15, %17 : vector<32x1xf32>
    %19 = math.rsqrt %18 : vector<32x1xf32>
    %20 = arith.mulf %16, %19 : vector<32x1xf32>
    %c0_11 = arith.constant 0 : index
    %c0_12 = arith.constant 0 : index
    %21 = vector.load %arg4[%c0_11, %c0_12] : memref<32x1xf32, #tpu.memory_space<vmem>>, vector<32x1xf32>
    %22 = arith.mulf %6, %20 : vector<32x1xf32>
    %23 = arith.subf %21, %22 : vector<32x1xf32>
    %24 = vector.broadcast %20 : vector<32x1xf32> to vector<32x32xf32>
    %25 = arith.mulf %2, %24 : vector<32x32xf32>
    %26 = vector.broadcast %23 : vector<32x1xf32> to vector<32x32xf32>
    %27 = arith.addf %25, %26 : vector<32x32xf32>
    %cst_13 = arith.constant 0.000000e+00 : f32
    %28 = vector.broadcast %cst_13 : f32 to vector<32x32xf32>
    %29 = arith.maximumf %27, %28 : vector<32x32xf32>
    %c0_14 = arith.constant 0 : index
    %c0_15 = arith.constant 0 : index
    %30 = vector.load %arg5[%c0_14, %c0_15] : memref<32x32xf32, #tpu.memory_space<vmem>>, vector<32x32xf32>
    tpu.vector_store %arg5[%c0_14, %c0_15], %29 {strides = array<i32>} : memref<32x32xf32, #tpu.memory_space<vmem>>, vector<32x32xf32>,
    return
  }
  func.func @transform_0(%arg0: i32) -> (i32, i32) {
    %c0_i32 = arith.constant 0 : i32
    %c0_i32_0 = arith.constant 0 : i32
    %c0_i32_1 = arith.constant 0 : i32
    return %c0_i32, %c0_i32_0 : i32, i32
  }
  func.func @transform_1(%arg0: i32) -> (i32, i32) {
    %c0_i32 = arith.constant 0 : i32
    %c0_i32_0 = arith.constant 0 : i32
    %c0_i32_1 = arith.constant 0 : i32
    return %c0_i32, %c0_i32_0 : i32, i32
  }
  func.func @transform_2(%arg0: i32) -> (i32, i32) {
    %c0_i32 = arith.constant 0 : i32
    %c0_i32_0 = arith.constant 0 : i32
    %c0_i32_1 = arith.constant 0 : i32
    return %c0_i32, %c0_i32_0 : i32, i32
  }
  func.func @transform_3(%arg0: i32) -> (i32, i32) {
    %c0_i32 = arith.constant 0 : i32
    %c0_i32_0 = arith.constant 0 : i32
    %c0_i32_1 = arith.constant 0 : i32
    return %c0_i32, %c0_i32_0 : i32, i32
  }
  func.func @transform_4(%arg0: i32) -> (i32, i32) {
    %c0_i32 = arith.constant 0 : i32
    %c0_i32_0 = arith.constant 0 : i32
    %c0_i32_1 = arith.constant 0 : i32
    return %c0_i32, %c0_i32_0 : i32, i32
  }
}

module attributes {stable_mosaic.version = 11 : i64} {
  func.func @_conv_bn_fused_kernel(%arg0: i32, %arg1: memref<32x288xbf16, #tpu.memory_space<vmem>>, %arg2: memref<288x32xbf16, #tpu.memory_space<vmem>>, %arg3: memref<32x1xf32, #tpu.memory_space<vmem>>, %arg4: memref<32x1xf32, #tpu.memory_space<vmem>>, %arg5: memref<32x32xf32, #tpu.memory_space<vmem>>, %arg6: memref<32x32xf32, #tpu.memory_space<vmem>>) attributes {dimension_semantics = [#tpu.dimension_semantics<arbitrary>], iteration_bounds = array<i64: 1>, scalar_prefetch = 0 : i64, scratch_operands = 0 : i64, tpu.core_type = #tpu.core_type<tc>, window_params = [{pipeline_mode = #tpu.pipeline_mode<synchronous>, transform_indices = @transform_0, window_bounds = array<i64: 32, 288>}, {pipeline_mode = #tpu.pipeline_mode<synchronous>, transform_indices = @transform_1, window_bounds = array<i64: 288, 32>}, {pipeline_mode = #tpu.pipeline_mode<synchronous>, transform_indices = @transform_2, window_bounds = array<i64: 32, 1>}, {pipeline_mode = #tpu.pipeline_mode<synchronous>, transform_indices = @transform_3, window_bounds = array<i64: 32, 1>}, {pipeline_mode = #tpu.pipeline_mode<synchronous>, transform_indices = @transform_4, window_bounds = array<i64: 32, 32>}, {pipeline_mode = #tpu.pipeline_mode<synchronous>, transform_indices = @transform_5, window_bounds = array<i64: 32, 32>}]} {
    %c0 = arith.constant 0 : index
    %c0_0 = arith.constant 0 : index
    %0 = vector.load %arg1[%c0, %c0_0] : memref<32x288xbf16, #tpu.memory_space<vmem>>, vector<32x288xbf16>
    %c0_1 = arith.constant 0 : index
    %c0_2 = arith.constant 0 : index
    %1 = vector.load %arg2[%c0_1, %c0_2] : memref<288x32xbf16, #tpu.memory_space<vmem>>, vector<288x32xbf16>
    %cst = arith.constant dense<0.000000e+00> : vector<32x32xf32>
    %2 = tpu.matmul %0, %1, %cst {dimension_numbers = #tpu.dot_dimension_numbers<[1], [0], [0], [1], [0, 0, 1, 1], [], []>} : vector<32x288xbf16>, vector<288x32xbf16>, vector<32x32xf32> -> vector<32x32xf32>
    %cst_3 = arith.constant dense<0.000000e+00> : vector<32xf32>
    %3 = vector.multi_reduction <add>, %2, %cst_3 [1] : vector<32x32xf32> to vector<32xf32>
    %4 = vector.shape_cast %3 : vector<32xf32> to vector<32x1xf32>
    %cst_4 = arith.constant 3.125000e-02 : f32
    %5 = vector.broadcast %cst_4 : f32 to vector<32x1xf32>
    %6 = arith.mulf %4, %5 : vector<32x1xf32>
    %7 = arith.mulf %2, %2 : vector<32x32xf32>
    %cst_5 = arith.constant dense<0.000000e+00> : vector<32xf32>
    %8 = vector.multi_reduction <add>, %7, %cst_5 [1] : vector<32x32xf32> to vector<32xf32>
    %9 = vector.shape_cast %8 : vector<32xf32> to vector<32x1xf32>
    %cst_6 = arith.constant 3.125000e-02 : f32
    %10 = vector.broadcast %cst_6 : f32 to vector<32x1xf32>
    %11 = arith.mulf %9, %10 : vector<32x1xf32>
    %12 = arith.mulf %6, %6 : vector<32x1xf32>
    %13 = arith.subf %11, %12 : vector<32x1xf32>
    %cst_7 = arith.constant 0.000000e+00 : f32
    %14 = vector.broadcast %cst_7 : f32 to vector<32x1xf32>
    %15 = arith.maximumf %13, %14 : vector<32x1xf32>
    %c0_8 = arith.constant 0 : index
    %c0_9 = arith.constant 0 : index
    %16 = vector.load %arg3[%c0_8, %c0_9] : memref<32x1xf32, #tpu.memory_space<vmem>>, vector<32x1xf32>
    %cst_10 = arith.constant 9.99999974E-6 : f32
    %17 = vector.broadcast %cst_10 : f32 to vector<32x1xf32>
    %18 = arith.addf %15, %17 : vector<32x1xf32>
    %19 = math.rsqrt %18 : vector<32x1xf32>
    %20 = arith.mulf %16, %19 : vector<32x1xf32>
    %c0_11 = arith.constant 0 : index
    %c0_12 = arith.constant 0 : index
    %21 = vector.load %arg4[%c0_11, %c0_12] : memref<32x1xf32, #tpu.memory_space<vmem>>, vector<32x1xf32>
    %22 = arith.mulf %6, %20 : vector<32x1xf32>
    %23 = arith.subf %21, %22 : vector<32x1xf32>
    %24 = vector.broadcast %20 : vector<32x1xf32> to vector<32x32xf32>
    %25 = arith.mulf %2, %24 : vector<32x32xf32>
    %26 = vector.broadcast %23 : vector<32x1xf32> to vector<32x32xf32>
    %27 = arith.addf %25, %26 : vector<32x32xf32>
    %c0_13 = arith.constant 0 : index
    %c0_14 = arith.constant 0 : index
    %28 = vector.load %arg5[%c0_13, %c0_14] : memref<32x32xf32, #tpu.memory_space<vmem>>, vector<32x32xf32>
    %29 = arith.addf %27, %28 : vector<32x32xf32>
    %cst_15 = arith.constant 0.000000e+00 : f32
    %30 = vector.broadcast %cst_15 : f32 to vector<32x32xf32>
    %31 = arith.maximumf %29, %30 : vector<32x32xf32>
    %c0_16 = arith.constant 0 : index
    %c0_17 = arith.constant 0 : index
    %32 = vector.load %arg6[%c0_16, %c0_17] : memref<32x32xf32, #tpu.memory_space<vmem>>, vector<32x32xf32>
    tpu.vector_store %arg6[%c0_16, %c0_17], %31 {strides = array<i32>} : memref<32x32xf32, #tpu.memory_space<vmem>>, vector<32x32xf32>,
    return
  }
  func.func @transform_0(%arg0: i32) -> (i32, i32) {
    %c0_i32 = arith.constant 0 : i32
    %c0_i32_0 = arith.constant 0 : i32
    %c0_i32_1 = arith.constant 0 : i32
    return %c0_i32, %c0_i32_0 : i32, i32
  }
  func.func @transform_1(%arg0: i32) -> (i32, i32) {
    %c0_i32 = arith.constant 0 : i32
    %c0_i32_0 = arith.constant 0 : i32
    %c0_i32_1 = arith.constant 0 : i32
    return %c0_i32, %c0_i32_0 : i32, i32
  }
  func.func @transform_2(%arg0: i32) -> (i32, i32) {
    %c0_i32 = arith.constant 0 : i32
    %c0_i32_0 = arith.constant 0 : i32
    %c0_i32_1 = arith.constant 0 : i32
    return %c0_i32, %c0_i32_0 : i32, i32
  }
  func.func @transform_3(%arg0: i32) -> (i32, i32) {
    %c0_i32 = arith.constant 0 : i32
    %c0_i32_0 = arith.constant 0 : i32
    %c0_i32_1 = arith.constant 0 : i32
    return %c0_i32, %c0_i32_0 : i32, i32
  }
  func.func @transform_4(%arg0: i32) -> (i32, i32) {
    %c0_i32 = arith.constant 0 : i32
    %c0_i32_0 = arith.constant 0 : i32
    %c0_i32_1 = arith.constant 0 : i32
    return %c0_i32, %c0_i32_0 : i32, i32
  }
  func.func @transform_5(%arg0: i32) -> (i32, i32) {
    %c0_i32 = arith.constant 0 : i32
    %c0_i32_0 = arith.constant 0 : i32
    %c0_i32_1 = arith.constant 0 : i32
    return %c0_i32, %c0_i32_0 : i32, i32
  }
}

module attributes {stable_mosaic.version = 11 : i64} {
  func.func @_conv_bn_fused_kernel(%arg0: i32, %arg1: memref<32x16xbf16, #tpu.memory_space<vmem>>, %arg2: memref<16x32xbf16, #tpu.memory_space<vmem>>, %arg3: memref<32x1xf32, #tpu.memory_space<vmem>>, %arg4: memref<32x1xf32, #tpu.memory_space<vmem>>, %arg5: memref<32x32xf32, #tpu.memory_space<vmem>>) attributes {dimension_semantics = [#tpu.dimension_semantics<arbitrary>], iteration_bounds = array<i64: 1>, scalar_prefetch = 0 : i64, scratch_operands = 0 : i64, tpu.core_type = #tpu.core_type<tc>, window_params = [{pipeline_mode = #tpu.pipeline_mode<synchronous>, transform_indices = @transform_0, window_bounds = array<i64: 32, 16>}, {pipeline_mode = #tpu.pipeline_mode<synchronous>, transform_indices = @transform_1, window_bounds = array<i64: 16, 32>}, {pipeline_mode = #tpu.pipeline_mode<synchronous>, transform_indices = @transform_2, window_bounds = array<i64: 32, 1>}, {pipeline_mode = #tpu.pipeline_mode<synchronous>, transform_indices = @transform_3, window_bounds = array<i64: 32, 1>}, {pipeline_mode = #tpu.pipeline_mode<synchronous>, transform_indices = @transform_4, window_bounds = array<i64: 32, 32>}]} {
    %c0 = arith.constant 0 : index
    %c0_0 = arith.constant 0 : index
    %0 = vector.load %arg1[%c0, %c0_0] : memref<32x16xbf16, #tpu.memory_space<vmem>>, vector<32x16xbf16>
    %c0_1 = arith.constant 0 : index
    %c0_2 = arith.constant 0 : index
    %1 = vector.load %arg2[%c0_1, %c0_2] : memref<16x32xbf16, #tpu.memory_space<vmem>>, vector<16x32xbf16>
    %cst = arith.constant dense<0.000000e+00> : vector<32x32xf32>
    %2 = tpu.matmul %0, %1, %cst {dimension_numbers = #tpu.dot_dimension_numbers<[1], [0], [0], [1], [0, 0, 1, 1], [], []>} : vector<32x16xbf16>, vector<16x32xbf16>, vector<32x32xf32> -> vector<32x32xf32>
    %cst_3 = arith.constant dense<0.000000e+00> : vector<32xf32>
    %3 = vector.multi_reduction <add>, %2, %cst_3 [1] : vector<32x32xf32> to vector<32xf32>
    %4 = vector.shape_cast %3 : vector<32xf32> to vector<32x1xf32>
    %cst_4 = arith.constant 3.125000e-02 : f32
    %5 = vector.broadcast %cst_4 : f32 to vector<32x1xf32>
    %6 = arith.mulf %4, %5 : vector<32x1xf32>
    %7 = arith.mulf %2, %2 : vector<32x32xf32>
    %cst_5 = arith.constant dense<0.000000e+00> : vector<32xf32>
    %8 = vector.multi_reduction <add>, %7, %cst_5 [1] : vector<32x32xf32> to vector<32xf32>
    %9 = vector.shape_cast %8 : vector<32xf32> to vector<32x1xf32>
    %cst_6 = arith.constant 3.125000e-02 : f32
    %10 = vector.broadcast %cst_6 : f32 to vector<32x1xf32>
    %11 = arith.mulf %9, %10 : vector<32x1xf32>
    %12 = arith.mulf %6, %6 : vector<32x1xf32>
    %13 = arith.subf %11, %12 : vector<32x1xf32>
    %cst_7 = arith.constant 0.000000e+00 : f32
    %14 = vector.broadcast %cst_7 : f32 to vector<32x1xf32>
    %15 = arith.maximumf %13, %14 : vector<32x1xf32>
    %c0_8 = arith.constant 0 : index
    %c0_9 = arith.constant 0 : index
    %16 = vector.load %arg3[%c0_8, %c0_9] : memref<32x1xf32, #tpu.memory_space<vmem>>, vector<32x1xf32>
    %cst_10 = arith.constant 9.99999974E-6 : f32
    %17 = vector.broadcast %cst_10 : f32 to vector<32x1xf32>
    %18 = arith.addf %15, %17 : vector<32x1xf32>
    %19 = math.rsqrt %18 : vector<32x1xf32>
    %20 = arith.mulf %16, %19 : vector<32x1xf32>
    %c0_11 = arith.constant 0 : index
    %c0_12 = arith.constant 0 : index
    %21 = vector.load %arg4[%c0_11, %c0_12] : memref<32x1xf32, #tpu.memory_space<vmem>>, vector<32x1xf32>
    %22 = arith.mulf %6, %20 : vector<32x1xf32>
    %23 = arith.subf %21, %22 : vector<32x1xf32>
    %24 = vector.broadcast %20 : vector<32x1xf32> to vector<32x32xf32>
    %25 = arith.mulf %2, %24 : vector<32x32xf32>
    %26 = vector.broadcast %23 : vector<32x1xf32> to vector<32x32xf32>
    %27 = arith.addf %25, %26 : vector<32x32xf32>
    %c0_13 = arith.constant 0 : index
    %c0_14 = arith.constant 0 : index
    %28 = vector.load %arg5[%c0_13, %c0_14] : memref<32x32xf32, #tpu.memory_space<vmem>>, vector<32x32xf32>
    tpu.vector_store %arg5[%c0_13, %c0_14], %27 {strides = array<i32>} : memref<32x32xf32, #tpu.memory_space<vmem>>, vector<32x32xf32>,
    return
  }
  func.func @transform_0(%arg0: i32) -> (i32, i32) {
    %c0_i32 = arith.constant 0 : i32
    %c0_i32_0 = arith.constant 0 : i32
    %c0_i32_1 = arith.constant 0 : i32
    return %c0_i32, %c0_i32_0 : i32, i32
  }
  func.func @transform_1(%arg0: i32) -> (i32, i32) {
    %c0_i32 = arith.constant 0 : i32
    %c0_i32_0 = arith.constant 0 : i32
    %c0_i32_1 = arith.constant 0 : i32
    return %c0_i32, %c0_i32_0 : i32, i32
  }
  func.func @transform_2(%arg0: i32) -> (i32, i32) {
    %c0_i32 = arith.constant 0 : i32
    %c0_i32_0 = arith.constant 0 : i32
    %c0_i32_1 = arith.constant 0 : i32
    return %c0_i32, %c0_i32_0 : i32, i32
  }
  func.func @transform_3(%arg0: i32) -> (i32, i32) {
    %c0_i32 = arith.constant 0 : i32
    %c0_i32_0 = arith.constant 0 : i32
    %c0_i32_1 = arith.constant 0 : i32
    return %c0_i32, %c0_i32_0 : i32, i32
  }
  func.func @transform_4(%arg0: i32) -> (i32, i32) {
    %c0_i32 = arith.constant 0 : i32
    %c0_i32_0 = arith.constant 0 : i32
    %c0_i32_1 = arith.constant 0 : i32
    return %c0_i32, %c0_i32_0 : i32, i32
  }
}

module attributes {stable_mosaic.version = 11 : i64} {
  func.func @_pool_fc_kernel(%arg0: i32, %arg1: memref<32x2x16xf32, #tpu.memory_space<vmem>>, %arg2: memref<7x32xf32, #tpu.memory_space<vmem>>, %arg3: memref<7x1xf32, #tpu.memory_space<vmem>>, %arg4: memref<7x2xf32, #tpu.memory_space<vmem>>) attributes {dimension_semantics = [#tpu.dimension_semantics<arbitrary>], iteration_bounds = array<i64: 1>, scalar_prefetch = 0 : i64, scratch_operands = 0 : i64, tpu.core_type = #tpu.core_type<tc>, window_params = [{pipeline_mode = #tpu.pipeline_mode<synchronous>, transform_indices = @transform_0, window_bounds = array<i64: 32, 2, 16>}, {pipeline_mode = #tpu.pipeline_mode<synchronous>, transform_indices = @transform_1, window_bounds = array<i64: 7, 32>}, {pipeline_mode = #tpu.pipeline_mode<synchronous>, transform_indices = @transform_2, window_bounds = array<i64: 7, 1>}, {pipeline_mode = #tpu.pipeline_mode<synchronous>, transform_indices = @transform_3, window_bounds = array<i64: 7, 2>}]} {
    %c0 = arith.constant 0 : index
    %c0_0 = arith.constant 0 : index
    %c0_1 = arith.constant 0 : index
    %0 = vector.load %arg1[%c0, %c0_0, %c0_1] : memref<32x2x16xf32, #tpu.memory_space<vmem>>, vector<32x2x16xf32>
    %cst = arith.constant dense<0.000000e+00> : vector<32x2xf32>
    %1 = vector.multi_reduction <add>, %0, %cst [2] : vector<32x2x16xf32> to vector<32x2xf32>
    %cst_2 = arith.constant 1.600000e+01 : f32
    %2 = vector.broadcast %cst_2 : f32 to vector<32x2xf32>
    %3 = arith.divf %1, %2 : vector<32x2xf32>
    %c0_3 = arith.constant 0 : index
    %c0_4 = arith.constant 0 : index
    %4 = vector.load %arg2[%c0_3, %c0_4] : memref<7x32xf32, #tpu.memory_space<vmem>>, vector<7x32xf32>
    %cst_5 = arith.constant dense<0.000000e+00> : vector<7x2xf32>
    %5 = tpu.matmul %4, %3, %cst_5 {dimension_numbers = #tpu.dot_dimension_numbers<[1], [0], [0], [1], [0, 0, 1, 1], [], []>} : vector<7x32xf32>, vector<32x2xf32>, vector<7x2xf32> -> vector<7x2xf32>
    %c0_6 = arith.constant 0 : index
    %c0_7 = arith.constant 0 : index
    %6 = vector.load %arg3[%c0_6, %c0_7] : memref<7x1xf32, #tpu.memory_space<vmem>>, vector<7x1xf32>
    %7 = vector.broadcast %6 : vector<7x1xf32> to vector<7x2xf32>
    %8 = arith.addf %5, %7 : vector<7x2xf32>
    %c0_8 = arith.constant 0 : index
    %c0_9 = arith.constant 0 : index
    %9 = vector.load %arg4[%c0_8, %c0_9] : memref<7x2xf32, #tpu.memory_space<vmem>>, vector<7x2xf32>
    tpu.vector_store %arg4[%c0_8, %c0_9], %8 {strides = array<i32>} : memref<7x2xf32, #tpu.memory_space<vmem>>, vector<7x2xf32>,
    return
  }
  func.func @transform_0(%arg0: i32) -> (i32, i32, i32) {
    %c0_i32 = arith.constant 0 : i32
    %c0_i32_0 = arith.constant 0 : i32
    %c0_i32_1 = arith.constant 0 : i32
    %c0_i32_2 = arith.constant 0 : i32
    return %c0_i32, %c0_i32_0, %c0_i32_1 : i32, i32, i32
  }
  func.func @transform_1(%arg0: i32) -> (i32, i32) {
    %c0_i32 = arith.constant 0 : i32
    %c0_i32_0 = arith.constant 0 : i32
    %c0_i32_1 = arith.constant 0 : i32
    return %c0_i32, %c0_i32_0 : i32, i32
  }
  func.func @transform_2(%arg0: i32) -> (i32, i32) {
    %c0_i32 = arith.constant 0 : i32
    %c0_i32_0 = arith.constant 0 : i32
    %c0_i32_1 = arith.constant 0 : i32
    return %c0_i32, %c0_i32_0 : i32, i32
  }
  func.func @transform_3(%arg0: i32) -> (i32, i32) {
    %c0_i32 = arith.constant 0 : i32
    %c0_i32_0 = arith.constant 0 : i32
    %c0_i32_1 = arith.constant 0 : i32
    return %c0_i32, %c0_i32_0 : i32, i32
  }
}

</mosaic_0001>

<bundles_post_ra>
// kernel: _lambda_.11
= control target key start
LH: loop header
LB: loop body
LE: loop exit
PB: predicated region body
PF: predicated region fallthrough
CT: control target
= control target key end

     0   :  { %vm170_vm0 = vcmask 1043456   ;;  %vm171_vm1 = vcmask 1044480   ;;  %v662_v2 = vmov 65535   ;;  %vm166_vm2 = vcmask 203776   ;;  %s1017_s1 = inlined_call_operand.vmem [shape: bf16[25,1568], index: 1, kind: input, shape index: {}]   ;;  %s1018_s0 = inlined_call_operand.vmem [shape: bf16[8,25], index: 0, kind: input, shape index: {}]   ;;  %s1019_s2 = inlined_call_operand.vmem [shape: f32[8,1], index: 2, kind: input, shape index: {}]   ;;  %s1020_s3 = inlined_call_operand.vmem [shape: f32[8,1], index: 3, kind: input, shape index: {}]   ;;  %s1021_s4 = inlined_call_operand.vmem [shape: f32[8,1568], index: 4, kind: output, shape index: {}]  }
   0x1   :  { %v567_v0 = vld [vmem:[%s1017_s1 + $0x68] sm:$0xf]  ;;  %v649_v1 = vld [vmem:[%s1017_s1 + $0x98] sm:$0x10]  ;;  %v172_v3 = vsel %vm170_vm0, 4294967295, %v662_v2  ;;  %vm393_vm3 = vcmask 261120  }
   0x2   :  { %v568_v4 = vor.u32 %v649_v1, %v567_v0  ;;  %v695_v5 = vsel %vm171_vm1, %v172_v3, 0  ;;  %v643_v6 = vld [vmem:[%s1017_s1 + $0x6c] sm:$0xf]  ;;  %v569_v7 = vld [vmem:[%s1017_s1 + $0x9c] sm:$0x10] }
   0x3   :  { %v572_v8 = vor.u32 %v643_v6, %v569_v7  ;;  %v575_v9 = vld [vmem:[%s1017_s1 + $0x70] sm:$0xf]  ;;  %v650_v10 = vld [vmem:[%s1017_s1 + $0xa0] sm:$0x10]  ;;  %v644_v11 = vld [vmem:[%s1017_s1 + $0x74] sm:$0xf] }
   0x4   :  { %v175_v12 = vand.u32 %v568_v4, %v695_v5  ;;  %v576_v13 = vor.u32 %v650_v10, %v575_v9  ;;  %v577_v14 = vld [vmem:[%s1017_s1 + $0xa4] sm:$0x10]  ;;  %v515_v15 = vld [vmem:[%s1017_s1] sm:$0xf]  ;;  %v636_v16 = vld [vmem:[%s1017_s1 + $0x30] sm:$0xf0] }
   0x5   :  { %v178_v17 = vand.u32 %v572_v8, %v695_v5  ;;  %v580_v18 = vor.u32 %v644_v11, %v577_v14  ;;  %v630_v19 = vld [vmem:[%s1017_s1 + $0x4] sm:$0xf]  ;;  %v517_v20 = vld [vmem:[%s1017_s1 + $0x34] sm:$0xf0]  ;;  %v523_v21 = vld [vmem:[%s1017_s1 + $0x8] sm:$0xf]  ;;  %v516_v23 = vor.u32 %v636_v16, %v515_v15 }
   0x6   :  { %219 = vmatpush.bf16.msra.mxu0 %v175_v12  ;;  %v181_v22 = vand.u32 %v576_v13, %v695_v5  ;;  %v637_v24 = vld [vmem:[%s1017_s1 + $0x38] sm:$0xf0]  ;;  %v631_v25 = vld [vmem:[%s1017_s1 + $0xc] sm:$0xf]  ;;  %v525_v26 = vld [vmem:[%s1017_s1 + $0x3c] sm:$0xf0]  ;;  %v520_v28 = vor.u32 %v630_v19, %v517_v20 }
   0x7   :  { %232 = vmatpush.bf16.msra.mxu1 %v178_v17  ;;  %v184_v27 = vand.u32 %v580_v18, %v695_v5  ;;  %v583_v29 = vld [vmem:[%s1017_s1 + $0x78] sm:$0xf]  ;;  %v651_v30 = vld [vmem:[%s1017_s1 + $0xa8] sm:$0x10]  ;;  %v524_v31 = vor.u32 %v637_v24, %v523_v21  ;;  %v752_v32 = vld [vmem:[%s1018_s0] sm:$0xf]  ;;  %v528_v37 = vor.u32 %v631_v25, %v525_v26 }
   0x8   :  { %245 = vmatpush.bf16.msra.mxu2 %v181_v22  ;;  %v584_v33 = vor.u32 %v651_v30, %v583_v29  ;;  %v591_v34 = vld [vmem:[%s1017_s1 + $0x80] sm:$0xf]  ;;  %v652_v35 = vld [vmem:[%s1017_s1 + $0xb0] sm:$0x10]  ;;  %v531_v36 = vld [vmem:[%s1017_s1 + $0x10] sm:$0xf] }
   0x9   :  { %258 = vmatpush.bf16.msra.mxu3 %v184_v27  ;;  %v592_v38 = vor.u32 %v652_v35, %v591_v34  ;;  %v638_v39 = vld [vmem:[%s1017_s1 + $0x40] sm:$0xf0]  ;;  %v593_v41 = vld [vmem:[%s1017_s1 + $0xb4] sm:$0x10]  ;;  %v645_v44 = vld [vmem:[%s1017_s1 + $0x7c] sm:$0xf] }
   0xa   :  { %v646_v40 = vld [vmem:[%s1017_s1 + $0x84] sm:$0xf]  ;;  %220 = vmatpush.bf16.msra.mxu0 %v516_v23  ;;  %v187_v42 = vand.u32 %v584_v33, %v695_v5  ;;  %v585_v45 = vld [vmem:[%s1017_s1 + $0xac] sm:$0x10]  ;;  %v539_v46 = vld [vmem:[%s1017_s1 + $0x18] sm:$0xf]  ;;  %v532_v52 = vor.u32 %v638_v39, %v531_v36 }
   0xb   :  { %v596_v43 = vor.u32 %v646_v40, %v593_v41  ;;  %233 = vmatpush.bf16.msra.mxu1 %v520_v28  ;;  %v193_v47 = vand.u32 %v592_v38, %v695_v5  ;;  %v588_v48 = vor.u32 %v645_v44, %v585_v45  ;;  %v639_v49 = vld [vmem:[%s1017_s1 + $0x48] sm:$0xf0]  ;;  %v633_v50 = vld [vmem:[%s1017_s1 + $0x1c] sm:$0xf]  ;;  %v541_v51 = vld [vmem:[%s1017_s1 + $0x4c] sm:$0xf0] }
   0xc   :  { %246 = vmatpush.bf16.msra.mxu2 %v524_v31  ;;  %v632_v54 = vld [vmem:[%s1017_s1 + $0x14] sm:$0xf]  ;;  %v533_v55 = vld [vmem:[%s1017_s1 + $0x44] sm:$0xf0]  ;;  %v653_v58 = vld [vmem:[%s1017_s1 + $0xb8] sm:$0x10]  ;;  %v540_v61 = vor.u32 %v639_v49, %v539_v46  ;;  %v544_v3 = vor.u32 %v633_v50, %v541_v51 }
   0xd   :  { %v196_v53 = vand.u32 %v596_v43, %v695_v5  ;;  %v599_v56 = vld [vmem:[%s1017_s1 + $0x88] sm:$0xf]  ;;  %259 = vmatpush.bf16.msra.mxu3 %v528_v37  ;;  %617 = vmatmul.msk.bf16.vlgmr.msra.gmra.mxu0 %vm166_vm2, %v752_v32  ;;  %v190_v57 = vand.u32 %v588_v48, %v695_v5  ;;  %v607_v59 = vld [vmem:[%s1017_s1 + $0x90] sm:$0xf]  ;;  %v654_v60 = vld [vmem:[%s1017_s1 + $0xc0] sm:$0x10]  ;;  %v536_v13 = vor.u32 %v632_v54, %v533_v55 }
   0xe   :  { %271 = vmatpush.bf16.msrb.mxu0 %v187_v42  ;;  %618 = vmatmul.msk.bf16.vlgmr.msra.gmra.mxu1 %vm166_vm2, %v752_v32  ;;  %v600_v62 = vor.u32 %v653_v58, %v599_v56  ;;  %v608_v63 = vor.u32 %v654_v60, %v607_v59  ;;  %v547_v0 = vld [vmem:[%s1017_s1 + $0x20] sm:$0xf]  ;;  %v640_v1 = vld [vmem:[%s1017_s1 + $0x50] sm:$0xf0]  ;;  %v609_v4 = vld [vmem:[%s1017_s1 + $0xc4] sm:$0x10] }
   0xf   :  { %v648_v2 = vld [vmem:[%s1017_s1 + $0x94] sm:$0xf]  ;;  %619 = vmatmul.msk.bf16.vlgmr.msra.gmra.mxu2 %vm166_vm2, %v752_v32  ;;  %v647_v6 = vld [vmem:[%s1017_s1 + $0x8c] sm:$0xf]  ;;  %v601_v7 = vld [vmem:[%s1017_s1 + $0xbc] sm:$0x10]  ;;  %284 = vmatpush.bf16.msrb.mxu1 %v190_v57  ;;  %v548_v17 = vor.u32 %v640_v1, %v547_v0 }
  0x10   :  { %297 = vmatpush.bf16.msrb.mxu2 %v193_v47  ;;  %620 = vmatmul.msk.bf16.vlgmr.msra.gmra.mxu3 %vm166_vm2, %v752_v32  ;;  %v199_v8 = vand.u32 %v600_v62, %v695_v5  ;;  %v205_v9 = vand.u32 %v608_v63, %v695_v5  ;;  %v612_v10 = vor.u32 %v648_v2, %v609_v4  ;;  %v555_v11 = vld [vmem:[%s1017_s1 + $0x28] sm:$0xf]  ;;  %v641_v12 = vld [vmem:[%s1017_s1 + $0x58] sm:$0xf0]  ;;  %v635_v15 = vld [vmem:[%s1017_s1 + $0x2c] sm:$0xf] }
  0x11   :  { %310 = vmatpush.bf16.msrb.mxu3 %v196_v53  ;;  %v604_v14 = vor.u32 %v647_v6, %v601_v7  ;;  %v557_v16 = vld [vmem:[%s1017_s1 + $0x5c] sm:$0xf0]  ;;  %v634_v19 = vld [vmem:[%s1017_s1 + $0x24] sm:$0xf]  ;;  %v556_v21 = vor.u32 %v641_v12, %v555_v11  ;;  %v549_v22 = vld [vmem:[%s1017_s1 + $0x54] sm:$0xf0] }
  0x12   :  { %272 = vmatpush.bf16.msrb.mxu0 %v532_v52  ;;  %v208_v18 = vand.u32 %v612_v10, %v695_v5  ;;  %v615_v23 = vld [vmem:[%s1017_s1 + $0x98] sm:$0xf]  ;;  %v655_v24 = vld [vmem:[%s1017_s1 + $0xc8] sm:$0x10]  ;;  %v560_v25 = vor.u32 %v635_v15, %v557_v16  ;;  %v552_v26 = vor.u32 %v634_v19, %v549_v22  ;;  %v563_v29 = vld [vmem:[%s1017_s1 + $0x30] sm:$0xf] }
  0x13   :  { %v202_v20 = vand.u32 %v604_v14, %v695_v5  ;;  %285 = vmatpush.bf16.msrb.mxu1 %v536_v13  ;;  %v616_v27 = vor.u32 %v655_v24, %v615_v23  ;;  %v642_v30 = vld [vmem:[%s1017_s1 + $0x60] sm:$0xf0] }
  0x14   :  { %298 = vmatpush.bf16.msrb.mxu2 %v540_v61  ;;  %v564_v31 = vor.u32 %v642_v30, %v563_v29 }
  0x15   :  { %311 = vmatpush.bf16.msrb.mxu3 %v544_v3  ;;  %v211_v28 = vand.u32 %v616_v27, %v695_v5 }
  0x16   :  { %323 = vmatpush.bf16.msra.mxu0 %v199_v8 }
  0x17   :  { %336 = vmatpush.bf16.msra.mxu1 %v202_v20 }
  0x18   :  { %349 = vmatpush.bf16.msra.mxu2 %v205_v9 }
  0x19   :  { %362 = vmatpush.bf16.msra.mxu3 %v208_v18 }
  0x1a   :  { %324 = vmatpush.bf16.msra.mxu0 %v548_v17 }
  0x1b   :  { %337 = vmatpush.bf16.msra.mxu1 %v552_v26 }
  0x1c   :  { %350 = vmatpush.bf16.msra.mxu2 %v556_v21 }
  0x1d   :  { %363 = vmatpush.bf16.msra.mxu3 %v560_v25  ;;  %621 = vmatmul.msk.bf16.vlgmr.msrb.gmra.mxu0 %vm166_vm2, %v752_v32 }
  0x1e   :  { %622 = vmatmul.msk.bf16.vlgmr.msrb.gmra.mxu1 %vm166_vm2, %v752_v32  ;;  %375 = vmatpush.bf16.msrb.mxu0 %v211_v28 }
  0x1f   :  { %623 = vmatmul.msk.bf16.vlgmr.msrb.gmra.mxu2 %vm166_vm2, %v752_v32 }
  0x20   :  { %624 = vmatmul.msk.bf16.vlgmr.msrb.gmra.mxu3 %vm166_vm2, %v752_v32 }
  0x22   :  { %376 = vmatpush.bf16.msrb.mxu0 %v564_v31 }
  0x2d   :  { %625 = vmatmul.msk.bf16.vlgmr.msra.gmra.mxu0 %vm166_vm2, %v752_v32 }
  0x2e   :  { %626 = vmatmul.msk.bf16.vlgmr.msra.gmra.mxu1 %vm166_vm2, %v752_v32 }
  0x2f   :  { %627 = vmatmul.msk.bf16.vlgmr.msra.gmra.mxu2 %vm166_vm2, %v752_v32 }
  0x30   :  { %628 = vmatmul.msk.bf16.vlgmr.msra.gmra.mxu3 %vm166_vm2, %v752_v32 }
  0x3d   :  { %629 = vmatmul.msk.bf16.vlgmr.msrb.gmra.mxu0 %vm166_vm2, %v752_v32 }
  0x8a   :  { %v891_v5 = vpop.f32.mrf.mxu0 }
  0x8b   :  { %v893_v33 = vpop.f32.mrf.mxu1  ;;  %v399_v43 = vmul.f32 %v891_v5, %v891_v5 }
  0x8c   :  { %v382_v42 = vadd.f32 %v893_v33, %v891_v5  ;;  %v400_v44 = vmul.f32 %v893_v33, %v893_v33 }
  0x8e   :  { %v412_v51 = vadd.f32 %v400_v44, %v399_v43 }
  0x92   :  { %v895_v34 = vpop.f32.mrf.mxu2  ;;  %v224_v35 = vpop.f32.mrf.mxu0 }
  0x93   :  { %v897_v36 = vpop.f32.mrf.mxu3  ;;  %v237_v37 = vpop.f32.mrf.mxu1  ;;  %v383_v32 = vadd.f32 %v382_v42, %v895_v34  ;;  %v401_v45 = vmul.f32 %v895_v34, %v895_v34 }
  0x94   :  { %v402_v54 = vmul.f32 %v897_v36, %v897_v36  ;;  %v663_v37 = vmov 0  }
  0x95   :  { %v384_v46 = vadd.f32 %v383_v32, %v897_v36  ;;  %v413_v53 = vadd.f32 %v412_v51, %v401_v45  ;;  %658 = vset.pattern.permute.xlu1 %v663_v37  ;;  %659 = vset.pattern.permute.xlu0 %v663_v37 }
  0x97   :  { %v414_v57 = vadd.f32 %v413_v53, %v402_v54  ;;  %v431_v54 = vld [vmem:[%s1019_s2] sm:$0xff] }
  0x9a   :  { %v250_v38 = vpop.f32.mrf.mxu2  ;;  %v899_v39 = vpop.f32.mrf.mxu0 }
  0x9b   :  { %v263_v40 = vpop.f32.mrf.mxu3  ;;  %v901_v41 = vpop.f32.mrf.mxu1  ;;  %v385_v52 = vadd.f32 %v384_v46, %v899_v39  ;;  %v403_v55 = vmul.f32 %v899_v39, %v899_v39 }
  0x9c   :  { %v404_v0 = vmul.f32 %v901_v41, %v901_v41 }
  0x9d   :  { %v386_v56 = vadd.f32 %v385_v52, %v901_v41  ;;  %v415_v63 = vadd.f32 %v414_v57, %v403_v55 }
  0x9f   :  { %v416_v3 = vadd.f32 %v415_v63, %v404_v0 }
  0xa2   :  { %v913_v47 = vpop.f32.mrf.mxu2  ;;  %v276_v48 = vpop.f32.mrf.mxu0 }
  0xa3   :  { %v915_v49 = vpop.f32.mrf.mxu3  ;;  %v289_v50 = vpop.f32.mrf.mxu1  ;;  %v387_v58 = vadd.f32 %v386_v56, %v913_v47  ;;  %v405_v1 = vmul.f32 %v913_v47, %v913_v47 }
  0xa4   :  { %v406_v7 = vmul.f32 %v915_v49, %v915_v49 }
  0xa5   :  { %v388_v2 = vadd.f32 %v387_v58, %v915_v49  ;;  %v417_v6 = vadd.f32 %v416_v3, %v405_v1 }
  0xa7   :  { %v418_v14 = vadd.f32 %v417_v6, %v406_v7 }
  0xaa   :  { %v302_v59 = vpop.f32.mrf.mxu2  ;;  %v924_v60 = vpop.f32.mrf.mxu0 }
  0xab   :  { %v315_v61 = vpop.f32.mrf.mxu3  ;;  %v926_v62 = vpop.f32.mrf.mxu1  ;;  %v389_v4 = vadd.f32 %v388_v2, %v924_v60  ;;  %v407_v12 = vmul.f32 %v924_v60, %v924_v60  ;;  %v444_v59 = vld [vmem:[%s1020_s3] sm:$0xff] }
  0xac   :  { %v408_v17 = vmul.f32 %v926_v62, %v926_v62 }
  0xad   :  { %v390_v13 = vadd.f32 %v389_v4, %v926_v62  ;;  %v419_v16 = vadd.f32 %v418_v14, %v407_v12 }
  0xaf   :  { %v420_v24 = vadd.f32 %v419_v16, %v408_v17 }
  0xb2   :  { %v936_v8 = vpop.f32.mrf.mxu2  ;;  %v328_v9 = vpop.f32.mrf.mxu0 }
  0xb3   :  { %v938_v10 = vpop.f32.mrf.mxu3  ;;  %v341_v11 = vpop.f32.mrf.mxu1  ;;  %v391_v15 = vadd.f32 %v390_v13, %v936_v8  ;;  %v409_v18 = vmul.f32 %v936_v8, %v936_v8 }
  0xb4   :  { %v410_v27 = vmul.f32 %v938_v10, %v938_v10 }
  0xb5   :  { %v392_v21 = vadd.f32 %v391_v15, %v938_v10  ;;  %v421_v28 = vadd.f32 %v420_v24, %v409_v18 }
  0xb7   :  { %v422_v31 = vadd.f32 %v421_v28, %v410_v27 }
  0xba   :  { %v354_v19 = vpop.f32.mrf.mxu2  ;;  %v948_v20 = vpop.f32.mrf.mxu0 }
  0xbb   :  { %v367_v22 = vpop.f32.mrf.mxu3  ;;  %v394_v23 = vsel %vm393_vm3, %v948_v20, 0.0  ;;  %v411_v26 = vmul.f32 %v948_v20, %v948_v20 }
  0xbc   :  { %v395_v25 = vadd.f32 %v394_v23, %v392_v21 }
  0xbd   :  { %v423_v29 = vsel %vm393_vm3, %v411_v26, 0.0 }
  0xbe   :  { %396 = vadd.xlane.f32.xlu0 %v395_v25  ;;  %v424_v35 = vadd.f32 %v423_v29, %v422_v31 }
  0xc2   :  { %v380_v30 = vpop.f32.mrf.mxu0 }
  0xc6   :  { %425 = vadd.xlane.f32.xlu0 %v424_v35 }
 0x131   :  { %v397_v38 = vpop.xlane.xlu0 %396 }
 0x132   :  { %v398_v40 = vmul.f32 0.0006377551, %v397_v38 }
 0x134   :  { %v428_v32 = vmul.f32 %v398_v40, %v398_v40 }
 0x139   :  { %v426_v42 = vpop.xlane.xlu0 %425 }
 0x13a   :  { %v427_v43 = vmul.f32 0.0006377551, %v426_v42 }
 0x13c   :  { %v429_v44 = vsub.f32 %v427_v43, %v428_v32 }
 0x13e   :  { %v430_v45 = vmax.f32 %v429_v44, 0.0 }
 0x140   :  { %v432_v46 = vadd.f32 1e-05, %v430_v45 }
 0x142   :  { %660 = vrsqrt.f32 %v432_v46  ;;  %vm439_vm5 = vweird.f32 %v432_v46 }
 0x148   :  { %v661_v48 = vpop.eup %660 }
 0x149   :  { %v434_v50 = vmul.f32 %v661_v48, %v432_v46  ;;  %vm440_vm4 = vweird.f32 %v661_v48 }
 0x14a   :  { %vm441_vm6 = vmor %vm439_vm5, %vm440_vm4 }
 0x14b   :  { %v435_v51 = vmul.f32 %v661_v48, %v434_v50 }
 0x14d   :  { %v436_v52 = vmul.f32 0.5, %v435_v51 }
 0x14f   :  { %v437_v53 = vsub.f32 1.5, %v436_v52 }
 0x151   :  { %v438_v55 = vmul.f32 %v661_v48, %v437_v53 }
 0x153   :  { %v442_v56 = vsel %vm441_vm6, %v661_v48, %v438_v55 }
 0x154   :  { %v443_v57 = vmul.f32 %v442_v56, %v431_v54 }
 0x156   :  { %449 = vperm.xlu1 %658, %v443_v57   ;;  %v445_v58 = vmul.f32 %v443_v57, %v398_v40 }
 0x158   :  { %v446_v61 = vsub.f32 %v444_v59, %v445_v58 }
 0x15e   :  { %467 = vperm.xlu1 %658, %v446_v61  }
 0x1c8   :  { %v450_v63 = vpop.permute.xlu1 %449 }
 0x1c9   :  { %v452_v0 = vmul.f32 %v450_v63, %v891_v5  ;;  %v453_v1 = vmul.f32 %v450_v63, %v893_v33  ;;  %v454_v2 = vmul.f32 %v450_v63, %v895_v34  ;;  %v455_v3 = vmul.f32 %v450_v63, %v897_v36 }
 0x1ca   :  { %v456_v4 = vmul.f32 %v450_v63, %v899_v39  ;;  %v457_v6 = vmul.f32 %v450_v63, %v901_v41  ;;  %v458_v14 = vmul.f32 %v450_v63, %v913_v47  ;;  %v459_v5 = vmul.f32 %v450_v63, %v915_v49 }
 0x1cb   :  { %v460_v33 = vmul.f32 %v450_v63, %v924_v60  ;;  %v461_v39 = vmul.f32 %v450_v63, %v926_v62  ;;  %v462_v21 = vmul.f32 %v450_v63, %v936_v8  ;;  %v463_v47 = vmul.f32 %v450_v63, %v938_v10 }
 0x1cc   :  { %v464_v62 = vmul.f32 %v450_v63, %v948_v20 }
 0x1d0   :  { %v468_v7 = vpop.permute.xlu1 %467 }
 0x1d1   :  { %v470_v9 = vadd.f32 %v468_v7, %v452_v0  ;;  %v471_v11 = vadd.f32 %v468_v7, %v453_v1  ;;  %v472_v12 = vadd.f32 %v468_v7, %v454_v2  ;;  %v473_v13 = vadd.f32 %v468_v7, %v455_v3 }
 0x1d2   :  { %v474_v15 = vadd.f32 %v468_v7, %v456_v4  ;;  %v475_v16 = vadd.f32 %v468_v7, %v457_v6  ;;  %v476_v34 = vadd.f32 %v468_v7, %v458_v14  ;;  %v477_v41 = vadd.f32 %v468_v7, %v459_v5 }
 0x1d3   :  { %v483_v17 = vmax.f32 %v470_v9, 0.0  ;;  %v484_v36 = vmax.f32 %v471_v11, 0.0  ;;  %v485_v18 = vmax.f32 %v472_v12, 0.0  ;;  %v486_v19 = vmax.f32 %v473_v13, 0.0 }
 0x1d4   :  { %v478_v22 = vadd.f32 %v468_v7, %v460_v33  ;;  %v487_v23 = vmax.f32 %v474_v15, 0.0  ;;  %v479_v49 = vadd.f32 %v468_v7, %v461_v39  ;;  %v488_v60 = vmax.f32 %v475_v16, 0.0 }
 0x1d5   :  { %496 = vst [vmem:[%s1021_s4] sm:$0xff] %v483_v17  ;;  %v480_v24 = vadd.f32 %v468_v7, %v462_v21  ;;  %v489_v25 = vmax.f32 %v476_v34, 0.0  ;;  %v481_v8 = vadd.f32 %v468_v7, %v463_v47  ;;  %v490_v26 = vmax.f32 %v477_v41, 0.0 }
 0x1d6   :  { %497 = vst [vmem:[%s1021_s4 + $0x8] sm:$0xff] %v484_v36  ;;  %v482_v10 = vadd.f32 %v468_v7, %v464_v62  ;;  %v491_v27 = vmax.f32 %v478_v22, 0.0  ;;  %v492_v28 = vmax.f32 %v479_v49, 0.0 }
 0x1d7   :  { %498 = vst [vmem:[%s1021_s4 + $0x10] sm:$0xff] %v485_v18  ;;  %v493_v20 = vmax.f32 %v480_v24, 0.0  ;;  %v494_v29 = vmax.f32 %v481_v8, 0.0 }
 0x1d8   :  { %499 = vst [vmem:[%s1021_s4 + $0x18] sm:$0xff] %v486_v19  ;;  %v495_v30 = vmax.f32 %v482_v10, 0.0 }
 0x1d9   :  { %500 = vst [vmem:[%s1021_s4 + $0x20] sm:$0xff] %v487_v23 }
 0x1da   :  { %501 = vst [vmem:[%s1021_s4 + $0x28] sm:$0xff] %v488_v60 }
 0x1db   :  { %502 = vst [vmem:[%s1021_s4 + $0x30] sm:$0xff] %v489_v25 }
 0x1dc   :  { %503 = vst [vmem:[%s1021_s4 + $0x38] sm:$0xff] %v490_v26 }
 0x1dd   :  { %504 = vst [vmem:[%s1021_s4 + $0x40] sm:$0xff] %v491_v27 }
 0x1de   :  { %505 = vst [vmem:[%s1021_s4 + $0x48] sm:$0xff] %v492_v28 }
 0x1df   :  { %506 = vst [vmem:[%s1021_s4 + $0x50] sm:$0xff] %v493_v20 }
 0x1e0   :  { %507 = vst [vmem:[%s1021_s4 + $0x58] sm:$0xff] %v494_v29 }
 0x1e1   :  { %508 = vst.msk [vmem:[%s1021_s4 + $0x60] sm:$0xff] %vm393_vm3, %v495_v30 }

// kernel: _lambda_.12
= control target key start
LH: loop header
LB: loop body
LE: loop exit
PB: predicated region body
PF: predicated region fallthrough
CT: control target
= control target key end

     0   :  { %vm103_vm0 = vcmask 64512   ;;  %s279_s0 = inlined_call_operand.vmem [shape: f32[8,392], index: 0, kind: input, shape index: {}]   ;;  %s280_s1 = inlined_call_operand.vmem [shape: f32[8,392], index: 1, kind: input, shape index: {}]   ;;  %s281_s2 = inlined_call_operand.vmem [shape: f32[8,392], index: 2, kind: input, shape index: {}]   ;;  %s282_s3 = inlined_call_operand.vmem [shape: f32[8,392], index: 3, kind: input, shape index: {}]   ;;  %s283_s4 = inlined_call_operand.vmem [shape: f32[8,392], index: 4, kind: input, shape index: {}]   ;;  %s284_s5 = inlined_call_operand.vmem [shape: f32[8,392], index: 5, kind: input, shape index: {}]   ;;  %s285_s6 = inlined_call_operand.vmem [shape: f32[8,392], index: 6, kind: input, shape index: {}]   ;;  %s286_s7 = inlined_call_operand.vmem [shape: f32[8,392], index: 7, kind: input, shape index: {}]   ;;  %s287_s8 = inlined_call_operand.vmem [shape: f32[8,392], index: 8, kind: input, shape index: {}]   ;;  %s288_s9 = inlined_call_operand.vmem [shape: f32[8,392], index: 9, kind: output, shape index: {}]  }
   0x1   :  { %v32_v0 = vld [vmem:[%s279_s0] sm:$0xff]  ;;  %v33_v6 = vld [vmem:[%s279_s0 + $0x8] sm:$0xff]  ;;  %v34_v15 = vld [vmem:[%s279_s0 + $0x10] sm:$0xff] }
   0x2   :  { %v36_v1 = vld [vmem:[%s280_s1] sm:$0xff]  ;;  %v37_v7 = vld [vmem:[%s280_s1 + $0x8] sm:$0xff]  ;;  %v38_v16 = vld [vmem:[%s280_s1 + $0x10] sm:$0xff] }
   0x3   :  { %v44_v2 = vld [vmem:[%s281_s2] sm:$0xff]  ;;  %v40_v3 = vmax.f32 %v32_v0, %v36_v1  ;;  %v45_v8 = vld [vmem:[%s281_s2 + $0x8] sm:$0xff]  ;;  %v41_v10 = vmax.f32 %v33_v6, %v37_v7  ;;  %v46_v17 = vld [vmem:[%s281_s2 + $0x10] sm:$0xff]  ;;  %v42_v20 = vmax.f32 %v34_v15, %v38_v16 }
   0x4   :  { %v52_v4 = vld [vmem:[%s282_s3] sm:$0xff]  ;;  %v53_v13 = vld [vmem:[%s282_s3 + $0x8] sm:$0xff]  ;;  %v54_v24 = vld [vmem:[%s282_s3 + $0x10] sm:$0xff] }
   0x5   :  { %v48_v5 = vmax.f32 %v40_v3, %v44_v2  ;;  %v60_v9 = vld [vmem:[%s283_s4] sm:$0xff]  ;;  %v49_v14 = vmax.f32 %v41_v10, %v45_v8  ;;  %v61_v19 = vld [vmem:[%s283_s4 + $0x8] sm:$0xff]  ;;  %v50_v26 = vmax.f32 %v42_v20, %v46_v17  ;;  %v35_v27 = vld [vmem:[%s279_s0 + $0x18] sm:$0xff] }
   0x6   :  { %v68_v12 = vld [vmem:[%s284_s5] sm:$0xff]  ;;  %v69_v23 = vld [vmem:[%s284_s5 + $0x8] sm:$0xff]  ;;  %v39_v28 = vld [vmem:[%s280_s1 + $0x18] sm:$0xff] }
   0x7   :  { %v56_v11 = vmax.f32 %v48_v5, %v52_v4  ;;  %v76_v21 = vld [vmem:[%s285_s6] sm:$0xff]  ;;  %v57_v22 = vmax.f32 %v49_v14, %v53_v13  ;;  %v47_v29 = vld [vmem:[%s281_s2 + $0x18] sm:$0xff]  ;;  %v62_v32 = vld [vmem:[%s283_s4 + $0x10] sm:$0xff]  ;;  %v43_v33 = vmax.f32 %v35_v27, %v39_v28  ;;  %v58_v36 = vmax.f32 %v50_v26, %v54_v24 }
   0x8   :  { %v84_v30 = vld [vmem:[%s286_s7] sm:$0xff]  ;;  %v77_v35 = vld [vmem:[%s285_s6 + $0x8] sm:$0xff]  ;;  %v55_v37 = vld [vmem:[%s282_s3 + $0x18] sm:$0xff] }
   0x9   :  { %v64_v18 = vmax.f32 %v56_v11, %v60_v9  ;;  %v65_v31 = vmax.f32 %v57_v22, %v61_v19  ;;  %v92_v38 = vld [vmem:[%s287_s8] sm:$0xff]  ;;  %v70_v40 = vld [vmem:[%s284_s5 + $0x10] sm:$0xff]  ;;  %v51_v41 = vmax.f32 %v43_v33, %v47_v29  ;;  %v85_v43 = vld [vmem:[%s286_s7 + $0x8] sm:$0xff]  ;;  %v66_v44 = vmax.f32 %v58_v36, %v62_v32 }
   0xa   :  { %v63_v45 = vld [vmem:[%s283_s4 + $0x18] sm:$0xff]  ;;  %v78_v47 = vld [vmem:[%s285_s6 + $0x10] sm:$0xff]  ;;  %v93_v50 = vld [vmem:[%s287_s8 + $0x8] sm:$0xff] }
   0xb   :  { %v72_v25 = vmax.f32 %v64_v18, %v68_v12  ;;  %v73_v39 = vmax.f32 %v65_v31, %v69_v23  ;;  %v59_v48 = vmax.f32 %v51_v41, %v55_v37  ;;  %v74_v51 = vmax.f32 %v66_v44, %v70_v40  ;;  %v71_v52 = vld [vmem:[%s284_s5 + $0x18] sm:$0xff]  ;;  %v86_v54 = vld [vmem:[%s286_s7 + $0x10] sm:$0xff] }
   0xc   :  { %v79_v57 = vld [vmem:[%s285_s6 + $0x18] sm:$0xff]  ;;  %v94_v59 = vld [vmem:[%s287_s8 + $0x10] sm:$0xff] }
   0xd   :  { %v80_v34 = vmax.f32 %v72_v25, %v76_v21  ;;  %v81_v46 = vmax.f32 %v73_v39, %v77_v35  ;;  %v67_v55 = vmax.f32 %v59_v48, %v63_v45  ;;  %v82_v56 = vmax.f32 %v74_v51, %v78_v47  ;;  %v87_v62 = vld [vmem:[%s286_s7 + $0x18] sm:$0xff] }
   0xe   :  { %v95_v1 = vld [vmem:[%s287_s8 + $0x18] sm:$0xff] }
   0xf   :  { %v88_v42 = vmax.f32 %v80_v34, %v84_v30  ;;  %v89_v53 = vmax.f32 %v81_v46, %v85_v43  ;;  %v75_v60 = vmax.f32 %v67_v55, %v71_v52  ;;  %v90_v61 = vmax.f32 %v82_v56, %v86_v54 }
  0x11   :  { %v96_v49 = vmax.f32 %v88_v42, %v92_v38  ;;  %v97_v58 = vmax.f32 %v89_v53, %v93_v50  ;;  %v83_v63 = vmax.f32 %v75_v60, %v79_v57  ;;  %v98_v0 = vmax.f32 %v90_v61, %v94_v59 }
  0x13   :  { %100 = vst [vmem:[%s288_s9] sm:$0xff] %v96_v49  ;;  %v91_v2 = vmax.f32 %v83_v63, %v87_v62 }
  0x14   :  { %101 = vst [vmem:[%s288_s9 + $0x8] sm:$0xff] %v97_v58 }
  0x15   :  { %102 = vst [vmem:[%s288_s9 + $0x10] sm:$0xff] %v98_v0  ;;  %v99_v3 = vmax.f32 %v91_v2, %v95_v1 }
  0x17   :  { %104 = vst.msk [vmem:[%s288_s9 + $0x18] sm:$0xff] %vm103_vm0, %v99_v3 }

// kernel: _lambda_.13
= control target key start
LH: loop header
LB: loop body
LE: loop exit
PB: predicated region body
PF: predicated region fallthrough
CT: control target
= control target key end

     0   :  { %vm131_vm0 = vcmask 1043456   ;;  %vm127_vm1 = vcmask 588800   ;;  %vm198_vm2 = vcmask 64512   ;;  %s509_s1 = inlined_call_operand.vmem [shape: bf16[72,392], index: 1, kind: input, shape index: {}]   ;;  %s510_s0 = inlined_call_operand.vmem [shape: bf16[8,72], index: 0, kind: input, shape index: {}]   ;;  %s511_s2 = inlined_call_operand.vmem [shape: f32[8,1], index: 2, kind: input, shape index: {}]   ;;  %s512_s3 = inlined_call_operand.vmem [shape: f32[8,1], index: 3, kind: input, shape index: {}]   ;;  %s513_s4 = inlined_call_operand.vmem [shape: f32[8,392], index: 4, kind: output, shape index: {}]  }
   0x1   :  { %v35_v0 = vld [vmem:[%s509_s1 + $0x80] sm:$0xff]  ;;  %v36_v1 = vld [vmem:[%s509_s1 + $0x88] sm:$0xff]  ;;  %v346_v7 = vld [vmem:[%s509_s1 + $0x6c] sm:$0xf0] }
   0x2   :  { %v87_v2 = vunpack.c.l.b16 %v35_v0  ;;  %v88_v3 = vunpack.c.h.b16 %v35_v0  ;;  %v89_v4 = vunpack.c.l.b16 %v36_v1  ;;  %v90_v5 = vunpack.c.h.b16 %v36_v1  ;;  %v314_v6 = vld [vmem:[%s509_s1 + $0x60] sm:$0xf]  ;;  %v344_v12 = vld [vmem:[%s509_s1 + $0x64] sm:$0xf]  ;;  %v316_v13 = vld [vmem:[%s509_s1 + $0x70] sm:$0xf0] }
   0x3   :  { %v322_v14 = vld [vmem:[%s509_s1 + $0x68] sm:$0xf]  ;;  %v347_v15 = vld [vmem:[%s509_s1 + $0x74] sm:$0xf0]  ;;  %v345_v16 = vld [vmem:[%s509_s1 + $0x6c] sm:$0xf]  ;;  %v315_v22 = vor.u32 %v346_v7, %v314_v6  ;;  %v319_v23 = vor.u32 %v344_v12, %v316_v13 }
   0x4   :  { %v107_v8 = vpack.c.b16 %v87_v2, %v87_v2  ;;  %v108_v9 = vpack.c.b16 %v88_v3, %v88_v3  ;;  %v109_v10 = vpack.c.b16 %v89_v4, %v89_v4  ;;  %v110_v11 = vpack.c.b16 %v90_v5, %v90_v5  ;;  %v324_v17 = vld [vmem:[%s509_s1 + $0x78] sm:$0xf0]  ;;  %v298_v24 = vld [vmem:[%s509_s1 + $0x40] sm:$0xf]  ;;  %v342_v25 = vld [vmem:[%s509_s1 + $0x4c] sm:$0xf0] }
   0x5   :  { %v323_v26 = vor.u32 %v347_v15, %v322_v14  ;;  %v327_v27 = vor.u32 %v345_v16, %v324_v17  ;;  %v340_v28 = vld [vmem:[%s509_s1 + $0x44] sm:$0xf]  ;;  %v300_v29 = vld [vmem:[%s509_s1 + $0x50] sm:$0xf0]  ;;  %v306_v30 = vld [vmem:[%s509_s1 + $0x48] sm:$0xf]  ;;  %v299_v34 = vor.u32 %v342_v25, %v298_v24 }
   0x6   :  { %v133_v18 = vsel %vm131_vm0, %v107_v8, 0  ;;  %v136_v19 = vsel %vm131_vm0, %v108_v9, 0  ;;  %v139_v20 = vsel %vm131_vm0, %v109_v10, 0  ;;  %v142_v21 = vsel %vm131_vm0, %v110_v11, 0  ;;  %v343_v31 = vld [vmem:[%s509_s1 + $0x54] sm:$0xf0] }
   0x7   :  { %147 = vmatpush.bf16.msra.mxu0 %v133_v18  ;;  %160 = vmatpush.bf16.msra.mxu1 %v136_v19  ;;  %v341_v32 = vld [vmem:[%s509_s1 + $0x4c] sm:$0xf]  ;;  %v308_v33 = vld [vmem:[%s509_s1 + $0x58] sm:$0xf0]  ;;  %v303_v35 = vor.u32 %v340_v28, %v300_v29  ;;  %v282_v36 = vld [vmem:[%s509_s1 + $0x20] sm:$0xf]  ;;  %v307_v38 = vor.u32 %v343_v31, %v306_v30 }
   0x8   :  { %173 = vmatpush.bf16.msra.mxu2 %v139_v20  ;;  %186 = vmatpush.bf16.msra.mxu3 %v142_v21  ;;  %v338_v37 = vld [vmem:[%s509_s1 + $0x2c] sm:$0xf0]  ;;  %v311_v39 = vor.u32 %v341_v32, %v308_v33  ;;  %v336_v40 = vld [vmem:[%s509_s1 + $0x24] sm:$0xf]  ;;  %v284_v41 = vld [vmem:[%s509_s1 + $0x30] sm:$0xf0] }
   0x9   :  { %v290_v42 = vld [vmem:[%s509_s1 + $0x28] sm:$0xf]  ;;  %v339_v43 = vld [vmem:[%s509_s1 + $0x34] sm:$0xf0]  ;;  %v337_v44 = vld [vmem:[%s509_s1 + $0x2c] sm:$0xf]  ;;  %v283_v46 = vor.u32 %v338_v37, %v282_v36  ;;  %v287_v47 = vor.u32 %v336_v40, %v284_v41 }
   0xa   :  { %v292_v45 = vld [vmem:[%s509_s1 + $0x38] sm:$0xf0]  ;;  %v266_v48 = vld [vmem:[%s509_s1] sm:$0xf]  ;;  %v334_v49 = vld [vmem:[%s509_s1 + $0xc] sm:$0xf0]  ;;  %v291_v50 = vor.u32 %v339_v43, %v290_v42 }
   0xb   :  { %148 = vmatpush.bf16.msra.mxu0 %v315_v22  ;;  %161 = vmatpush.bf16.msra.mxu1 %v319_v23  ;;  %v295_v51 = vor.u32 %v337_v44, %v292_v45  ;;  %v332_v52 = vld [vmem:[%s509_s1 + $0x4] sm:$0xf]  ;;  %v268_v53 = vld [vmem:[%s509_s1 + $0x10] sm:$0xf0]  ;;  %v274_v54 = vld [vmem:[%s509_s1 + $0x8] sm:$0xf]  ;;  %v267_v58 = vor.u32 %v334_v49, %v266_v48 }
   0xc   :  { %174 = vmatpush.bf16.msra.mxu2 %v323_v26  ;;  %187 = vmatpush.bf16.msra.mxu3 %v327_v27  ;;  %v335_v55 = vld [vmem:[%s509_s1 + $0x14] sm:$0xf0]  ;;  %v333_v56 = vld [vmem:[%s509_s1 + $0xc] sm:$0xf]  ;;  %v276_v57 = vld [vmem:[%s509_s1 + $0x18] sm:$0xf0]  ;;  %v271_v59 = vor.u32 %v332_v52, %v268_v53 }
   0xd   :  { %v275_v60 = vor.u32 %v335_v55, %v274_v54  ;;  %v279_v61 = vor.u32 %v333_v56, %v276_v57  ;;  %v18_v62 = vld [vmem:[%s510_s0] sm:$0xf]  ;;  %v353_v19 = vmov 0  }
   0xe   :  { %349 = vset.pattern.permute.xlu1 %v353_v19  ;;  %350 = vset.pattern.permute.xlu0 %v353_v19  ;;  %v218_v33 = vld [vmem:[%s511_s2] sm:$0xff] }
   0xf   :  { %149 = vmatpush.bf16.msra.mxu0 %v299_v34  ;;  %162 = vmatpush.bf16.msra.mxu1 %v303_v35 }
  0x10   :  { %175 = vmatpush.bf16.msra.mxu2 %v307_v38  ;;  %188 = vmatpush.bf16.msra.mxu3 %v311_v39  ;;  %v231_v38 = vld [vmem:[%s512_s3] sm:$0xff] }
  0x13   :  { %150 = vmatpush.bf16.msra.mxu0 %v283_v46  ;;  %163 = vmatpush.bf16.msra.mxu1 %v287_v47 }
  0x14   :  { %176 = vmatpush.bf16.msra.mxu2 %v291_v50  ;;  %189 = vmatpush.bf16.msra.mxu3 %v295_v51 }
  0x17   :  { %151 = vmatpush.bf16.msra.mxu0 %v267_v58  ;;  %164 = vmatpush.bf16.msra.mxu1 %v271_v59 }
  0x18   :  { %177 = vmatpush.bf16.msra.mxu2 %v275_v60  ;;  %190 = vmatpush.bf16.msra.mxu3 %v279_v61 }
  0x1a   :  { %328 = vmatmul.msk.bf16.vlgmr.msra.gmra.mxu0 %vm127_vm1, %v18_v62  ;;  %329 = vmatmul.msk.bf16.vlgmr.msra.gmra.mxu1 %vm127_vm1, %v18_v62 }
  0x1b   :  { %330 = vmatmul.msk.bf16.vlgmr.msra.gmra.mxu2 %vm127_vm1, %v18_v62  ;;  %331 = vmatmul.msk.bf16.vlgmr.msra.gmra.mxu3 %vm127_vm1, %v18_v62 }
  0x97   :  { %v153_v63 = vpop.f32.mrf.mxu0  ;;  %v166_v0 = vpop.f32.mrf.mxu1 }
  0x98   :  { %v196_v1 = vadd.f32 %v166_v0, %v153_v63  ;;  %v204_v2 = vmul.f32 %v153_v63, %v153_v63  ;;  %v205_v3 = vmul.f32 %v166_v0, %v166_v0 }
  0x9a   :  { %v208_v12 = vadd.f32 %v205_v3, %v204_v2 }
  0x9e   :  { %v179_v4 = vpop.f32.mrf.mxu2  ;;  %v192_v5 = vpop.f32.mrf.mxu3 }
  0x9f   :  { %v155_v6 = vpop.f32.mrf.mxu0  ;;  %v168_v7 = vpop.f32.mrf.mxu1  ;;  %v197_v8 = vadd.f32 %v196_v1, %v179_v4  ;;  %v199_v9 = vsel %vm198_vm2, %v192_v5, 0.0  ;;  %v206_v10 = vmul.f32 %v179_v4, %v179_v4  ;;  %v207_v13 = vmul.f32 %v192_v5, %v192_v5 }
  0xa1   :  { %v200_v11 = vadd.f32 %v199_v9, %v197_v8  ;;  %v209_v14 = vadd.f32 %v208_v12, %v206_v10  ;;  %v210_v17 = vsel %vm198_vm2, %v207_v13, 0.0 }
  0xa3   :  { %201 = vadd.xlane.f32.xlu0 %v200_v11  ;;  %v211_v18 = vadd.f32 %v210_v17, %v209_v14 }
  0xa6   :  { %v181_v15 = vpop.f32.mrf.mxu2  ;;  %v194_v16 = vpop.f32.mrf.mxu3 }
  0xab   :  { %212 = vadd.xlane.f32.xlu0 %v211_v18 }
 0x116   :  { %v202_v20 = vpop.xlane.xlu0 %201 }
 0x117   :  { %v203_v21 = vmul.f32 0.0025510204, %v202_v20 }
 0x119   :  { %v215_v23 = vmul.f32 %v203_v21, %v203_v21 }
 0x11e   :  { %v213_v22 = vpop.xlane.xlu0 %212 }
 0x11f   :  { %v214_v24 = vmul.f32 0.0025510204, %v213_v22 }
 0x121   :  { %v216_v25 = vsub.f32 %v214_v24, %v215_v23 }
 0x123   :  { %v217_v26 = vmax.f32 %v216_v25, 0.0 }
 0x125   :  { %v219_v27 = vadd.f32 1e-05, %v217_v26 }
 0x127   :  { %351 = vrsqrt.f32 %v219_v27  ;;  %vm226_vm4 = vweird.f32 %v219_v27 }
 0x12d   :  { %v352_v28 = vpop.eup %351 }
 0x12e   :  { %v221_v29 = vmul.f32 %v352_v28, %v219_v27  ;;  %vm227_vm3 = vweird.f32 %v352_v28 }
 0x12f   :  { %vm228_vm5 = vmor %vm226_vm4, %vm227_vm3 }
 0x130   :  { %v222_v30 = vmul.f32 %v352_v28, %v221_v29 }
 0x132   :  { %v223_v31 = vmul.f32 0.5, %v222_v30 }
 0x134   :  { %v224_v32 = vsub.f32 1.5, %v223_v31 }
 0x136   :  { %v225_v34 = vmul.f32 %v352_v28, %v224_v32 }
 0x138   :  { %v229_v35 = vsel %vm228_vm5, %v352_v28, %v225_v34 }
 0x139   :  { %v230_v36 = vmul.f32 %v229_v35, %v218_v33 }
 0x13b   :  { %236 = vperm.xlu1 %349, %v230_v36   ;;  %v232_v37 = vmul.f32 %v230_v36, %v203_v21 }
 0x13d   :  { %v233_v39 = vsub.f32 %v231_v38, %v232_v37 }
 0x143   :  { %245 = vperm.xlu1 %349, %v233_v39  }
 0x1ad   :  { %v237_v40 = vpop.permute.xlu1 %236 }
 0x1ae   :  { %v239_v41 = vmul.f32 %v237_v40, %v153_v63  ;;  %v240_v42 = vmul.f32 %v237_v40, %v166_v0  ;;  %v241_v43 = vmul.f32 %v237_v40, %v179_v4  ;;  %v242_v44 = vmul.f32 %v237_v40, %v192_v5 }
 0x1b5   :  { %v246_v45 = vpop.permute.xlu1 %245 }
 0x1b6   :  { %v248_v46 = vadd.f32 %v246_v45, %v239_v41  ;;  %v249_v47 = vadd.f32 %v246_v45, %v240_v42  ;;  %v250_v48 = vadd.f32 %v246_v45, %v241_v43  ;;  %v251_v49 = vadd.f32 %v246_v45, %v242_v44 }
 0x1b8   :  { %v252_v50 = vmax.f32 %v248_v46, 0.0  ;;  %v253_v51 = vmax.f32 %v249_v47, 0.0  ;;  %v254_v52 = vmax.f32 %v250_v48, 0.0  ;;  %v255_v53 = vmax.f32 %v251_v49, 0.0 }
 0x1ba   :  { %256 = vst [vmem:[%s513_s4] sm:$0xff] %v252_v50 }
 0x1bb   :  { %257 = vst [vmem:[%s513_s4 + $0x8] sm:$0xff] %v253_v51 }
 0x1bc   :  { %258 = vst [vmem:[%s513_s4 + $0x10] sm:$0xff] %v254_v52 }
 0x1bd   :  { %259 = vst.msk [vmem:[%s513_s4 + $0x18] sm:$0xff] %vm198_vm2, %v255_v53 }

// kernel: _lambda_.14
= control target key start
LH: loop header
LB: loop body
LE: loop exit
PB: predicated region body
PF: predicated region fallthrough
CT: control target
= control target key end

     0   :  { %vm134_vm0 = vcmask 1043456   ;;  %vm130_vm1 = vcmask 588800   ;;  %vm201_vm2 = vcmask 64512   ;;  %s537_s1 = inlined_call_operand.vmem [shape: bf16[72,392], index: 1, kind: input, shape index: {}]   ;;  %s538_s0 = inlined_call_operand.vmem [shape: bf16[8,72], index: 0, kind: input, shape index: {}]   ;;  %s539_s2 = inlined_call_operand.vmem [shape: f32[8,1], index: 2, kind: input, shape index: {}]   ;;  %s540_s3 = inlined_call_operand.vmem [shape: f32[8,1], index: 3, kind: input, shape index: {}]   ;;  %s541_s4 = inlined_call_operand.vmem [shape: f32[8,392], index: 4, kind: input, shape index: {}]   ;;  %s542_s5 = inlined_call_operand.vmem [shape: f32[8,392], index: 5, kind: output, shape index: {}]  }
   0x1   :  { %v38_v0 = vld [vmem:[%s537_s1 + $0x80] sm:$0xff]  ;;  %v39_v1 = vld [vmem:[%s537_s1 + $0x88] sm:$0xff]  ;;  %v357_v7 = vld [vmem:[%s537_s1 + $0x6c] sm:$0xf0] }
   0x2   :  { %v90_v2 = vunpack.c.l.b16 %v38_v0  ;;  %v91_v3 = vunpack.c.h.b16 %v38_v0  ;;  %v92_v4 = vunpack.c.l.b16 %v39_v1  ;;  %v93_v5 = vunpack.c.h.b16 %v39_v1  ;;  %v325_v6 = vld [vmem:[%s537_s1 + $0x60] sm:$0xf]  ;;  %v355_v12 = vld [vmem:[%s537_s1 + $0x64] sm:$0xf]  ;;  %v327_v13 = vld [vmem:[%s537_s1 + $0x70] sm:$0xf0] }
   0x3   :  { %v333_v14 = vld [vmem:[%s537_s1 + $0x68] sm:$0xf]  ;;  %v358_v15 = vld [vmem:[%s537_s1 + $0x74] sm:$0xf0]  ;;  %v356_v16 = vld [vmem:[%s537_s1 + $0x6c] sm:$0xf]  ;;  %v326_v22 = vor.u32 %v357_v7, %v325_v6  ;;  %v330_v23 = vor.u32 %v355_v12, %v327_v13 }
   0x4   :  { %v110_v8 = vpack.c.b16 %v90_v2, %v90_v2  ;;  %v111_v9 = vpack.c.b16 %v91_v3, %v91_v3  ;;  %v112_v10 = vpack.c.b16 %v92_v4, %v92_v4  ;;  %v113_v11 = vpack.c.b16 %v93_v5, %v93_v5  ;;  %v335_v17 = vld [vmem:[%s537_s1 + $0x78] sm:$0xf0]  ;;  %v309_v24 = vld [vmem:[%s537_s1 + $0x40] sm:$0xf]  ;;  %v353_v25 = vld [vmem:[%s537_s1 + $0x4c] sm:$0xf0] }
   0x5   :  { %v334_v26 = vor.u32 %v358_v15, %v333_v14  ;;  %v338_v27 = vor.u32 %v356_v16, %v335_v17  ;;  %v351_v28 = vld [vmem:[%s537_s1 + $0x44] sm:$0xf]  ;;  %v311_v29 = vld [vmem:[%s537_s1 + $0x50] sm:$0xf0]  ;;  %v317_v30 = vld [vmem:[%s537_s1 + $0x48] sm:$0xf]  ;;  %v310_v34 = vor.u32 %v353_v25, %v309_v24 }
   0x6   :  { %v136_v18 = vsel %vm134_vm0, %v110_v8, 0  ;;  %v139_v19 = vsel %vm134_vm0, %v111_v9, 0  ;;  %v142_v20 = vsel %vm134_vm0, %v112_v10, 0  ;;  %v145_v21 = vsel %vm134_vm0, %v113_v11, 0  ;;  %v354_v31 = vld [vmem:[%s537_s1 + $0x54] sm:$0xf0] }
   0x7   :  { %150 = vmatpush.bf16.msra.mxu0 %v136_v18  ;;  %163 = vmatpush.bf16.msra.mxu1 %v139_v19  ;;  %v352_v32 = vld [vmem:[%s537_s1 + $0x4c] sm:$0xf]  ;;  %v319_v33 = vld [vmem:[%s537_s1 + $0x58] sm:$0xf0]  ;;  %v314_v35 = vor.u32 %v351_v28, %v311_v29  ;;  %v293_v36 = vld [vmem:[%s537_s1 + $0x20] sm:$0xf]  ;;  %v318_v38 = vor.u32 %v354_v31, %v317_v30 }
   0x8   :  { %176 = vmatpush.bf16.msra.mxu2 %v142_v20  ;;  %189 = vmatpush.bf16.msra.mxu3 %v145_v21  ;;  %v349_v37 = vld [vmem:[%s537_s1 + $0x2c] sm:$0xf0]  ;;  %v322_v39 = vor.u32 %v352_v32, %v319_v33  ;;  %v347_v40 = vld [vmem:[%s537_s1 + $0x24] sm:$0xf]  ;;  %v295_v41 = vld [vmem:[%s537_s1 + $0x30] sm:$0xf0] }
   0x9   :  { %v301_v42 = vld [vmem:[%s537_s1 + $0x28] sm:$0xf]  ;;  %v350_v43 = vld [vmem:[%s537_s1 + $0x34] sm:$0xf0]  ;;  %v348_v44 = vld [vmem:[%s537_s1 + $0x2c] sm:$0xf]  ;;  %v294_v46 = vor.u32 %v349_v37, %v293_v36  ;;  %v298_v47 = vor.u32 %v347_v40, %v295_v41 }
   0xa   :  { %v303_v45 = vld [vmem:[%s537_s1 + $0x38] sm:$0xf0]  ;;  %v277_v48 = vld [vmem:[%s537_s1] sm:$0xf]  ;;  %v345_v49 = vld [vmem:[%s537_s1 + $0xc] sm:$0xf0]  ;;  %v302_v50 = vor.u32 %v350_v43, %v301_v42 }
   0xb   :  { %151 = vmatpush.bf16.msra.mxu0 %v326_v22  ;;  %164 = vmatpush.bf16.msra.mxu1 %v330_v23  ;;  %v306_v51 = vor.u32 %v348_v44, %v303_v45  ;;  %v343_v52 = vld [vmem:[%s537_s1 + $0x4] sm:$0xf]  ;;  %v279_v53 = vld [vmem:[%s537_s1 + $0x10] sm:$0xf0]  ;;  %v285_v54 = vld [vmem:[%s537_s1 + $0x8] sm:$0xf]  ;;  %v278_v58 = vor.u32 %v345_v49, %v277_v48 }
   0xc   :  { %177 = vmatpush.bf16.msra.mxu2 %v334_v26  ;;  %190 = vmatpush.bf16.msra.mxu3 %v338_v27  ;;  %v346_v55 = vld [vmem:[%s537_s1 + $0x14] sm:$0xf0]  ;;  %v344_v56 = vld [vmem:[%s537_s1 + $0xc] sm:$0xf]  ;;  %v287_v57 = vld [vmem:[%s537_s1 + $0x18] sm:$0xf0]  ;;  %v282_v59 = vor.u32 %v343_v52, %v279_v53 }
   0xd   :  { %v286_v60 = vor.u32 %v346_v55, %v285_v54  ;;  %v290_v61 = vor.u32 %v344_v56, %v287_v57  ;;  %v21_v62 = vld [vmem:[%s538_s0] sm:$0xf]  ;;  %v364_v19 = vmov 0   ;;  %v258_v48 = vld [vmem:[%s541_s4 + $0x18] sm:$0xff] }
   0xe   :  { %360 = vset.pattern.permute.xlu1 %v364_v19  ;;  %361 = vset.pattern.permute.xlu0 %v364_v19  ;;  %v221_v33 = vld [vmem:[%s539_s2] sm:$0xff] }
   0xf   :  { %152 = vmatpush.bf16.msra.mxu0 %v310_v34  ;;  %165 = vmatpush.bf16.msra.mxu1 %v314_v35  ;;  %v255_v45 = vld [vmem:[%s541_s4] sm:$0xff] }
  0x10   :  { %178 = vmatpush.bf16.msra.mxu2 %v318_v38  ;;  %191 = vmatpush.bf16.msra.mxu3 %v322_v39  ;;  %v234_v38 = vld [vmem:[%s540_s3] sm:$0xff] }
  0x13   :  { %153 = vmatpush.bf16.msra.mxu0 %v294_v46  ;;  %166 = vmatpush.bf16.msra.mxu1 %v298_v47  ;;  %v256_v46 = vld [vmem:[%s541_s4 + $0x8] sm:$0xff]  ;;  %v257_v47 = vld [vmem:[%s541_s4 + $0x10] sm:$0xff] }
  0x14   :  { %179 = vmatpush.bf16.msra.mxu2 %v302_v50  ;;  %192 = vmatpush.bf16.msra.mxu3 %v306_v51 }
  0x17   :  { %154 = vmatpush.bf16.msra.mxu0 %v278_v58  ;;  %167 = vmatpush.bf16.msra.mxu1 %v282_v59 }
  0x18   :  { %180 = vmatpush.bf16.msra.mxu2 %v286_v60  ;;  %193 = vmatpush.bf16.msra.mxu3 %v290_v61 }
  0x1a   :  { %339 = vmatmul.msk.bf16.vlgmr.msra.gmra.mxu0 %vm130_vm1, %v21_v62  ;;  %340 = vmatmul.msk.bf16.vlgmr.msra.gmra.mxu1 %vm130_vm1, %v21_v62 }
  0x1b   :  { %341 = vmatmul.msk.bf16.vlgmr.msra.gmra.mxu2 %vm130_vm1, %v21_v62  ;;  %342 = vmatmul.msk.bf16.vlgmr.msra.gmra.mxu3 %vm130_vm1, %v21_v62 }
  0x97   :  { %v156_v63 = vpop.f32.mrf.mxu0  ;;  %v169_v0 = vpop.f32.mrf.mxu1 }
  0x98   :  { %v199_v1 = vadd.f32 %v169_v0, %v156_v63  ;;  %v207_v2 = vmul.f32 %v156_v63, %v156_v63  ;;  %v208_v3 = vmul.f32 %v169_v0, %v169_v0 }
  0x9a   :  { %v211_v12 = vadd.f32 %v208_v3, %v207_v2 }
  0x9e   :  { %v182_v4 = vpop.f32.mrf.mxu2  ;;  %v195_v5 = vpop.f32.mrf.mxu3 }
  0x9f   :  { %v158_v6 = vpop.f32.mrf.mxu0  ;;  %v171_v7 = vpop.f32.mrf.mxu1  ;;  %v200_v8 = vadd.f32 %v199_v1, %v182_v4  ;;  %v202_v9 = vsel %vm201_vm2, %v195_v5, 0.0  ;;  %v209_v10 = vmul.f32 %v182_v4, %v182_v4  ;;  %v210_v13 = vmul.f32 %v195_v5, %v195_v5 }
  0xa1   :  { %v203_v11 = vadd.f32 %v202_v9, %v200_v8  ;;  %v212_v14 = vadd.f32 %v211_v12, %v209_v10  ;;  %v213_v17 = vsel %vm201_vm2, %v210_v13, 0.0 }
  0xa3   :  { %204 = vadd.xlane.f32.xlu0 %v203_v11  ;;  %v214_v18 = vadd.f32 %v213_v17, %v212_v14 }
  0xa6   :  { %v184_v15 = vpop.f32.mrf.mxu2  ;;  %v197_v16 = vpop.f32.mrf.mxu3 }
  0xab   :  { %215 = vadd.xlane.f32.xlu0 %v214_v18 }
 0x116   :  { %v205_v20 = vpop.xlane.xlu0 %204 }
 0x117   :  { %v206_v21 = vmul.f32 0.0025510204, %v205_v20 }
 0x119   :  { %v218_v23 = vmul.f32 %v206_v21, %v206_v21 }
 0x11e   :  { %v216_v22 = vpop.xlane.xlu0 %215 }
 0x11f   :  { %v217_v24 = vmul.f32 0.0025510204, %v216_v22 }
 0x121   :  { %v219_v25 = vsub.f32 %v217_v24, %v218_v23 }
 0x123   :  { %v220_v26 = vmax.f32 %v219_v25, 0.0 }
 0x125   :  { %v222_v27 = vadd.f32 1e-05, %v220_v26 }
 0x127   :  { %362 = vrsqrt.f32 %v222_v27  ;;  %vm229_vm4 = vweird.f32 %v222_v27 }
 0x12d   :  { %v363_v28 = vpop.eup %362 }
 0x12e   :  { %v224_v29 = vmul.f32 %v363_v28, %v222_v27  ;;  %vm230_vm3 = vweird.f32 %v363_v28 }
 0x12f   :  { %vm231_vm5 = vmor %vm229_vm4, %vm230_vm3 }
 0x130   :  { %v225_v30 = vmul.f32 %v363_v28, %v224_v29 }
 0x132   :  { %v226_v31 = vmul.f32 0.5, %v225_v30 }
 0x134   :  { %v227_v32 = vsub.f32 1.5, %v226_v31 }
 0x136   :  { %v228_v34 = vmul.f32 %v363_v28, %v227_v32 }
 0x138   :  { %v232_v35 = vsel %vm231_vm5, %v363_v28, %v228_v34 }
 0x139   :  { %v233_v36 = vmul.f32 %v232_v35, %v221_v33 }
 0x13b   :  { %239 = vperm.xlu1 %360, %v233_v36   ;;  %v235_v37 = vmul.f32 %v233_v36, %v206_v21 }
 0x13d   :  { %v236_v39 = vsub.f32 %v234_v38, %v235_v37 }
 0x143   :  { %248 = vperm.xlu1 %360, %v236_v39  }
 0x1ad   :  { %v240_v40 = vpop.permute.xlu1 %239 }
 0x1ae   :  { %v242_v41 = vmul.f32 %v240_v40, %v156_v63  ;;  %v243_v42 = vmul.f32 %v240_v40, %v169_v0  ;;  %v244_v43 = vmul.f32 %v240_v40, %v182_v4  ;;  %v245_v44 = vmul.f32 %v240_v40, %v195_v5 }
 0x1b5   :  { %v249_v49 = vpop.permute.xlu1 %248 }
 0x1b6   :  { %v251_v50 = vadd.f32 %v249_v49, %v242_v41  ;;  %v252_v51 = vadd.f32 %v249_v49, %v243_v42  ;;  %v253_v52 = vadd.f32 %v249_v49, %v244_v43  ;;  %v254_v53 = vadd.f32 %v249_v49, %v245_v44 }
 0x1b8   :  { %v259_v54 = vadd.f32 %v255_v45, %v251_v50  ;;  %v260_v55 = vadd.f32 %v256_v46, %v252_v51  ;;  %v261_v56 = vadd.f32 %v257_v47, %v253_v52  ;;  %v262_v57 = vadd.f32 %v258_v48, %v254_v53 }
 0x1ba   :  { %v263_v58 = vmax.f32 %v259_v54, 0.0  ;;  %v264_v59 = vmax.f32 %v260_v55, 0.0  ;;  %v265_v60 = vmax.f32 %v261_v56, 0.0  ;;  %v266_v61 = vmax.f32 %v262_v57, 0.0 }
 0x1bc   :  { %267 = vst [vmem:[%s542_s5] sm:$0xff] %v263_v58 }
 0x1bd   :  { %268 = vst [vmem:[%s542_s5 + $0x8] sm:$0xff] %v264_v59 }
 0x1be   :  { %269 = vst [vmem:[%s542_s5 + $0x10] sm:$0xff] %v265_v60 }
 0x1bf   :  { %270 = vst.msk [vmem:[%s542_s5 + $0x18] sm:$0xff] %vm201_vm2, %v266_v61 }

// kernel: _lambda_.15
= control target key start
LH: loop header
LB: loop body
LE: loop exit
PB: predicated region body
PF: predicated region fallthrough
CT: control target
= control target key end

     0   :  { %vm65_vm0 = vcmask 1043456   ;;  %vm61_vm1 = vcmask 588800   ;;  %vm83_vm2 = vcmask 801792   ;;  %v206_v17 = vmov 0   ;;  %s286_s1 = inlined_call_operand.vmem [shape: bf16[72,98], index: 1, kind: input, shape index: {}]   ;;  %s287_s0 = inlined_call_operand.vmem [shape: bf16[16,72], index: 0, kind: input, shape index: {}]   ;;  %s288_s2 = inlined_call_operand.vmem [shape: f32[16,1], index: 2, kind: input, shape index: {}]   ;;  %s289_s3 = inlined_call_operand.vmem [shape: f32[16,1], index: 3, kind: input, shape index: {}]   ;;  %s290_s4 = inlined_call_operand.vmem [shape: f32[16,98], index: 4, kind: output, shape index: {}]  }
   0x1   :  { %v28_v0 = vld [vmem:[%s286_s1 + $0x20] sm:$0xf]  ;;  %v197_v4 = vld [vmem:[%s286_s1 + $0x18] sm:$0xff]  ;;  %v196_v5 = vld [vmem:[%s286_s1 + $0x10] sm:$0xff]  ;;  %199 = vset.pattern.permute.xlu2 %v206_v17  ;;  %200 = vset.pattern.permute.xlu0 %v206_v17 }
   0x2   :  { %v51_v1 = vunpack.c.l.b16 %v28_v0  ;;  %v195_v6 = vld [vmem:[%s286_s1 + $0x8] sm:$0xff]  ;;  %v194_v7 = vld [vmem:[%s286_s1] sm:$0xff]  ;;  %201 = vset.pattern.permute.xlu1 %v206_v17 }
   0x3   :  { %v193_v8 = vld [vmem:[%s287_s0] sm:$0xff]  ;;  %v109_v51 = vld [vmem:[%s288_s2 + $0x8] sm:$0xff] }
   0x4   :  { %v56_v2 = vpack.c.b16 %v51_v1, %v51_v1  ;;  %v108_v41 = vld [vmem:[%s288_s2] sm:$0xff]  ;;  %v135_v55 = vld [vmem:[%s289_s3 + $0x8] sm:$0xff] }
   0x5   :  { %v134_v47 = vld [vmem:[%s289_s3] sm:$0xff] }
   0x6   :  { %v67_v3 = vsel %vm65_vm0, %v56_v2, 0 }
   0x7   :  { %72 = vmatpush.bf16.msra.mxu0 %v67_v3 }
   0xb   :  { %73 = vmatpush.bf16.msra.mxu0 %v197_v4 }
   0xf   :  { %74 = vmatpush.bf16.msra.mxu0 %v196_v5 }
  0x13   :  { %75 = vmatpush.bf16.msra.mxu0 %v195_v6 }
  0x17   :  { %76 = vmatpush.bf16.msra.mxu0 %v194_v7 }
  0x1a   :  { %192 = vmatmul.msk.bf16.vlgmr.msra.gmra.mxu0 %vm61_vm1, %v193_v8 }
  0x97   :  { %v250_v9 = vpop.f32.mrf.mxu0 }
  0x98   :  { %v84_v10 = vsel %vm83_vm2, %v250_v9, 0.0  ;;  %v92_v11 = vmul.f32 %v250_v9, %v250_v9 }
  0x99   :  { %85 = vadd.xlane.f32.xlu0 %v84_v10 }
  0x9a   :  { %v94_v12 = vsel %vm83_vm2, %v92_v11, 0.0 }
  0x9b   :  { %95 = vadd.xlane.f32.xlu1 %v94_v12 }
  0x9f   :  { %v257_v13 = vpop.f32.mrf.mxu0 }
  0xa0   :  { %v93_v14 = vmul.f32 %v257_v13, %v257_v13  ;;  %v87_v15 = vsel %vm83_vm2, %v257_v13, 0.0 }
  0xa1   :  { %88 = vadd.xlane.f32.xlu0 %v87_v15 }
  0xa2   :  { %v97_v16 = vsel %vm83_vm2, %v93_v14, 0.0 }
  0xa3   :  { %98 = vadd.xlane.f32.xlu1 %v97_v16 }
 0x10c   :  { %v86_v18 = vpop.xlane.xlu0 %85 }
 0x10d   :  { %v90_v19 = vmul.f32 0.010204081, %v86_v18 }
 0x10e   :  { %v96_v20 = vpop.xlane.xlu1 %95 }
 0x10f   :  { %v102_v21 = vmul.f32 %v90_v19, %v90_v19  ;;  %v100_v22 = vmul.f32 0.010204081, %v96_v20 }
 0x111   :  { %v104_v23 = vsub.f32 %v100_v22, %v102_v21 }
 0x113   :  { %v106_v24 = vmax.f32 %v104_v23, 0.0 }
 0x114   :  { %v89_v25 = vpop.xlane.xlu0 %88 }
 0x115   :  { %v110_v26 = vadd.f32 1e-05, %v106_v24  ;;  %v91_v27 = vmul.f32 0.010204081, %v89_v25 }
 0x116   :  { %v99_v28 = vpop.xlane.xlu1 %98 }
 0x117   :  { %202 = vrsqrt.f32 %v110_v26  ;;  %v103_v29 = vmul.f32 %v91_v27, %v91_v27  ;;  %v101_v30 = vmul.f32 0.010204081, %v99_v28  ;;  %vm118_vm4 = vweird.f32 %v110_v26 }
 0x119   :  { %v105_v31 = vsub.f32 %v101_v30, %v103_v29 }
 0x11b   :  { %v107_v32 = vmax.f32 %v105_v31, 0.0 }
 0x11d   :  { %v203_v33 = vpop.eup %202  ;;  %v111_v34 = vadd.f32 1e-05, %v107_v32 }
 0x11e   :  { %v113_v35 = vmul.f32 %v203_v33, %v110_v26  ;;  %vm119_vm3 = vweird.f32 %v203_v33 }
 0x11f   :  { %204 = vrsqrt.f32 %v111_v34  ;;  %vm120_vm5 = vmor %vm118_vm4, %vm119_vm3  ;;  %vm128_vm7 = vweird.f32 %v111_v34 }
 0x120   :  { %v114_v36 = vmul.f32 %v203_v33, %v113_v35 }
 0x122   :  { %v115_v37 = vmul.f32 0.5, %v114_v36 }
 0x124   :  { %v116_v38 = vsub.f32 1.5, %v115_v37 }
 0x125   :  { %v205_v39 = vpop.eup %204 }
 0x126   :  { %v123_v40 = vmul.f32 %v205_v39, %v111_v34  ;;  %v117_v42 = vmul.f32 %v203_v33, %v116_v38  ;;  %vm129_vm6 = vweird.f32 %v205_v39 }
 0x127   :  { %vm130_vm8 = vmor %vm128_vm7, %vm129_vm6 }
 0x128   :  { %v124_v43 = vmul.f32 %v205_v39, %v123_v40  ;;  %v121_v44 = vsel %vm120_vm5, %v203_v33, %v117_v42 }
 0x129   :  { %v132_v45 = vmul.f32 %v121_v44, %v108_v41 }
 0x12a   :  { %v125_v46 = vmul.f32 0.5, %v124_v43 }
 0x12b   :  { %142 = vperm.xlu2 %199, %v132_v45   ;;  %v136_v48 = vmul.f32 %v132_v45, %v90_v19 }
 0x12c   :  { %v126_v49 = vsub.f32 1.5, %v125_v46 }
 0x12d   :  { %v138_v50 = vsub.f32 %v134_v47, %v136_v48 }
 0x12e   :  { %v127_v52 = vmul.f32 %v205_v39, %v126_v49 }
 0x12f   :  { %154 = vperm.xlu0 %200, %v138_v50  }
 0x130   :  { %v131_v53 = vsel %vm130_vm8, %v205_v39, %v127_v52 }
 0x131   :  { %v133_v54 = vmul.f32 %v131_v53, %v109_v51 }
 0x133   :  { %147 = vperm.xlu2 %199, %v133_v54   ;;  %v137_v56 = vmul.f32 %v133_v54, %v91_v27 }
 0x135   :  { %v139_v57 = vsub.f32 %v135_v55, %v137_v56 }
 0x137   :  { %159 = vperm.xlu1 %201, %v139_v57  }
 0x185   :  { %v143_v58 = vpop.permute.xlu2 %142 }
 0x186   :  { %v150_v59 = vmul.f32 %v143_v58, %v250_v9 }
 0x18d   :  { %v148_v63 = vpop.permute.xlu2 %147 }
 0x18e   :  { %v151_v0 = vmul.f32 %v148_v63, %v257_v13 }
 0x1a1   :  { %v155_v60 = vpop.permute.xlu0 %154 }
 0x1a2   :  { %v162_v61 = vadd.f32 %v155_v60, %v150_v59 }
 0x1a4   :  { %v164_v62 = vmax.f32 %v162_v61, 0.0 }
 0x1a6   :  { %166 = vst.msk [vmem:[%s290_s4] sm:$0xff] %vm83_vm2, %v164_v62 }
 0x1a9   :  { %v160_v1 = vpop.permute.xlu1 %159 }
 0x1aa   :  { %v163_v2 = vadd.f32 %v160_v1, %v151_v0 }
 0x1ac   :  { %v165_v3 = vmax.f32 %v163_v2, 0.0 }
 0x1ae   :  { %167 = vst.msk [vmem:[%s290_s4 + $0x8] sm:$0xff] %vm83_vm2, %v165_v3 }

// kernel: _lambda_.16
= control target key start
LH: loop header
LB: loop body
LE: loop exit
PB: predicated region body
PF: predicated region fallthrough
CT: control target
= control target key end

     0   :  { %vm30_vm0 = vcmask 1043456   ;;  %vm26_vm1 = vcmask 64512   ;;  %vm48_vm2 = vcmask 801792   ;;  %v149_v11 = vmov 0   ;;  %s217_s1 = inlined_call_operand.vmem [shape: bf16[8,98], index: 1, kind: input, shape index: {}]   ;;  %s218_s0 = inlined_call_operand.vmem [shape: bf16[16,8], index: 0, kind: input, shape index: {}]   ;;  %s219_s2 = inlined_call_operand.vmem [shape: f32[16,1], index: 2, kind: input, shape index: {}]   ;;  %s220_s3 = inlined_call_operand.vmem [shape: f32[16,1], index: 3, kind: input, shape index: {}]   ;;  %s221_s4 = inlined_call_operand.vmem [shape: f32[16,98], index: 4, kind: output, shape index: {}]  }
   0x1   :  { %v20_v0 = vld [vmem:[%s217_s1] sm:$0xf]  ;;  %142 = vset.pattern.permute.xlu2 %v149_v11  ;;  %143 = vset.pattern.permute.xlu0 %v149_v11  ;;  %v74_v45 = vld [vmem:[%s219_s2 + $0x8] sm:$0xff] }
   0x2   :  { %v32_v1 = vsel %vm30_vm0, %v20_v0, 0  ;;  %v140_v2 = vld [vmem:[%s218_s0] sm:$0xff]  ;;  %144 = vset.pattern.permute.xlu1 %v149_v11  ;;  %v100_v49 = vld [vmem:[%s220_s3 + $0x8] sm:$0xff] }
   0x3   :  { %41 = vmatpush.bf16.msra.mxu0 %v32_v1  ;;  %v73_v35 = vld [vmem:[%s219_s2] sm:$0xff] }
   0x4   :  { %v99_v41 = vld [vmem:[%s220_s3] sm:$0xff] }
   0x6   :  { %139 = vmatmul.msk.bf16.vlgmr.msra.gmra.mxu0 %vm26_vm1, %v140_v2 }
  0x83   :  { %v181_v3 = vpop.f32.mrf.mxu0 }
  0x84   :  { %v49_v4 = vsel %vm48_vm2, %v181_v3, 0.0  ;;  %v57_v5 = vmul.f32 %v181_v3, %v181_v3 }
  0x85   :  { %50 = vadd.xlane.f32.xlu0 %v49_v4 }
  0x86   :  { %v59_v6 = vsel %vm48_vm2, %v57_v5, 0.0 }
  0x87   :  { %60 = vadd.xlane.f32.xlu1 %v59_v6 }
  0x8b   :  { %v188_v7 = vpop.f32.mrf.mxu0 }
  0x8c   :  { %v58_v8 = vmul.f32 %v188_v7, %v188_v7  ;;  %v52_v9 = vsel %vm48_vm2, %v188_v7, 0.0 }
  0x8d   :  { %53 = vadd.xlane.f32.xlu0 %v52_v9 }
  0x8e   :  { %v62_v10 = vsel %vm48_vm2, %v58_v8, 0.0 }
  0x8f   :  { %63 = vadd.xlane.f32.xlu1 %v62_v10 }
  0xf8   :  { %v51_v12 = vpop.xlane.xlu0 %50 }
  0xf9   :  { %v55_v13 = vmul.f32 0.010204081, %v51_v12 }
  0xfa   :  { %v61_v14 = vpop.xlane.xlu1 %60 }
  0xfb   :  { %v67_v15 = vmul.f32 %v55_v13, %v55_v13  ;;  %v65_v16 = vmul.f32 0.010204081, %v61_v14 }
  0xfd   :  { %v69_v17 = vsub.f32 %v65_v16, %v67_v15 }
  0xff   :  { %v71_v18 = vmax.f32 %v69_v17, 0.0 }
 0x100   :  { %v54_v19 = vpop.xlane.xlu0 %53 }
 0x101   :  { %v75_v20 = vadd.f32 1e-05, %v71_v18  ;;  %v56_v21 = vmul.f32 0.010204081, %v54_v19 }
 0x102   :  { %v64_v22 = vpop.xlane.xlu1 %63 }
 0x103   :  { %145 = vrsqrt.f32 %v75_v20  ;;  %v68_v23 = vmul.f32 %v56_v21, %v56_v21  ;;  %v66_v24 = vmul.f32 0.010204081, %v64_v22  ;;  %vm83_vm4 = vweird.f32 %v75_v20 }
 0x105   :  { %v70_v25 = vsub.f32 %v66_v24, %v68_v23 }
 0x107   :  { %v72_v26 = vmax.f32 %v70_v25, 0.0 }
 0x109   :  { %v146_v27 = vpop.eup %145  ;;  %v76_v28 = vadd.f32 1e-05, %v72_v26 }
 0x10a   :  { %v78_v29 = vmul.f32 %v146_v27, %v75_v20  ;;  %vm84_vm3 = vweird.f32 %v146_v27 }
 0x10b   :  { %147 = vrsqrt.f32 %v76_v28  ;;  %vm85_vm5 = vmor %vm83_vm4, %vm84_vm3  ;;  %vm93_vm7 = vweird.f32 %v76_v28 }
 0x10c   :  { %v79_v30 = vmul.f32 %v146_v27, %v78_v29 }
 0x10e   :  { %v80_v31 = vmul.f32 0.5, %v79_v30 }
 0x110   :  { %v81_v32 = vsub.f32 1.5, %v80_v31 }
 0x111   :  { %v148_v33 = vpop.eup %147 }
 0x112   :  { %v88_v34 = vmul.f32 %v148_v33, %v76_v28  ;;  %v82_v36 = vmul.f32 %v146_v27, %v81_v32  ;;  %vm94_vm6 = vweird.f32 %v148_v33 }
 0x113   :  { %vm95_vm8 = vmor %vm93_vm7, %vm94_vm6 }
 0x114   :  { %v89_v37 = vmul.f32 %v148_v33, %v88_v34  ;;  %v86_v38 = vsel %vm85_vm5, %v146_v27, %v82_v36 }
 0x115   :  { %v97_v39 = vmul.f32 %v86_v38, %v73_v35 }
 0x116   :  { %v90_v40 = vmul.f32 0.5, %v89_v37 }
 0x117   :  { %107 = vperm.xlu2 %142, %v97_v39   ;;  %v101_v42 = vmul.f32 %v97_v39, %v55_v13 }
 0x118   :  { %v91_v43 = vsub.f32 1.5, %v90_v40 }
 0x119   :  { %v103_v44 = vsub.f32 %v99_v41, %v101_v42 }
 0x11a   :  { %v92_v46 = vmul.f32 %v148_v33, %v91_v43 }
 0x11b   :  { %119 = vperm.xlu0 %143, %v103_v44  }
 0x11c   :  { %v96_v47 = vsel %vm95_vm8, %v148_v33, %v92_v46 }
 0x11d   :  { %v98_v48 = vmul.f32 %v96_v47, %v74_v45 }
 0x11f   :  { %112 = vperm.xlu2 %142, %v98_v48   ;;  %v102_v50 = vmul.f32 %v98_v48, %v56_v21 }
 0x121   :  { %v104_v51 = vsub.f32 %v100_v49, %v102_v50 }
 0x123   :  { %124 = vperm.xlu1 %144, %v104_v51  }
 0x171   :  { %v108_v52 = vpop.permute.xlu2 %107 }
 0x172   :  { %v115_v53 = vmul.f32 %v108_v52, %v181_v3 }
 0x179   :  { %v113_v56 = vpop.permute.xlu2 %112 }
 0x17a   :  { %v116_v57 = vmul.f32 %v113_v56, %v188_v7 }
 0x18d   :  { %v120_v54 = vpop.permute.xlu0 %119 }
 0x18e   :  { %v127_v55 = vadd.f32 %v120_v54, %v115_v53 }
 0x190   :  { %129 = vst.msk [vmem:[%s221_s4] sm:$0xff] %vm48_vm2, %v127_v55 }
 0x195   :  { %v125_v58 = vpop.permute.xlu1 %124 }
 0x196   :  { %v128_v59 = vadd.f32 %v125_v58, %v116_v57 }
 0x198   :  { %130 = vst.msk [vmem:[%s221_s4 + $0x8] sm:$0xff] %vm48_vm2, %v128_v59 }

// kernel: _lambda_.17
= control target key start
LH: loop header
LB: loop body
LE: loop exit
PB: predicated region body
PF: predicated region fallthrough
CT: control target
= control target key end

     0   :  { %vm104_vm0 = vcmask 130048   ;;  %vm136_vm1 = vcmask 801792   ;;  %v293_v27 = vmov 0   ;;  %s405_s1 = inlined_call_operand.vmem [shape: bf16[144,98], index: 1, kind: input, shape index: {}]   ;;  %s406_s0 = inlined_call_operand.vmem [shape: bf16[16,144], index: 0, kind: input, shape index: {}]   ;;  %s407_s2 = inlined_call_operand.vmem [shape: f32[16,1], index: 2, kind: input, shape index: {}]   ;;  %s408_s3 = inlined_call_operand.vmem [shape: f32[16,1], index: 3, kind: input, shape index: {}]   ;;  %s409_s4 = inlined_call_operand.vmem [shape: f32[16,98], index: 4, kind: input, shape index: {}]   ;;  %s410_s5 = inlined_call_operand.vmem [shape: f32[16,98], index: 5, kind: output, shape index: {}]  }
   0x1   :  { %v283_v0 = vld [vmem:[%s405_s1 + $0x38] sm:$0xff]  ;;  %v282_v1 = vld [vmem:[%s405_s1 + $0x30] sm:$0xff]  ;;  %v284_v2 = vld [vmem:[%s405_s1 + $0x40] sm:$0xff]  ;;  %286 = vset.pattern.permute.xlu2 %v293_v27  ;;  %287 = vset.pattern.permute.xlu0 %v293_v27 }
   0x2   :  { %108 = vmatpush.bf16.msra.mxu0 %v283_v0  ;;  %v274_v3 = vld [vmem:[%s406_s0 + $0x4] sm:$0xf]  ;;  %v233_v4 = vld [vmem:[%s406_s0 + $0x8] sm:$0xf0]  ;;  %129 = vmatpush.bf16.msra.mxu1 %v284_v2  ;;  %v279_v8 = vld [vmem:[%s405_s1 + $0x18] sm:$0xff] }
   0x3   :  { %v236_v5 = vor.u32 %v274_v3, %v233_v4  ;;  %v281_v6 = vld [vmem:[%s405_s1 + $0x28] sm:$0xff]  ;;  %v280_v7 = vld [vmem:[%s405_s1 + $0x20] sm:$0xff]  ;;  %v278_v9 = vld [vmem:[%s405_s1 + $0x10] sm:$0xff]  ;;  %288 = vset.pattern.permute.xlu1 %v293_v27 }
   0x4   :  { %v277_v10 = vld [vmem:[%s405_s1 + $0x8] sm:$0xff]  ;;  %v276_v11 = vld [vmem:[%s405_s1] sm:$0xff] }
   0x5   :  { %273 = vmatmul.msk.bf16.vlgmr.msra.gmra.mxu1 %vm104_vm0, %v236_v5  ;;  %v231_v12 = vld [vmem:[%s406_s0] sm:$0xf]  ;;  %v275_v13 = vld [vmem:[%s406_s0 + $0x4] sm:$0xf0] }
   0x6   :  { %109 = vmatpush.bf16.msra.mxu0 %v282_v1  ;;  %v232_v14 = vor.u32 %v275_v13, %v231_v12  ;;  %v161_v51 = vld [vmem:[%s407_s2] sm:$0xff]  ;;  %v162_v61 = vld [vmem:[%s407_s2 + $0x8] sm:$0xff] }
   0x7   :  { %v187_v57 = vld [vmem:[%s408_s3] sm:$0xff]  ;;  %v188_v1 = vld [vmem:[%s408_s3 + $0x8] sm:$0xff] }
   0x8   :  { %v218_v13 = vld [vmem:[%s409_s4 + $0x8] sm:$0xff] }
   0xa   :  { %110 = vmatpush.bf16.msra.mxu0 %v281_v6  ;;  %v217_v6 = vld [vmem:[%s409_s4] sm:$0xff] }
   0xe   :  { %111 = vmatpush.bf16.msra.mxu0 %v280_v7 }
  0x12   :  { %112 = vmatpush.bf16.msra.mxu0 %v279_v8 }
  0x16   :  { %113 = vmatpush.bf16.msra.mxu0 %v278_v9 }
  0x1a   :  { %114 = vmatpush.bf16.msra.mxu0 %v277_v10 }
  0x1e   :  { %115 = vmatpush.bf16.msra.mxu0 %v276_v11 }
  0x21   :  { %116 = vmatmul.bf16.vlgmr.msra.gmra.mxu0 %v232_v14 }
  0x82   :  { %v131_v15 = vpop.f32.mrf.mxu1 }
  0x8a   :  { %v133_v21 = vpop.f32.mrf.mxu1 }
  0x9e   :  { %v117_v16 = vpop.f32.mrf.mxu0 }
  0x9f   :  { %v363_v17 = vadd.f32 %v131_v15, %v117_v16 }
  0xa1   :  { %v137_v18 = vsel %vm136_vm1, %v363_v17, 0.0  ;;  %v145_v19 = vmul.f32 %v363_v17, %v363_v17 }
  0xa2   :  { %138 = vadd.xlane.f32.xlu0 %v137_v18 }
  0xa3   :  { %v147_v20 = vsel %vm136_vm1, %v145_v19, 0.0 }
  0xa4   :  { %148 = vadd.xlane.f32.xlu1 %v147_v20 }
  0xa6   :  { %v119_v22 = vpop.f32.mrf.mxu0 }
  0xa7   :  { %v370_v23 = vadd.f32 %v133_v21, %v119_v22 }
  0xa9   :  { %v140_v24 = vsel %vm136_vm1, %v370_v23, 0.0  ;;  %v146_v25 = vmul.f32 %v370_v23, %v370_v23 }
  0xaa   :  { %141 = vadd.xlane.f32.xlu0 %v140_v24 }
  0xab   :  { %v150_v26 = vsel %vm136_vm1, %v146_v25, 0.0 }
  0xac   :  { %151 = vadd.xlane.f32.xlu1 %v150_v26 }
 0x115   :  { %v139_v28 = vpop.xlane.xlu0 %138 }
 0x116   :  { %v143_v29 = vmul.f32 0.010204081, %v139_v28 }
 0x117   :  { %v149_v30 = vpop.xlane.xlu1 %148 }
 0x118   :  { %v155_v31 = vmul.f32 %v143_v29, %v143_v29  ;;  %v153_v32 = vmul.f32 0.010204081, %v149_v30 }
 0x11a   :  { %v157_v33 = vsub.f32 %v153_v32, %v155_v31 }
 0x11c   :  { %v159_v34 = vmax.f32 %v157_v33, 0.0 }
 0x11d   :  { %v142_v35 = vpop.xlane.xlu0 %141 }
 0x11e   :  { %v163_v36 = vadd.f32 1e-05, %v159_v34  ;;  %v144_v37 = vmul.f32 0.010204081, %v142_v35 }
 0x11f   :  { %v152_v38 = vpop.xlane.xlu1 %151 }
 0x120   :  { %289 = vrsqrt.f32 %v163_v36  ;;  %v156_v39 = vmul.f32 %v144_v37, %v144_v37  ;;  %v154_v40 = vmul.f32 0.010204081, %v152_v38  ;;  %vm171_vm3 = vweird.f32 %v163_v36 }
 0x122   :  { %v158_v41 = vsub.f32 %v154_v40, %v156_v39 }
 0x124   :  { %v160_v42 = vmax.f32 %v158_v41, 0.0 }
 0x126   :  { %v290_v43 = vpop.eup %289  ;;  %v164_v44 = vadd.f32 1e-05, %v160_v42 }
 0x127   :  { %v166_v45 = vmul.f32 %v290_v43, %v163_v36  ;;  %vm172_vm2 = vweird.f32 %v290_v43 }
 0x128   :  { %291 = vrsqrt.f32 %v164_v44  ;;  %vm173_vm4 = vmor %vm171_vm3, %vm172_vm2  ;;  %vm181_vm6 = vweird.f32 %v164_v44 }
 0x129   :  { %v167_v46 = vmul.f32 %v290_v43, %v166_v45 }
 0x12b   :  { %v168_v47 = vmul.f32 0.5, %v167_v46 }
 0x12d   :  { %v169_v48 = vsub.f32 1.5, %v168_v47 }
 0x12e   :  { %v292_v49 = vpop.eup %291 }
 0x12f   :  { %v176_v50 = vmul.f32 %v292_v49, %v164_v44  ;;  %v170_v52 = vmul.f32 %v290_v43, %v169_v48  ;;  %vm182_vm5 = vweird.f32 %v292_v49 }
 0x130   :  { %vm183_vm7 = vmor %vm181_vm6, %vm182_vm5 }
 0x131   :  { %v177_v53 = vmul.f32 %v292_v49, %v176_v50  ;;  %v174_v54 = vsel %vm173_vm4, %v290_v43, %v170_v52 }
 0x132   :  { %v185_v55 = vmul.f32 %v174_v54, %v161_v51 }
 0x133   :  { %v178_v56 = vmul.f32 0.5, %v177_v53 }
 0x134   :  { %195 = vperm.xlu2 %286, %v185_v55   ;;  %v189_v58 = vmul.f32 %v185_v55, %v143_v29 }
 0x135   :  { %v179_v59 = vsub.f32 1.5, %v178_v56 }
 0x136   :  { %v191_v60 = vsub.f32 %v187_v57, %v189_v58 }
 0x137   :  { %v180_v62 = vmul.f32 %v292_v49, %v179_v59 }
 0x138   :  { %207 = vperm.xlu0 %287, %v191_v60  }
 0x139   :  { %v184_v63 = vsel %vm183_vm7, %v292_v49, %v180_v62 }
 0x13a   :  { %v186_v0 = vmul.f32 %v184_v63, %v162_v61 }
 0x13c   :  { %200 = vperm.xlu2 %286, %v186_v0   ;;  %v190_v2 = vmul.f32 %v186_v0, %v144_v37 }
 0x13e   :  { %v192_v3 = vsub.f32 %v188_v1, %v190_v2 }
 0x140   :  { %212 = vperm.xlu1 %288, %v192_v3  }
 0x18e   :  { %v196_v4 = vpop.permute.xlu2 %195 }
 0x18f   :  { %v203_v5 = vmul.f32 %v196_v4, %v363_v17 }
 0x196   :  { %v201_v10 = vpop.permute.xlu2 %200 }
 0x197   :  { %v204_v12 = vmul.f32 %v201_v10, %v370_v23 }
 0x1aa   :  { %v208_v7 = vpop.permute.xlu0 %207 }
 0x1ab   :  { %v215_v8 = vadd.f32 %v208_v7, %v203_v5 }
 0x1ad   :  { %v219_v9 = vadd.f32 %v217_v6, %v215_v8 }
 0x1af   :  { %v221_v11 = vmax.f32 %v219_v9, 0.0 }
 0x1b1   :  { %223 = vst.msk [vmem:[%s410_s5] sm:$0xff] %vm136_vm1, %v221_v11 }
 0x1b2   :  { %v213_v14 = vpop.permute.xlu1 %212 }
 0x1b3   :  { %v216_v15 = vadd.f32 %v213_v14, %v204_v12 }
 0x1b5   :  { %v220_v16 = vadd.f32 %v218_v13, %v216_v15 }
 0x1b7   :  { %v222_v17 = vmax.f32 %v220_v16, 0.0 }
 0x1b9   :  { %224 = vst.msk [vmem:[%s410_s5 + $0x8] sm:$0xff] %vm136_vm1, %v222_v17 }

// kernel: _lambda_.18
= control target key start
LH: loop header
LB: loop body
LE: loop exit
PB: predicated region body
PF: predicated region fallthrough
CT: control target
= control target key end

     0   :  { %vm112_vm0 = vcmask 130048   ;;  %vm157_vm1 = vcmask 261120   ;;  %v417_v45 = vmov 0   ;;  %s583_s1 = inlined_call_operand.vmem [shape: bf16[144,32], index: 1, kind: input, shape index: {}]   ;;  %s584_s0 = inlined_call_operand.vmem [shape: bf16[32,144], index: 0, kind: input, shape index: {}]   ;;  %s585_s2 = inlined_call_operand.vmem [shape: f32[32,1], index: 2, kind: input, shape index: {}]   ;;  %s586_s3 = inlined_call_operand.vmem [shape: f32[32,1], index: 3, kind: input, shape index: {}]   ;;  %s587_s4 = inlined_call_operand.vmem [shape: f32[32,32], index: 4, kind: output, shape index: {}]  }
   0x1   :  { %v395_v0 = vld [vmem:[%s583_s1 + $0x38] sm:$0xff]  ;;  %v396_v1 = vld [vmem:[%s583_s1 + $0x40] sm:$0xff]  ;;  %v394_v2 = vld [vmem:[%s583_s1 + $0x30] sm:$0xff]  ;;  %406 = vset.pattern.permute.xlu2 %v417_v45  ;;  %407 = vset.pattern.permute.xlu0 %v417_v45 }
   0x2   :  { %119 = vmatpush.bf16.msra.mxu0 %v395_v0  ;;  %397 = vmatpush.bf16.msra.mxu2 %v395_v0  ;;  %v384_v3 = vld [vmem:[%s584_s0 + $0x4] sm:$0xf]  ;;  %v334_v4 = vld [vmem:[%s584_s0 + $0x8] sm:$0xf0]  ;;  %v391_v8 = vld [vmem:[%s583_s1 + $0x18] sm:$0xff] }
   0x3   :  { %145 = vmatpush.bf16.msra.mxu1 %v396_v1  ;;  %v337_v5 = vor.u32 %v384_v3, %v334_v4  ;;  %v393_v6 = vld [vmem:[%s583_s1 + $0x28] sm:$0xff]  ;;  %v392_v7 = vld [vmem:[%s583_s1 + $0x20] sm:$0xff]  ;;  %v386_v9 = vld [vmem:[%s584_s0 + $0x14] sm:$0xf]  ;;  %408 = vset.pattern.permute.xlu1 %v417_v45 }
   0x4   :  { %v342_v10 = vld [vmem:[%s584_s0 + $0x18] sm:$0xf0]  ;;  %v390_v11 = vld [vmem:[%s583_s1 + $0x10] sm:$0xff]  ;;  %v389_v13 = vld [vmem:[%s583_s1 + $0x8] sm:$0xff] }
   0x5   :  { %v345_v12 = vor.u32 %v386_v9, %v342_v10  ;;  %v388_v14 = vld [vmem:[%s583_s1] sm:$0xff]  ;;  %v385_v16 = vld [vmem:[%s584_s0 + $0x4] sm:$0xf0]  ;;  %v340_v17 = vld [vmem:[%s584_s0 + $0x10] sm:$0xf] }
   0x6   :  { %120 = vmatpush.bf16.msra.mxu0 %v394_v2  ;;  %398 = vmatpush.bf16.msra.mxu2 %v394_v2  ;;  %v332_v15 = vld [vmem:[%s584_s0] sm:$0xf]  ;;  %v387_v18 = vld [vmem:[%s584_s0 + $0x14] sm:$0xf0] }
   0x7   :  { %382 = vmatmul.msk.bf16.vlgmr.msra.gmra.mxu1 %vm112_vm0, %v337_v5  ;;  %v333_v19 = vor.u32 %v385_v16, %v332_v15  ;;  %v341_v20 = vor.u32 %v387_v18, %v340_v17 }
   0xa   :  { %121 = vmatpush.bf16.msra.mxu0 %v393_v6  ;;  %399 = vmatpush.bf16.msra.mxu2 %v393_v6 }
   0xe   :  { %122 = vmatpush.bf16.msra.mxu0 %v392_v7  ;;  %400 = vmatpush.bf16.msra.mxu2 %v392_v7 }
  0x12   :  { %123 = vmatpush.bf16.msra.mxu0 %v391_v8  ;;  %401 = vmatpush.bf16.msra.mxu2 %v391_v8 }
  0x16   :  { %124 = vmatpush.bf16.msra.mxu0 %v390_v11  ;;  %402 = vmatpush.bf16.msra.mxu2 %v390_v11 }
  0x17   :  { %383 = vmatmul.msk.bf16.gmra.mxu1 %vm112_vm0, %v345_v12 }
  0x1a   :  { %125 = vmatpush.bf16.msra.mxu0 %v389_v13  ;;  %403 = vmatpush.bf16.msra.mxu2 %v389_v13 }
  0x1e   :  { %126 = vmatpush.bf16.msra.mxu0 %v388_v14  ;;  %404 = vmatpush.bf16.msra.mxu2 %v388_v14 }
  0x21   :  { %127 = vmatmul.bf16.vlgmr.msra.gmra.mxu0 %v333_v19  ;;  %132 = vmatmul.bf16.vlgmr.msra.gmra.mxu2 %v341_v20  ;;  %v206_v19 = vld [vmem:[%s585_s2] sm:$0xff] }
  0x84   :  { %v147_v21 = vpop.f32.mrf.mxu1 }
  0x8c   :  { %v149_v22 = vpop.f32.mrf.mxu1 }
  0x94   :  { %v152_v27 = vpop.f32.mrf.mxu1 }
  0x9c   :  { %v154_v37 = vpop.f32.mrf.mxu1 }
  0x9e   :  { %v128_v23 = vpop.f32.mrf.mxu0 }
  0x9f   :  { %v496_v24 = vadd.f32 %v147_v21, %v128_v23 }
  0xa1   :  { %v158_v25 = vsel %vm157_vm1, %v496_v24, 0.0  ;;  %v174_v26 = vmul.f32 %v496_v24, %v496_v24 }
  0xa2   :  { %159 = vadd.xlane.f32.xlu0 %v158_v25 }
  0xa3   :  { %v178_v28 = vsel %vm157_vm1, %v174_v26, 0.0 }
  0xa4   :  { %v133_v29 = vpop.f32.mrf.mxu2  ;;  %179 = vadd.xlane.f32.xlu2 %v178_v28 }
  0xa5   :  { %v503_v30 = vadd.f32 %v152_v27, %v133_v29 }
  0xa6   :  { %v130_v31 = vpop.f32.mrf.mxu0 }
  0xa7   :  { %v505_v32 = vadd.f32 %v149_v22, %v130_v31  ;;  %v164_v33 = vsel %vm157_vm1, %v503_v30, 0.0  ;;  %v176_v40 = vmul.f32 %v503_v30, %v503_v30 }
  0xa8   :  { %165 = vadd.xlane.f32.xlu1 %v164_v33 }
  0xa9   :  { %v161_v34 = vsel %vm157_vm1, %v505_v32, 0.0  ;;  %v175_v35 = vmul.f32 %v505_v32, %v505_v32  ;;  %v184_v42 = vsel %vm157_vm1, %v176_v40, 0.0 }
  0xaa   :  { %162 = vadd.xlane.f32.xlu0 %v161_v34 }
  0xab   :  { %v181_v36 = vsel %vm157_vm1, %v175_v35, 0.0  ;;  %v258_v35 = vld [vmem:[%s586_s3] sm:$0xff] }
  0xac   :  { %v135_v38 = vpop.f32.mrf.mxu2  ;;  %182 = vadd.xlane.f32.xlu2 %v181_v36  ;;  %v207_v36 = vld [vmem:[%s585_s2 + $0x8] sm:$0xff] }
  0xad   :  { %v514_v39 = vadd.f32 %v154_v37, %v135_v38 }
  0xaf   :  { %v167_v41 = vsel %vm157_vm1, %v514_v39, 0.0  ;;  %v177_v43 = vmul.f32 %v514_v39, %v514_v39 }
  0xb0   :  { %168 = vadd.xlane.f32.xlu1 %v167_v41 }
  0xb1   :  { %v187_v44 = vsel %vm157_vm1, %v177_v43, 0.0 }
  0xb2   :  { %185 = vadd.xlane.f32.xlu0 %v184_v42 }
  0xb8   :  { %188 = vadd.xlane.f32.xlu1 %v187_v44 }
 0x115   :  { %v160_v46 = vpop.xlane.xlu0 %159 }
 0x116   :  { %v170_v47 = vmul.f32 0.03125, %v160_v46 }
 0x117   :  { %v180_v48 = vpop.xlane.xlu2 %179 }
 0x118   :  { %v194_v49 = vmul.f32 %v170_v47, %v170_v47  ;;  %v190_v50 = vmul.f32 0.03125, %v180_v48 }
 0x11a   :  { %v198_v51 = vsub.f32 %v190_v50, %v194_v49 }
 0x11b   :  { %v166_v52 = vpop.xlane.xlu1 %165 }
 0x11c   :  { %v202_v53 = vmax.f32 %v198_v51, 0.0  ;;  %v528_v60 = vmul.f32 0.03125, %v166_v52 }
 0x11d   :  { %v163_v54 = vpop.xlane.xlu0 %162 }
 0x11e   :  { %v210_v55 = vadd.f32 1e-05, %v202_v53  ;;  %v524_v56 = vmul.f32 0.03125, %v163_v54  ;;  %v196_v2 = vmul.f32 %v528_v60, %v528_v60  ;;  %v209_v53 = vld [vmem:[%s585_s2 + $0x18] sm:$0xff] }
 0x11f   :  { %v183_v57 = vpop.xlane.xlu2 %182 }
 0x120   :  { %409 = vrsqrt.f32 %v210_v55  ;;  %v195_v58 = vmul.f32 %v524_v56, %v524_v56  ;;  %v191_v59 = vmul.f32 0.03125, %v183_v57  ;;  %vm220_vm3 = vweird.f32 %v210_v55 }
 0x122   :  { %v199_v61 = vsub.f32 %v191_v59, %v195_v58  ;;  %v259_v58 = vld [vmem:[%s586_s3 + $0x8] sm:$0xff] }
 0x123   :  { %v169_v62 = vpop.xlane.xlu1 %168 }
 0x124   :  { %v203_v63 = vmax.f32 %v199_v61, 0.0  ;;  %v532_v6 = vmul.f32 0.03125, %v169_v62 }
 0x125   :  { %v186_v0 = vpop.xlane.xlu0 %185 }
 0x126   :  { %v410_v1 = vpop.eup %409  ;;  %v211_v3 = vadd.f32 1e-05, %v203_v63  ;;  %v192_v4 = vmul.f32 0.03125, %v186_v0  ;;  %v197_v12 = vmul.f32 %v532_v6, %v532_v6  ;;  %v260_v63 = vld [vmem:[%s586_s3 + $0x10] sm:$0xff] }
 0x127   :  { %v215_v5 = vmul.f32 %v410_v1, %v210_v55  ;;  %vm221_vm2 = vweird.f32 %v410_v1 }
 0x128   :  { %411 = vrsqrt.f32 %v211_v3  ;;  %v200_v7 = vsub.f32 %v192_v4, %v196_v2  ;;  %vm222_vm4 = vmor %vm220_vm3, %vm221_vm2  ;;  %vm230_vm6 = vweird.f32 %v211_v3 }
 0x129   :  { %v216_v8 = vmul.f32 %v410_v1, %v215_v5 }
 0x12a   :  { %v204_v9 = vmax.f32 %v200_v7, 0.0 }
 0x12b   :  { %v217_v10 = vmul.f32 0.5, %v216_v8  ;;  %v189_v11 = vpop.xlane.xlu1 %188 }
 0x12c   :  { %v212_v13 = vadd.f32 1e-05, %v204_v9  ;;  %v193_v14 = vmul.f32 0.03125, %v189_v11 }
 0x12d   :  { %v218_v15 = vsub.f32 1.5, %v217_v10 }
 0x12e   :  { %v412_v16 = vpop.eup %411  ;;  %413 = vrsqrt.f32 %v212_v13  ;;  %v201_v17 = vsub.f32 %v193_v14, %v197_v12  ;;  %vm240_vm9 = vweird.f32 %v212_v13 }
 0x12f   :  { %v225_v18 = vmul.f32 %v412_v16, %v211_v3  ;;  %v219_v20 = vmul.f32 %v410_v1, %v218_v15  ;;  %vm231_vm5 = vweird.f32 %v412_v16 }
 0x130   :  { %v205_v21 = vmax.f32 %v201_v17, 0.0  ;;  %vm232_vm7 = vmor %vm230_vm6, %vm231_vm5 }
 0x131   :  { %v226_v22 = vmul.f32 %v412_v16, %v225_v18  ;;  %v223_v23 = vsel %vm222_vm4, %v410_v1, %v219_v20 }
 0x132   :  { %v213_v25 = vadd.f32 1e-05, %v205_v21  ;;  %v254_v26 = vmul.f32 %v223_v23, %v206_v19 }
 0x133   :  { %v227_v27 = vmul.f32 0.5, %v226_v22 }
 0x134   :  { %v414_v28 = vpop.eup %413  ;;  %415 = vrsqrt.f32 %v213_v25  ;;  %272 = vperm.xlu2 %406, %v254_v26   ;;  %v262_v33 = vmul.f32 %v254_v26, %v170_v47  ;;  %v208_v47 = vld [vmem:[%s585_s2 + $0x10] sm:$0xff]  ;;  %vm250_vm12 = vweird.f32 %v213_v25 }
 0x135   :  { %v228_v29 = vsub.f32 1.5, %v227_v27  ;;  %v235_v31 = vmul.f32 %v414_v28, %v212_v13  ;;  %vm241_vm8 = vweird.f32 %v414_v28 }
 0x136   :  { %v266_v42 = vsub.f32 %v258_v35, %v262_v33  ;;  %vm242_vm10 = vmor %vm240_vm9, %vm241_vm8 }
 0x137   :  { %v236_v34 = vmul.f32 %v414_v28, %v235_v31  ;;  %v229_v37 = vmul.f32 %v412_v16, %v228_v29 }
 0x139   :  { %v237_v38 = vmul.f32 0.5, %v236_v34  ;;  %v233_v40 = vsel %vm232_vm7, %v412_v16, %v229_v37 }
 0x13a   :  { %v416_v41 = vpop.eup %415  ;;  %v255_v43 = vmul.f32 %v233_v40, %v207_v36 }
 0x13b   :  { %v238_v44 = vsub.f32 1.5, %v237_v38  ;;  %v245_v45 = vmul.f32 %v416_v41, %v213_v25  ;;  %vm251_vm11 = vweird.f32 %v416_v41 }
 0x13c   :  { %296 = vperm.xlu2 %406, %v266_v42   ;;  %277 = vperm.xlu0 %407, %v255_v43   ;;  %vm252_vm13 = vmor %vm250_vm12, %vm251_vm11  ;;  %v263_v55 = vmul.f32 %v255_v43, %v524_v56  ;;  %v261_v56 = vld [vmem:[%s586_s3 + $0x18] sm:$0xff] }
 0x13d   :  { %v246_v46 = vmul.f32 %v416_v41, %v245_v45  ;;  %v239_v48 = vmul.f32 %v414_v28, %v238_v44 }
 0x13e   :  { %v267_v61 = vsub.f32 %v259_v58, %v263_v55 }
 0x13f   :  { %v247_v49 = vmul.f32 0.5, %v246_v46  ;;  %v243_v50 = vsel %vm242_vm10, %v414_v28, %v239_v48 }
 0x140   :  { %v256_v51 = vmul.f32 %v243_v50, %v208_v47 }
 0x141   :  { %v248_v52 = vsub.f32 1.5, %v247_v49 }
 0x142   :  { %282 = vperm.xlu1 %408, %v256_v51   ;;  %v264_v62 = vmul.f32 %v256_v51, %v528_v60 }
 0x143   :  { %v249_v54 = vmul.f32 %v416_v41, %v248_v52 }
 0x144   :  { %v268_v1 = vsub.f32 %v260_v63, %v264_v62 }
 0x145   :  { %v253_v57 = vsel %vm252_vm13, %v416_v41, %v249_v54 }
 0x146   :  { %v257_v59 = vmul.f32 %v253_v57, %v209_v53 }
 0x148   :  { %287 = vperm.xlu2 %406, %v257_v59   ;;  %v265_v0 = vmul.f32 %v257_v59, %v532_v6 }
 0x14a   :  { %301 = vperm.xlu1 %408, %v267_v61   ;;  %v269_v2 = vsub.f32 %v261_v56, %v265_v0 }
 0x150   :  { %306 = vperm.xlu2 %406, %v268_v1  }
 0x152   :  { %311 = vperm.xlu1 %408, %v269_v2  }
 0x18e   :  { %v273_v3 = vpop.permute.xlu2 %272 }
 0x18f   :  { %v290_v4 = vmul.f32 %v273_v3, %v496_v24 }
 0x196   :  { %v297_v5 = vpop.permute.xlu2 %296 }
 0x197   :  { %v314_v7 = vadd.f32 %v297_v5, %v290_v4 }
 0x199   :  { %v318_v60 = vmax.f32 %v314_v7, 0.0 }
 0x19b   :  { %322 = vst.msk [vmem:[%s587_s4] sm:$0xff] %vm157_vm1, %v318_v60 }
 0x1a2   :  { %v288_v6 = vpop.permute.xlu2 %287 }
 0x1aa   :  { %v307_v10 = vpop.permute.xlu2 %306 }
 0x1ae   :  { %v278_v12 = vpop.permute.xlu0 %277 }
 0x1af   :  { %v291_v14 = vmul.f32 %v278_v12, %v505_v32 }
 0x1b4   :  { %v283_v8 = vpop.permute.xlu1 %282 }
 0x1b5   :  { %v292_v9 = vmul.f32 %v283_v8, %v503_v30  ;;  %v293_v30 = vmul.f32 %v288_v6, %v514_v39 }
 0x1b7   :  { %v316_v11 = vadd.f32 %v307_v10, %v292_v9 }
 0x1b9   :  { %v320_v13 = vmax.f32 %v316_v11, 0.0 }
 0x1bb   :  { %324 = vst.msk [vmem:[%s587_s4 + $0x10] sm:$0xff] %vm157_vm1, %v320_v13 }
 0x1bc   :  { %v302_v24 = vpop.permute.xlu1 %301 }
 0x1bd   :  { %v315_v15 = vadd.f32 %v302_v24, %v291_v14 }
 0x1bf   :  { %v319_v16 = vmax.f32 %v315_v15, 0.0 }
 0x1c1   :  { %323 = vst.msk [vmem:[%s587_s4 + $0x8] sm:$0xff] %vm157_vm1, %v319_v16 }
 0x1c4   :  { %v312_v17 = vpop.permute.xlu1 %311 }
 0x1c5   :  { %v317_v18 = vadd.f32 %v312_v17, %v293_v30 }
 0x1c7   :  { %v321_v19 = vmax.f32 %v317_v18, 0.0 }
 0x1c9   :  { %325 = vst.msk [vmem:[%s587_s4 + $0x18] sm:$0xff] %vm157_vm1, %v321_v19 }

// kernel: _lambda_.19
= control target key start
LH: loop header
LB: loop body
LE: loop exit
PB: predicated region body
PF: predicated region fallthrough
CT: control target
= control target key end

     0   :  { %vm40_vm0 = vcmask 130048   ;;  %vm66_vm1 = vcmask 261120   ;;  %v265_v19 = vmov 0   ;;  %s387_s1 = inlined_call_operand.vmem [shape: bf16[16,32], index: 1, kind: input, shape index: {}]   ;;  %s388_s0 = inlined_call_operand.vmem [shape: bf16[32,16], index: 0, kind: input, shape index: {}]   ;;  %s389_s2 = inlined_call_operand.vmem [shape: f32[32,1], index: 2, kind: input, shape index: {}]   ;;  %s390_s3 = inlined_call_operand.vmem [shape: f32[32,1], index: 3, kind: input, shape index: {}]   ;;  %s391_s4 = inlined_call_operand.vmem [shape: f32[32,32], index: 4, kind: output, shape index: {}]  }
   0x1   :  { %v251_v0 = vld [vmem:[%s387_s1] sm:$0xff]  ;;  %v250_v2 = vld [vmem:[%s388_s0 + $0x8] sm:$0xff]  ;;  %254 = vset.pattern.permute.xlu2 %v265_v19  ;;  %255 = vset.pattern.permute.xlu0 %v265_v19 }
   0x2   :  { %v249_v1 = vld [vmem:[%s388_s0] sm:$0xff]  ;;  %54 = vmatpush.bf16.msra.mxu0 %v251_v0  ;;  %252 = vmatpush.bf16.msra.mxu1 %v251_v0 }
   0x3   :  { %256 = vset.pattern.permute.xlu1 %v265_v19  ;;  %v115_v58 = vld [vmem:[%s389_s2] sm:$0xff] }
   0x5   :  { %247 = vmatmul.msk.bf16.vlgmr.msra.gmra.mxu0 %vm40_vm0, %v249_v1  ;;  %248 = vmatmul.msk.bf16.vlgmr.msra.gmra.mxu1 %vm40_vm0, %v250_v2 }
  0x82   :  { %v300_v3 = vpop.f32.mrf.mxu0  ;;  %v302_v4 = vpop.f32.mrf.mxu1 }
  0x83   :  { %v73_v5 = vsel %vm66_vm1, %v302_v4, 0.0  ;;  %v67_v6 = vsel %vm66_vm1, %v300_v3, 0.0  ;;  %v83_v7 = vmul.f32 %v300_v3, %v300_v3  ;;  %v85_v16 = vmul.f32 %v302_v4, %v302_v4 }
  0x84   :  { %74 = vadd.xlane.f32.xlu1 %v73_v5  ;;  %68 = vadd.xlane.f32.xlu0 %v67_v6 }
  0x85   :  { %v87_v8 = vsel %vm66_vm1, %v83_v7, 0.0  ;;  %v93_v18 = vsel %vm66_vm1, %v85_v16, 0.0 }
  0x86   :  { %88 = vadd.xlane.f32.xlu2 %v87_v8 }
  0x8a   :  { %v311_v9 = vpop.f32.mrf.mxu0  ;;  %v313_v10 = vpop.f32.mrf.mxu1 }
  0x8b   :  { %v84_v11 = vmul.f32 %v311_v9, %v311_v9  ;;  %v76_v12 = vsel %vm66_vm1, %v313_v10, 0.0  ;;  %v70_v13 = vsel %vm66_vm1, %v311_v9, 0.0  ;;  %v86_v15 = vmul.f32 %v313_v10, %v313_v10 }
  0x8c   :  { %77 = vadd.xlane.f32.xlu1 %v76_v12  ;;  %71 = vadd.xlane.f32.xlu0 %v70_v13  ;;  %v167_v12 = vld [vmem:[%s390_s3] sm:$0xff] }
  0x8d   :  { %v90_v14 = vsel %vm66_vm1, %v84_v11, 0.0  ;;  %v96_v17 = vsel %vm66_vm1, %v86_v15, 0.0 }
  0x8e   :  { %91 = vadd.xlane.f32.xlu2 %v90_v14  ;;  %v116_v14 = vld [vmem:[%s389_s2 + $0x8] sm:$0xff] }
  0x94   :  { %97 = vadd.xlane.f32.xlu1 %v96_v17  ;;  %94 = vadd.xlane.f32.xlu0 %v93_v18 }
  0xf7   :  { %v75_v20 = vpop.xlane.xlu1 %74  ;;  %v69_v21 = vpop.xlane.xlu0 %68 }
  0xf8   :  { %v79_v22 = vmul.f32 0.03125, %v69_v21  ;;  %v332_v35 = vmul.f32 0.03125, %v75_v20 }
  0xf9   :  { %v89_v23 = vpop.xlane.xlu2 %88 }
  0xfa   :  { %v103_v24 = vmul.f32 %v79_v22, %v79_v22  ;;  %v99_v25 = vmul.f32 0.03125, %v89_v23  ;;  %v105_v42 = vmul.f32 %v332_v35, %v332_v35 }
  0xfc   :  { %v107_v26 = vsub.f32 %v99_v25, %v103_v24  ;;  %v117_v24 = vld [vmem:[%s389_s2 + $0x10] sm:$0xff] }
  0xfe   :  { %v111_v27 = vmax.f32 %v107_v26, 0.0  ;;  %v118_v26 = vld [vmem:[%s389_s2 + $0x18] sm:$0xff] }
  0xff   :  { %v78_v28 = vpop.xlane.xlu1 %77  ;;  %v72_v29 = vpop.xlane.xlu0 %71 }
 0x100   :  { %v119_v30 = vadd.f32 1e-05, %v111_v27  ;;  %v328_v31 = vmul.f32 0.03125, %v72_v29  ;;  %v334_v36 = vmul.f32 0.03125, %v78_v28 }
 0x101   :  { %v92_v32 = vpop.xlane.xlu2 %91 }
 0x102   :  { %257 = vrsqrt.f32 %v119_v30  ;;  %v104_v33 = vmul.f32 %v328_v31, %v328_v31  ;;  %v100_v34 = vmul.f32 0.03125, %v92_v32  ;;  %v106_v43 = vmul.f32 %v334_v36, %v334_v36 }
 0x103   :  { %vm129_vm3 = vweird.f32 %v119_v30 }
 0x104   :  { %v108_v37 = vsub.f32 %v100_v34, %v104_v33  ;;  %v168_v33 = vld [vmem:[%s390_s3 + $0x8] sm:$0xff] }
 0x106   :  { %v112_v38 = vmax.f32 %v108_v37, 0.0  ;;  %v169_v37 = vld [vmem:[%s390_s3 + $0x10] sm:$0xff] }
 0x107   :  { %v98_v39 = vpop.xlane.xlu1 %97  ;;  %v95_v40 = vpop.xlane.xlu0 %94 }
 0x108   :  { %v258_v41 = vpop.eup %257  ;;  %v102_v44 = vmul.f32 0.03125, %v98_v39  ;;  %v101_v45 = vmul.f32 0.03125, %v95_v40  ;;  %v120_v47 = vadd.f32 1e-05, %v112_v38 }
 0x109   :  { %v124_v46 = vmul.f32 %v258_v41, %v119_v30  ;;  %vm130_vm2 = vweird.f32 %v258_v41 }
 0x10a   :  { %v110_v48 = vsub.f32 %v102_v44, %v106_v43  ;;  %v109_v49 = vsub.f32 %v101_v45, %v105_v42  ;;  %259 = vrsqrt.f32 %v120_v47  ;;  %vm131_vm4 = vmor %vm129_vm3, %vm130_vm2  ;;  %vm139_vm6 = vweird.f32 %v120_v47 }
 0x10b   :  { %v125_v50 = vmul.f32 %v258_v41, %v124_v46 }
 0x10c   :  { %v114_v51 = vmax.f32 %v110_v48, 0.0  ;;  %v113_v52 = vmax.f32 %v109_v49, 0.0 }
 0x10d   :  { %v126_v53 = vmul.f32 0.5, %v125_v50 }
 0x10e   :  { %v122_v54 = vadd.f32 1e-05, %v114_v51  ;;  %v121_v55 = vadd.f32 1e-05, %v113_v52 }
 0x10f   :  { %v127_v56 = vsub.f32 1.5, %v126_v53 }
 0x110   :  { %261 = vrsqrt.f32 %v122_v54  ;;  %v260_v57 = vpop.eup %259  ;;  %vm159_vm10 = vweird.f32 %v122_v54  ;;  %vm149_vm11 = vweird.f32 %v121_v55 }
 0x111   :  { %263 = vrsqrt.f32 %v121_v55  ;;  %v128_v59 = vmul.f32 %v258_v41, %v127_v56  ;;  %v134_v60 = vmul.f32 %v260_v57, %v120_v47  ;;  %vm140_vm5 = vweird.f32 %v260_v57 }
 0x112   :  { %vm141_vm7 = vmor %vm139_vm6, %vm140_vm5 }
 0x113   :  { %v132_v61 = vsel %vm131_vm4, %v258_v41, %v128_v59  ;;  %v135_v62 = vmul.f32 %v260_v57, %v134_v60 }
 0x114   :  { %v163_v63 = vmul.f32 %v132_v61, %v115_v58 }
 0x115   :  { %v136_v1 = vmul.f32 0.5, %v135_v62 }
 0x116   :  { %v262_v0 = vpop.eup %261  ;;  %181 = vperm.xlu2 %254, %v163_v63   ;;  %v171_v8 = vmul.f32 %v163_v63, %v79_v22 }
 0x117   :  { %v264_v2 = vpop.eup %263  ;;  %v154_v5 = vmul.f32 %v262_v0, %v122_v54  ;;  %v137_v6 = vsub.f32 1.5, %v136_v1  ;;  %vm160_vm8 = vweird.f32 %v262_v0 }
 0x118   :  { %v144_v7 = vmul.f32 %v264_v2, %v121_v55  ;;  %v175_v18 = vsub.f32 %v167_v12, %v171_v8  ;;  %vm150_vm9 = vweird.f32 %v264_v2  ;;  %vm161_vm12 = vmor %vm159_vm10, %vm160_vm8 }
 0x119   :  { %v155_v11 = vmul.f32 %v262_v0, %v154_v5  ;;  %v138_v15 = vmul.f32 %v260_v57, %v137_v6  ;;  %vm151_vm13 = vmor %vm149_vm11, %vm150_vm9 }
 0x11a   :  { %v145_v13 = vmul.f32 %v264_v2, %v144_v7 }
 0x11b   :  { %v156_v16 = vmul.f32 0.5, %v155_v11  ;;  %v142_v19 = vsel %vm141_vm7, %v260_v57, %v138_v15 }
 0x11c   :  { %v146_v17 = vmul.f32 0.5, %v145_v13  ;;  %v164_v21 = vmul.f32 %v142_v19, %v116_v14 }
 0x11d   :  { %v157_v20 = vsub.f32 1.5, %v156_v16 }
 0x11e   :  { %v147_v22 = vsub.f32 1.5, %v146_v17  ;;  %205 = vperm.xlu2 %254, %v175_v18   ;;  %186 = vperm.xlu0 %255, %v164_v21   ;;  %v172_v32 = vmul.f32 %v164_v21, %v328_v31  ;;  %v170_v31 = vld [vmem:[%s390_s3 + $0x18] sm:$0xff] }
 0x11f   :  { %v158_v23 = vmul.f32 %v262_v0, %v157_v20 }
 0x120   :  { %v148_v25 = vmul.f32 %v264_v2, %v147_v22  ;;  %v176_v38 = vsub.f32 %v168_v33, %v172_v32 }
 0x121   :  { %v162_v27 = vsel %vm161_vm12, %v262_v0, %v158_v23 }
 0x122   :  { %v152_v28 = vsel %vm151_vm13, %v264_v2, %v148_v25  ;;  %v166_v30 = vmul.f32 %v162_v27, %v118_v26 }
 0x123   :  { %v165_v29 = vmul.f32 %v152_v28, %v117_v24 }
 0x124   :  { %v174_v40 = vmul.f32 %v166_v30, %v334_v36 }
 0x125   :  { %191 = vperm.xlu1 %256, %v165_v29   ;;  %v173_v34 = vmul.f32 %v165_v29, %v332_v35 }
 0x126   :  { %196 = vperm.xlu2 %254, %v166_v30   ;;  %v178_v41 = vsub.f32 %v170_v31, %v174_v40 }
 0x127   :  { %v177_v39 = vsub.f32 %v169_v37, %v173_v34 }
 0x12d   :  { %210 = vperm.xlu1 %256, %v176_v38  }
 0x12e   :  { %215 = vperm.xlu2 %254, %v177_v39  }
 0x135   :  { %220 = vperm.xlu1 %256, %v178_v41  }
 0x170   :  { %v182_v42 = vpop.permute.xlu2 %181 }
 0x171   :  { %v199_v43 = vmul.f32 %v182_v42, %v300_v3 }
 0x178   :  { %v206_v35 = vpop.permute.xlu2 %205 }
 0x179   :  { %v223_v44 = vadd.f32 %v206_v35, %v199_v43 }
 0x17b   :  { %227 = vst.msk [vmem:[%s391_s4] sm:$0xff] %vm66_vm1, %v223_v44 }
 0x180   :  { %v197_v45 = vpop.permute.xlu2 %196 }
 0x181   :  { %v202_v52 = vmul.f32 %v197_v45, %v313_v10 }
 0x188   :  { %v216_v47 = vpop.permute.xlu2 %215 }
 0x190   :  { %v187_v49 = vpop.permute.xlu0 %186 }
 0x191   :  { %v200_v3 = vmul.f32 %v187_v49, %v311_v9 }
 0x197   :  { %v192_v46 = vpop.permute.xlu1 %191 }
 0x198   :  { %v201_v36 = vmul.f32 %v192_v46, %v302_v4 }
 0x19a   :  { %v225_v48 = vadd.f32 %v216_v47, %v201_v36 }
 0x19c   :  { %229 = vst.msk [vmem:[%s391_s4 + $0x10] sm:$0xff] %vm66_vm1, %v225_v48 }
 0x19f   :  { %v211_v50 = vpop.permute.xlu1 %210 }
 0x1a0   :  { %v224_v51 = vadd.f32 %v211_v50, %v200_v3 }
 0x1a2   :  { %228 = vst.msk [vmem:[%s391_s4 + $0x8] sm:$0xff] %vm66_vm1, %v224_v51 }
 0x1a7   :  { %v221_v4 = vpop.permute.xlu1 %220 }
 0x1a8   :  { %v226_v53 = vadd.f32 %v221_v4, %v202_v52 }
 0x1aa   :  { %230 = vst.msk [vmem:[%s391_s4 + $0x18] sm:$0xff] %vm66_vm1, %v226_v53 }

// kernel: _lambda_.20
= control target key start
LH: loop header
LB: loop body
LE: loop exit
PB: predicated region body
PF: predicated region fallthrough
CT: control target
= control target key end

     0   :  { %vm203_vm0 = vcmask 261120   ;;  %s806_s1 = inlined_call_operand.vmem [shape: bf16[288,32], index: 1, kind: input, shape index: {}]   ;;  %s807_s0 = inlined_call_operand.vmem [shape: bf16[32,288], index: 0, kind: input, shape index: {}]   ;;  %s808_s2 = inlined_call_operand.vmem [shape: f32[32,1], index: 2, kind: input, shape index: {}]   ;;  %s809_s3 = inlined_call_operand.vmem [shape: f32[32,1], index: 3, kind: input, shape index: {}]   ;;  %s810_s4 = inlined_call_operand.vmem [shape: f32[32,32], index: 4, kind: input, shape index: {}]   ;;  %s811_s5 = inlined_call_operand.vmem [shape: f32[32,32], index: 5, kind: output, shape index: {}]  }
   0x1   :  { %v558_v0 = vld [vmem:[%s806_s1 + $0x38] sm:$0xff]  ;;  %v557_v2 = vld [vmem:[%s806_s1 + $0x30] sm:$0xff]  ;;  %v568_v4 = vld [vmem:[%s806_s1 + $0x88] sm:$0xff] }
   0x2   :  { %v566_v1 = vld [vmem:[%s806_s1 + $0x78] sm:$0xff]  ;;  %210 = vmatpush.bf16.msra.mxu0 %v558_v0  ;;  %v565_v3 = vld [vmem:[%s806_s1 + $0x70] sm:$0xff]  ;;  %569 = vmatpush.bf16.msra.mxu3 %v558_v0  ;;  %v567_v5 = vld [vmem:[%s806_s1 + $0x80] sm:$0xff] }
   0x3   :  { %229 = vmatpush.bf16.msra.mxu1 %v566_v1  ;;  %254 = vmatpush.bf16.msra.mxu2 %v568_v4  ;;  %v457_v6 = vld [vmem:[%s807_s0 + $0x8] sm:$0xf]  ;;  %v547_v7 = vld [vmem:[%s807_s0 + $0x10] sm:$0xf0]  ;;  %v555_v11 = vld [vmem:[%s806_s1 + $0x20] sm:$0xff]  ;;  %v589_v4 = vmov 0  }
   0x4   :  { %v556_v8 = vld [vmem:[%s806_s1 + $0x28] sm:$0xff]  ;;  %v458_v10 = vor.u32 %v547_v7, %v457_v6  ;;  %v563_v12 = vld [vmem:[%s806_s1 + $0x60] sm:$0xff]  ;;  %v554_v13 = vld [vmem:[%s806_s1 + $0x18] sm:$0xff]  ;;  %578 = vset.pattern.permute.xlu2 %v589_v4  ;;  %579 = vset.pattern.permute.xlu0 %v589_v4 }
   0x5   :  { %v564_v9 = vld [vmem:[%s806_s1 + $0x68] sm:$0xff]  ;;  %v562_v14 = vld [vmem:[%s806_s1 + $0x58] sm:$0xff]  ;;  %v553_v15 = vld [vmem:[%s806_s1 + $0x10] sm:$0xff]  ;;  %580 = vset.pattern.permute.xlu1 %v589_v4 }
   0x6   :  { %211 = vmatpush.bf16.msra.mxu0 %v557_v2  ;;  %570 = vmatpush.bf16.msra.mxu3 %v557_v2  ;;  %v561_v16 = vld [vmem:[%s806_s1 + $0x50] sm:$0xff]  ;;  %v469_v17 = vld [vmem:[%s807_s0 + $0x20] sm:$0xf]  ;;  %v550_v18 = vld [vmem:[%s807_s0 + $0x28] sm:$0xf0] }
   0x7   :  { %230 = vmatpush.bf16.msra.mxu1 %v565_v3  ;;  %255 = vmatpush.bf16.msra.mxu2 %v567_v5  ;;  %v552_v19 = vld [vmem:[%s806_s1 + $0x8] sm:$0xff]  ;;  %v470_v21 = vor.u32 %v550_v18, %v469_v17  ;;  %v551_v22 = vld [vmem:[%s806_s1] sm:$0xff]  ;;  %v451_v27 = vld [vmem:[%s807_s0 + $0xc] sm:$0xf0] }
   0x8   :  { %v560_v20 = vld [vmem:[%s806_s1 + $0x48] sm:$0xff]  ;;  %v559_v23 = vld [vmem:[%s806_s1 + $0x40] sm:$0xff]  ;;  %v461_v28 = vld [vmem:[%s807_s0 + $0x18] sm:$0xf] }
   0x9   :  { %v449_v24 = vld [vmem:[%s807_s0] sm:$0xf]  ;;  %v546_v25 = vld [vmem:[%s807_s0 + $0x8] sm:$0xf0]  ;;  %v545_v26 = vld [vmem:[%s807_s0 + $0x4] sm:$0xf] }
   0xa   :  { %212 = vmatpush.bf16.msra.mxu0 %v556_v8  ;;  %571 = vmatpush.bf16.msra.mxu3 %v556_v8  ;;  %v549_v29 = vld [vmem:[%s807_s0 + $0x20] sm:$0xf0]  ;;  %v450_v30 = vor.u32 %v546_v25, %v449_v24  ;;  %v454_v31 = vor.u32 %v545_v26, %v451_v27  ;;  %v548_v33 = vld [vmem:[%s807_s0 + $0x1c] sm:$0xf]  ;;  %v463_v34 = vld [vmem:[%s807_s0 + $0x24] sm:$0xf0] }
   0xb   :  { %231 = vmatpush.bf16.msra.mxu1 %v564_v9  ;;  %543 = vmatmul.msk.bf16.vlgmr.msra.gmra.mxu2 %vm203_vm0, %v458_v10  ;;  %v462_v32 = vor.u32 %v549_v29, %v461_v28  ;;  %v466_v35 = vor.u32 %v548_v33, %v463_v34 }
   0xe   :  { %213 = vmatpush.bf16.msra.mxu0 %v555_v11  ;;  %572 = vmatpush.bf16.msra.mxu3 %v555_v11 }
   0xf   :  { %232 = vmatpush.bf16.msra.mxu1 %v563_v12 }
  0x12   :  { %214 = vmatpush.bf16.msra.mxu0 %v554_v13  ;;  %573 = vmatpush.bf16.msra.mxu3 %v554_v13 }
  0x13   :  { %233 = vmatpush.bf16.msra.mxu1 %v562_v14 }
  0x16   :  { %215 = vmatpush.bf16.msra.mxu0 %v553_v15  ;;  %574 = vmatpush.bf16.msra.mxu3 %v553_v15 }
  0x17   :  { %234 = vmatpush.bf16.msra.mxu1 %v561_v16 }
  0x1a   :  { %216 = vmatpush.bf16.msra.mxu0 %v552_v19  ;;  %575 = vmatpush.bf16.msra.mxu3 %v552_v19 }
  0x1b   :  { %235 = vmatpush.bf16.msra.mxu1 %v560_v20  ;;  %544 = vmatmul.msk.bf16.gmra.mxu2 %vm203_vm0, %v470_v21 }
  0x1e   :  { %217 = vmatpush.bf16.msra.mxu0 %v551_v22  ;;  %576 = vmatpush.bf16.msra.mxu3 %v551_v22 }
  0x1f   :  { %236 = vmatpush.bf16.msra.mxu1 %v559_v23 }
  0x21   :  { %218 = vmatmul.bf16.vlgmr.msra.gmra.mxu0 %v450_v30  ;;  %223 = vmatmul.bf16.vlgmr.msra.gmra.mxu3 %v462_v32 }
  0x22   :  { %237 = vmatmul.bf16.vlgmr.msra.gmra.mxu1 %v454_v31 }
  0x32   :  { %242 = vmatmul.bf16.gmra.mxu1 %v466_v35 }
  0x8e   :  { %v257_v36 = vpop.f32.mrf.mxu2 }
  0x96   :  { %v259_v43 = vpop.f32.mrf.mxu2 }
  0x9e   :  { %v219_v37 = vpop.f32.mrf.mxu0  ;;  %v262_v53 = vpop.f32.mrf.mxu2 }
  0x9f   :  { %v238_v38 = vpop.f32.mrf.mxu1 }
  0xa0   :  { %v239_v39 = vadd.f32 %v238_v38, %v219_v37  ;;  %v315_v37 = vld [vmem:[%s808_s2] sm:$0xff] }
  0xa2   :  { %v712_v40 = vadd.f32 %v257_v36, %v239_v39 }
  0xa4   :  { %v267_v41 = vsel %vm203_vm0, %v712_v40, 0.0  ;;  %v283_v42 = vmul.f32 %v712_v40, %v712_v40  ;;  %v224_v51 = vpop.f32.mrf.mxu3 }
  0xa5   :  { %268 = vadd.xlane.f32.xlu0 %v267_v41 }
  0xa6   :  { %v287_v44 = vsel %vm203_vm0, %v283_v42, 0.0  ;;  %v221_v45 = vpop.f32.mrf.mxu0  ;;  %v264_v63 = vpop.f32.mrf.mxu2 }
  0xa7   :  { %v240_v46 = vpop.f32.mrf.mxu1  ;;  %288 = vadd.xlane.f32.xlu2 %v287_v44 }
  0xa8   :  { %v241_v47 = vadd.f32 %v240_v46, %v221_v45 }
  0xaa   :  { %v719_v48 = vadd.f32 %v259_v43, %v241_v47 }
  0xac   :  { %v270_v49 = vsel %vm203_vm0, %v719_v48, 0.0  ;;  %v284_v50 = vmul.f32 %v719_v48, %v719_v48  ;;  %v226_v60 = vpop.f32.mrf.mxu3 }
  0xad   :  { %271 = vadd.xlane.f32.xlu0 %v270_v49 }
  0xae   :  { %v290_v52 = vsel %vm203_vm0, %v284_v50, 0.0 }
  0xaf   :  { %v243_v54 = vpop.f32.mrf.mxu1  ;;  %291 = vadd.xlane.f32.xlu2 %v290_v52 }
  0xb0   :  { %v244_v55 = vadd.f32 %v243_v54, %v224_v51  ;;  %v316_v54 = vld [vmem:[%s808_s2 + $0x8] sm:$0xff] }
  0xb2   :  { %v726_v56 = vadd.f32 %v262_v53, %v244_v55  ;;  %v367_v53 = vld [vmem:[%s809_s3] sm:$0xff] }
  0xb4   :  { %v273_v57 = vsel %vm203_vm0, %v726_v56, 0.0  ;;  %v285_v58 = vmul.f32 %v726_v56, %v726_v56 }
  0xb5   :  { %274 = vadd.xlane.f32.xlu1 %v273_v57 }
  0xb6   :  { %v293_v59 = vsel %vm203_vm0, %v285_v58, 0.0 }
  0xb7   :  { %v245_v61 = vpop.f32.mrf.mxu1  ;;  %294 = vadd.xlane.f32.xlu0 %v293_v59 }
  0xb8   :  { %v246_v62 = vadd.f32 %v245_v61, %v226_v60 }
  0xba   :  { %v733_v0 = vadd.f32 %v264_v63, %v246_v62 }
  0xbc   :  { %v276_v1 = vsel %vm203_vm0, %v733_v0, 0.0  ;;  %v286_v2 = vmul.f32 %v733_v0, %v733_v0 }
  0xbd   :  { %277 = vadd.xlane.f32.xlu1 %v276_v1  ;;  %v368_v1 = vld [vmem:[%s809_s3 + $0x8] sm:$0xff] }
  0xbe   :  { %v296_v3 = vsel %vm203_vm0, %v286_v2, 0.0 }
  0xc5   :  { %297 = vadd.xlane.f32.xlu1 %v296_v3 }
 0x118   :  { %v269_v5 = vpop.xlane.xlu0 %268 }
 0x119   :  { %v279_v6 = vmul.f32 0.03125, %v269_v5 }
 0x11a   :  { %v289_v7 = vpop.xlane.xlu2 %288 }
 0x11b   :  { %v303_v8 = vmul.f32 %v279_v6, %v279_v6  ;;  %v299_v9 = vmul.f32 0.03125, %v289_v7  ;;  %v317_v7 = vld [vmem:[%s808_s2 + $0x10] sm:$0xff] }
 0x11d   :  { %v307_v10 = vsub.f32 %v299_v9, %v303_v8 }
 0x11f   :  { %v311_v11 = vmax.f32 %v307_v10, 0.0 }
 0x120   :  { %v272_v12 = vpop.xlane.xlu0 %271 }
 0x121   :  { %v319_v13 = vadd.f32 1e-05, %v311_v11  ;;  %v740_v14 = vmul.f32 0.03125, %v272_v12 }
 0x122   :  { %v292_v15 = vpop.xlane.xlu2 %291 }
 0x123   :  { %581 = vrsqrt.f32 %v319_v13  ;;  %v304_v16 = vmul.f32 %v740_v14, %v740_v14  ;;  %v300_v17 = vmul.f32 0.03125, %v292_v15  ;;  %vm329_vm2 = vweird.f32 %v319_v13  ;;  %v318_v15 = vld [vmem:[%s808_s2 + $0x18] sm:$0xff] }
 0x125   :  { %v308_v18 = vsub.f32 %v300_v17, %v304_v16 }
 0x127   :  { %v312_v19 = vmax.f32 %v308_v18, 0.0 }
 0x128   :  { %v275_v20 = vpop.xlane.xlu1 %274 }
 0x129   :  { %v582_v21 = vpop.eup %581  ;;  %v320_v22 = vadd.f32 1e-05, %v312_v19  ;;  %v744_v23 = vmul.f32 0.03125, %v275_v20  ;;  %v370_v19 = vld [vmem:[%s809_s3 + $0x18] sm:$0xff] }
 0x12a   :  { %v324_v24 = vmul.f32 %v582_v21, %v319_v13  ;;  %v295_v25 = vpop.xlane.xlu0 %294  ;;  %vm330_vm1 = vweird.f32 %v582_v21 }
 0x12b   :  { %583 = vrsqrt.f32 %v320_v22  ;;  %v305_v26 = vmul.f32 %v744_v23, %v744_v23  ;;  %v301_v27 = vmul.f32 0.03125, %v295_v25  ;;  %vm331_vm3 = vmor %vm329_vm2, %vm330_vm1  ;;  %vm339_vm5 = vweird.f32 %v320_v22 }
 0x12c   :  { %v325_v28 = vmul.f32 %v582_v21, %v324_v24  ;;  %v369_v24 = vld [vmem:[%s809_s3 + $0x10] sm:$0xff] }
 0x12d   :  { %v309_v29 = vsub.f32 %v301_v27, %v305_v26 }
 0x12e   :  { %v326_v30 = vmul.f32 0.5, %v325_v28  ;;  %v427_v28 = vld [vmem:[%s810_s4] sm:$0xff] }
 0x12f   :  { %v313_v31 = vmax.f32 %v309_v29, 0.0 }
 0x130   :  { %v327_v32 = vsub.f32 1.5, %v326_v30  ;;  %v278_v33 = vpop.xlane.xlu1 %277 }
 0x131   :  { %v584_v34 = vpop.eup %583  ;;  %v321_v35 = vadd.f32 1e-05, %v313_v31  ;;  %v282_v42 = vmul.f32 0.03125, %v278_v33 }
 0x132   :  { %v334_v36 = vmul.f32 %v584_v34, %v320_v22  ;;  %v328_v38 = vmul.f32 %v582_v21, %v327_v32  ;;  %vm340_vm4 = vweird.f32 %v584_v34 }
 0x133   :  { %585 = vrsqrt.f32 %v321_v35  ;;  %v306_v49 = vmul.f32 %v282_v42, %v282_v42  ;;  %vm341_vm6 = vmor %vm339_vm5, %vm340_vm4  ;;  %vm349_vm8 = vweird.f32 %v321_v35 }
 0x134   :  { %v335_v39 = vmul.f32 %v584_v34, %v334_v36  ;;  %v332_v41 = vsel %vm331_vm3, %v582_v21, %v328_v38 }
 0x135   :  { %v363_v43 = vmul.f32 %v332_v41, %v315_v37 }
 0x136   :  { %v336_v44 = vmul.f32 0.5, %v335_v39 }
 0x137   :  { %381 = vperm.xlu2 %578, %v363_v43   ;;  %v371_v51 = vmul.f32 %v363_v43, %v279_v6 }
 0x138   :  { %v337_v45 = vsub.f32 1.5, %v336_v44  ;;  %v298_v46 = vpop.xlane.xlu1 %297 }
 0x139   :  { %v586_v47 = vpop.eup %585  ;;  %v302_v50 = vmul.f32 0.03125, %v298_v46  ;;  %v375_v61 = vsub.f32 %v367_v53, %v371_v51 }
 0x13a   :  { %v344_v52 = vmul.f32 %v586_v47, %v321_v35  ;;  %v338_v55 = vmul.f32 %v584_v34, %v337_v45  ;;  %vm350_vm7 = vweird.f32 %v586_v47 }
 0x13b   :  { %v310_v57 = vsub.f32 %v302_v50, %v306_v49  ;;  %vm351_vm9 = vmor %vm349_vm8, %vm350_vm7 }
 0x13c   :  { %v345_v58 = vmul.f32 %v586_v47, %v344_v52  ;;  %v342_v59 = vsel %vm341_vm6, %v584_v34, %v338_v55 }
 0x13d   :  { %v314_v60 = vmax.f32 %v310_v57, 0.0  ;;  %v364_v62 = vmul.f32 %v342_v59, %v316_v54 }
 0x13e   :  { %v346_v63 = vmul.f32 0.5, %v345_v58 }
 0x13f   :  { %v322_v2 = vadd.f32 1e-05, %v314_v60  ;;  %405 = vperm.xlu2 %578, %v375_v61   ;;  %386 = vperm.xlu0 %579, %v364_v62   ;;  %v372_v3 = vmul.f32 %v364_v62, %v740_v14 }
 0x140   :  { %v347_v4 = vsub.f32 1.5, %v346_v63 }
 0x141   :  { %587 = vrsqrt.f32 %v322_v2  ;;  %v376_v5 = vsub.f32 %v368_v1, %v372_v3  ;;  %vm359_vm11 = vweird.f32 %v322_v2 }
 0x142   :  { %v348_v6 = vmul.f32 %v586_v47, %v347_v4 }
 0x143   :  { %410 = vperm.xlu1 %580, %v376_v5  }
 0x144   :  { %v352_v8 = vsel %vm351_vm9, %v586_v47, %v348_v6  ;;  %v430_v47 = vld [vmem:[%s810_s4 + $0x18] sm:$0xff] }
 0x145   :  { %v365_v11 = vmul.f32 %v352_v8, %v317_v7 }
 0x147   :  { %v588_v9 = vpop.eup %587  ;;  %v373_v22 = vmul.f32 %v365_v11, %v744_v23 }
 0x148   :  { %v354_v10 = vmul.f32 %v588_v9, %v322_v2  ;;  %vm360_vm10 = vweird.f32 %v588_v9 }
 0x149   :  { %vm361_vm12 = vmor %vm359_vm11, %vm360_vm10  ;;  %v377_v25 = vsub.f32 %v369_v24, %v373_v22 }
 0x14a   :  { %v355_v12 = vmul.f32 %v588_v9, %v354_v10 }
 0x14b   :  { %391 = vperm.xlu1 %580, %v365_v11  }
 0x14c   :  { %v356_v13 = vmul.f32 0.5, %v355_v12 }
 0x14e   :  { %v357_v14 = vsub.f32 1.5, %v356_v13 }
 0x150   :  { %v358_v16 = vmul.f32 %v588_v9, %v357_v14 }
 0x152   :  { %v362_v17 = vsel %vm361_vm12, %v588_v9, %v358_v16 }
 0x153   :  { %v366_v18 = vmul.f32 %v362_v17, %v318_v15 }
 0x155   :  { %396 = vperm.xlu2 %578, %v366_v18   ;;  %v374_v20 = vmul.f32 %v366_v18, %v282_v42 }
 0x157   :  { %v378_v21 = vsub.f32 %v370_v19, %v374_v20 }
 0x159   :  { %420 = vperm.xlu1 %580, %v378_v21  }
 0x15d   :  { %415 = vperm.xlu2 %578, %v377_v25  }
 0x191   :  { %v382_v26 = vpop.permute.xlu2 %381 }
 0x192   :  { %v399_v27 = vmul.f32 %v382_v26, %v712_v40  ;;  %v428_v40 = vld [vmem:[%s810_s4 + $0x8] sm:$0xff] }
 0x199   :  { %v406_v29 = vpop.permute.xlu2 %405 }
 0x19a   :  { %v423_v30 = vadd.f32 %v406_v29, %v399_v27 }
 0x19c   :  { %v431_v31 = vadd.f32 %v427_v28, %v423_v30 }
 0x19e   :  { %v435_v32 = vmax.f32 %v431_v31, 0.0 }
 0x1a0   :  { %439 = vst.msk [vmem:[%s811_s5] sm:$0xff] %vm203_vm0, %v435_v32 }
 0x1af   :  { %v397_v34 = vpop.permute.xlu2 %396 }
 0x1b0   :  { %v402_v46 = vmul.f32 %v397_v34, %v733_v0 }
 0x1b1   :  { %v387_v23 = vpop.permute.xlu0 %386 }
 0x1b2   :  { %v400_v33 = vmul.f32 %v387_v23, %v719_v48  ;;  %v429_v48 = vld [vmem:[%s810_s4 + $0x10] sm:$0xff] }
 0x1b5   :  { %v411_v35 = vpop.permute.xlu1 %410 }
 0x1b6   :  { %v424_v36 = vadd.f32 %v411_v35, %v400_v33 }
 0x1b7   :  { %v416_v42 = vpop.permute.xlu2 %415 }
 0x1b8   :  { %v432_v37 = vadd.f32 %v428_v40, %v424_v36 }
 0x1ba   :  { %v436_v38 = vmax.f32 %v432_v37, 0.0 }
 0x1bc   :  { %440 = vst.msk [vmem:[%s811_s5 + $0x8] sm:$0xff] %vm203_vm0, %v436_v38 }
 0x1bd   :  { %v392_v39 = vpop.permute.xlu1 %391 }
 0x1be   :  { %v401_v41 = vmul.f32 %v392_v39, %v726_v56 }
 0x1c0   :  { %v425_v43 = vadd.f32 %v416_v42, %v401_v41 }
 0x1c2   :  { %v433_v44 = vadd.f32 %v429_v48, %v425_v43 }
 0x1c4   :  { %v437_v45 = vmax.f32 %v433_v44, 0.0 }
 0x1c6   :  { %441 = vst.msk [vmem:[%s811_s5 + $0x10] sm:$0xff] %vm203_vm0, %v437_v45 }
 0x1cb   :  { %v421_v56 = vpop.permute.xlu1 %420 }
 0x1cc   :  { %v426_v49 = vadd.f32 %v421_v56, %v402_v46 }
 0x1ce   :  { %v434_v50 = vadd.f32 %v430_v47, %v426_v49 }
 0x1d0   :  { %v438_v51 = vmax.f32 %v434_v50, 0.0 }
 0x1d2   :  { %442 = vst.msk [vmem:[%s811_s5 + $0x18] sm:$0xff] %vm203_vm0, %v438_v51 }

// kernel: _lambda_.21
= control target key start
LH: loop header
LB: loop body
LE: loop exit
PB: predicated region body
PF: predicated region fallthrough
CT: control target
= control target key end

     0   :  { %vm46_vm0 = vcmask 123904   ;;  %vm255_vm2 = vcmask 1041409   ;;  %vm257_vm3 = vcmask 1042434   ;;  %vm259_vm4 = vcmask 1043459   ;;  %s607_s0 = inlined_call_operand.vmem [shape: f32[32,2,16], index: 0, kind: input, shape index: {}]   ;;  %s608_s2 = inlined_call_operand.vmem [shape: f32[7,1], index: 2, kind: input, shape index: {}]   ;;  %s609_s1 = inlined_call_operand.vmem [shape: f32[7,32], index: 1, kind: input, shape index: {}]   ;;  %s610_s3 = inlined_call_operand.vmem [shape: f32[7,2], index: 3, kind: output, shape index: {}]  }
   0x1   :  { %v40_v0 = vld [vmem:[%s607_s0 + $0x34] sm:$0x3]  ;;  %v38_v1 = vld [vmem:[%s607_s0 + $0x30] sm:$0x3]  ;;  %v31_v2 = vld [vmem:[%s607_s0 + $0x22] sm:$0x3] }
   0x2   :  { %v125_v3 = vsel %vm46_vm0, %v40_v0, 0.0  ;;  %v119_v4 = vsel %vm46_vm0, %v38_v1, 0.0  ;;  %v98_v5 = vsel %vm46_vm0, %v31_v2, 0.0  ;;  %v39_v6 = vld [vmem:[%s607_s0 + $0x32] sm:$0x3]  ;;  %vm261_vm5 = vcmask 1044484  }
   0x3   :  { %126 = vadd.xlane.f32.xlu1 %v125_v3  ;;  %120 = vadd.xlane.f32.xlu0 %v119_v4  ;;  %v30_v7 = vld [vmem:[%s607_s0 + $0x20] sm:$0x3]  ;;  %v41_v8 = vld [vmem:[%s607_s0 + $0x36] sm:$0x3]  ;;  %v122_v9 = vsel %vm46_vm0, %v39_v6, 0.0  ;;  %vm263_vm6 = vcmask 1045509  }
   0x4   :  { %99 = vadd.xlane.f32.xlu2 %v98_v5  ;;  %v95_v10 = vsel %vm46_vm0, %v30_v7, 0.0  ;;  %v128_v11 = vsel %vm46_vm0, %v41_v8, 0.0  ;;  %v32_v12 = vld [vmem:[%s607_s0 + $0x24] sm:$0x3]  ;;  %v42_v13 = vld [vmem:[%s607_s0 + $0x38] sm:$0x3] }
   0x5   :  { %v22_v14 = vld [vmem:[%s607_s0 + $0x10] sm:$0x3]  ;;  %v101_v15 = vsel %vm46_vm0, %v32_v12, 0.0  ;;  %v131_v16 = vsel %vm46_vm0, %v42_v13, 0.0  ;;  %v33_v18 = vld [vmem:[%s607_s0 + $0x26] sm:$0x3] }
   0x6   :  { %v71_v17 = vsel %vm46_vm0, %v22_v14, 0.0  ;;  %v23_v19 = vld [vmem:[%s607_s0 + $0x12] sm:$0x3]  ;;  %v43_v20 = vld [vmem:[%s607_s0 + $0x3a] sm:$0x3]  ;;  %v104_v21 = vsel %vm46_vm0, %v33_v18, 0.0 }
   0x7   :  { %v74_v22 = vsel %vm46_vm0, %v23_v19, 0.0  ;;  %v134_v23 = vsel %vm46_vm0, %v43_v20, 0.0  ;;  %v18_v24 = vld [vmem:[%s607_s0 + $0x8] sm:$0x3]  ;;  %v24_v26 = vld [vmem:[%s607_s0 + $0x14] sm:$0x3]  ;;  %v221_v20 = vlaneseq }
   0x8   :  { %v34_v25 = vld [vmem:[%s607_s0 + $0x28] sm:$0x3]  ;;  %v59_v27 = vsel %vm46_vm0, %v18_v24, 0.0  ;;  %v44_v28 = vld [vmem:[%s607_s0 + $0x3c] sm:$0x3]  ;;  %v77_v30 = vsel %vm46_vm0, %v24_v26, 0.0 }
   0x9   :  { %v107_v29 = vsel %vm46_vm0, %v34_v25, 0.0  ;;  %v137_v31 = vsel %vm46_vm0, %v44_v28, 0.0  ;;  %v37_v32 = vld [vmem:[%s607_s0 + $0x2e] sm:$0x3]  ;;  %v27_v33 = vld [vmem:[%s607_s0 + $0x1a] sm:$0x3] }
   0xa   :  { %v116_v34 = vsel %vm46_vm0, %v37_v32, 0.0  ;;  %v86_v35 = vsel %vm46_vm0, %v27_v33, 0.0  ;;  %v19_v36 = vld [vmem:[%s607_s0 + $0xa] sm:$0x3]  ;;  %v15_v37 = vld [vmem:[%s607_s0 + $0x2] sm:$0x3] }
   0xb   :  { %123 = vadd.xlane.f32.xlu0 %v122_v9  ;;  %96 = vadd.xlane.f32.xlu1 %v95_v10  ;;  %v14_v38 = vld [vmem:[%s607_s0] sm:$0x3]  ;;  %v62_v39 = vsel %vm46_vm0, %v19_v36, 0.0  ;;  %v25_v40 = vld [vmem:[%s607_s0 + $0x16] sm:$0x3]  ;;  %v50_v41 = vsel %vm46_vm0, %v15_v37, 0.0 }
   0xc   :  { %129 = vadd.xlane.f32.xlu2 %v128_v11  ;;  %v47_v42 = vsel %vm46_vm0, %v14_v38, 0.0  ;;  %v80_v43 = vsel %vm46_vm0, %v25_v40, 0.0  ;;  %v28_v44 = vld [vmem:[%s607_s0 + $0x1c] sm:$0x3]  ;;  %v29_v46 = vld [vmem:[%s607_s0 + $0x1e] sm:$0x3] }
   0xd   :  { %v89_v45 = vsel %vm46_vm0, %v28_v44, 0.0  ;;  %v92_v47 = vsel %vm46_vm0, %v29_v46, 0.0  ;;  %v20_v48 = vld [vmem:[%s607_s0 + $0xc] sm:$0x3]  ;;  %v45_v49 = vld [vmem:[%s607_s0 + $0x3e] sm:$0x3] }
   0xe   :  { %v35_v50 = vld [vmem:[%s607_s0 + $0x2a] sm:$0x3]  ;;  %v65_v51 = vsel %vm46_vm0, %v20_v48, 0.0  ;;  %v16_v52 = vld [vmem:[%s607_s0 + $0x4] sm:$0x3]  ;;  %v140_v53 = vsel %vm46_vm0, %v45_v49, 0.0 }
   0xf   :  { %v110_v54 = vsel %vm46_vm0, %v35_v50, 0.0  ;;  %v53_v55 = vsel %vm46_vm0, %v16_v52, 0.0  ;;  %v21_v56 = vld [vmem:[%s607_s0 + $0xe] sm:$0x3]  ;;  %v36_v58 = vld [vmem:[%s607_s0 + $0x2c] sm:$0x3] }
  0x10   :  { %v68_v57 = vsel %vm46_vm0, %v21_v56, 0.0  ;;  %v26_v59 = vld [vmem:[%s607_s0 + $0x18] sm:$0x3]  ;;  %v17_v60 = vld [vmem:[%s607_s0 + $0x6] sm:$0x3]  ;;  %v113_v61 = vsel %vm46_vm0, %v36_v58, 0.0 }
  0x11   :  { %v83_v62 = vsel %vm46_vm0, %v26_v59, 0.0  ;;  %v56_v63 = vsel %vm46_vm0, %v17_v60, 0.0  ;;  %v331_v5 = vmov 16.0   ;;  %v490_v24 = vand.u32 127, %v221_v20  ;;  %v183_v58 = vld [vmem:[%s608_s2] sm:$0x7f] }
  0x12   :  { %329 = vrcp.f32 %v331_v5  ;;  %vm265_vm7 = vcmask 1046534   ;;  %vm267_vm8 = vcmask 1047559   ;;  %vm294_vm9 = vcmask 261120  }
  0x13   :  { %102 = vadd.xlane.f32.xlu0 %v101_v15  ;;  %132 = vadd.xlane.f32.xlu1 %v131_v16  ;;  %vm318_vm10 = vcmask 14336  }
  0x14   :  { %72 = vadd.xlane.f32.xlu2 %v71_v17 }
  0x18   :  { %v330_v7 = vpop.eup %329 }
  0x19   :  { %v144_v11 = vmul.f32 16.0, %v330_v7  ;;  %vm148_vm1 = vweird.f32 %v330_v7 }
  0x1b   :  { %105 = vadd.xlane.f32.xlu1 %v104_v21  ;;  %75 = vadd.xlane.f32.xlu0 %v74_v22  ;;  %v145_v12 = vsub.f32 1.0, %v144_v11 }
  0x1c   :  { %135 = vadd.xlane.f32.xlu2 %v134_v23 }
  0x1d   :  { %v146_v16 = vmul.f32 %v330_v7, %v145_v12 }
  0x1f   :  { %v147_v17 = vadd.f32 %v330_v7, %v146_v16 }
  0x21   :  { %v487_v22 = vsel %vm148_vm1, %v330_v7, %v147_v17 }
  0x23   :  { %108 = vadd.xlane.f32.xlu1 %v107_v29  ;;  %78 = vadd.xlane.f32.xlu0 %v77_v30 }
  0x24   :  { %138 = vadd.xlane.f32.xlu2 %v137_v31 }
  0x2b   :  { %51 = vadd.xlane.f32.xlu1 %v50_v41  ;;  %48 = vadd.xlane.f32.xlu0 %v47_v42 }
  0x2c   :  { %81 = vadd.xlane.f32.xlu2 %v80_v43 }
  0x33   :  { %141 = vadd.xlane.f32.xlu1 %v140_v53  ;;  %111 = vadd.xlane.f32.xlu0 %v110_v54 }
  0x34   :  { %54 = vadd.xlane.f32.xlu2 %v53_v55 }
  0x3b   :  { %114 = vadd.xlane.f32.xlu1 %v113_v61  ;;  %84 = vadd.xlane.f32.xlu0 %v83_v62  ;;  %v332_v61 = vmov 0  }
  0x3c   :  { %57 = vadd.xlane.f32.xlu2 %v56_v63  ;;  %328 = vset.pattern.permute.xlu0 %v332_v61 }
  0x3d   :  { %327 = vset.pattern.permute.xlu2 %v332_v61 }
  0x43   :  { %117 = vadd.xlane.f32.xlu1 %v116_v34  ;;  %87 = vadd.xlane.f32.xlu0 %v86_v35 }
  0x44   :  { %60 = vadd.xlane.f32.xlu2 %v59_v27 }
  0x4b   :  { %63 = vadd.xlane.f32.xlu1 %v62_v39  ;;  %90 = vadd.xlane.f32.xlu0 %v89_v45 }
  0x4c   :  { %93 = vadd.xlane.f32.xlu2 %v92_v47 }
  0x53   :  { %66 = vadd.xlane.f32.xlu0 %v65_v51  ;;  %69 = vadd.xlane.f32.xlu1 %v68_v57 }
  0x64   :  { %186 = vperm.xlu2 %327, %v183_v58  }
  0x76   :  { %v127_v0 = vpop.xlane.xlu1 %126  ;;  %v121_v1 = vpop.xlane.xlu0 %120 }
  0x77   :  { %v100_v2 = vpop.xlane.xlu2 %99  ;;  %v174_v25 = vmul.f32 %v487_v22, %v121_v1  ;;  %v176_v27 = vmul.f32 %v487_v22, %v127_v0 }
  0x78   :  { %v167_v53 = vmul.f32 %v487_v22, %v100_v2 }
  0x79   :  { %v247_v30 = vperm.slane %v174_v25, %v490_v24  ;;  %v249_v36 = vperm.slane %v176_v27, %v490_v24 }
  0x7a   :  { %v240_v63 = vperm.slane %v167_v53, %v490_v24 }
  0x7e   :  { %v124_v3 = vpop.xlane.xlu0 %123  ;;  %v97_v4 = vpop.xlane.xlu1 %96 }
  0x7f   :  { %v130_v6 = vpop.xlane.xlu2 %129  ;;  %v175_v23 = vmul.f32 %v487_v22, %v124_v3  ;;  %v166_v54 = vmul.f32 %v487_v22, %v97_v4 }
  0x80   :  { %v177_v31 = vmul.f32 %v487_v22, %v130_v6 }
  0x81   :  { %v248_v26 = vperm.slane %v175_v23, %v490_v24  ;;  %v239_v0 = vperm.slane %v166_v54, %v490_v24 }
  0x82   :  { %v250_v38 = vperm.slane %v177_v31, %v490_v24 }
  0x83   :  { %v283_v34 = vsel %vm255_vm2, %v248_v26, %v247_v30  ;;  %v276_v6 = vsel %vm255_vm2, %v240_v63, %v239_v0 }
  0x84   :  { %v284_v39 = vsel %vm257_vm3, %v249_v36, %v283_v34 }
  0x85   :  { %v285_v45 = vsel %vm259_vm4, %v250_v38, %v284_v39 }
  0x86   :  { %v103_v8 = vpop.xlane.xlu0 %102  ;;  %v133_v9 = vpop.xlane.xlu1 %132 }
  0x87   :  { %v481_v10 = vpop.xlane.xlu2 %72  ;;  %v178_v33 = vmul.f32 %v487_v22, %v133_v9  ;;  %v168_v55 = vmul.f32 %v487_v22, %v103_v8 }
  0x88   :  { %v158_v9 = vmul.f32 %v487_v22, %v481_v10 }
  0x89   :  { %v251_v40 = vperm.slane %v178_v33, %v490_v24  ;;  %v241_v2 = vperm.slane %v168_v55, %v490_v24 }
  0x8a   :  { %v231_v26 = vperm.slane %v158_v9, %v490_v24 }
  0x8b   :  { %v286_v48 = vsel %vm261_vm5, %v251_v40, %v285_v45  ;;  %v277_v8 = vsel %vm257_vm3, %v241_v2, %v276_v6 }
  0x8e   :  { %v106_v13 = vpop.xlane.xlu1 %105  ;;  %v483_v14 = vpop.xlane.xlu0 %75 }
  0x8f   :  { %v136_v15 = vpop.xlane.xlu2 %135  ;;  %v169_v59 = vmul.f32 %v487_v22, %v106_v13  ;;  %v159_v11 = vmul.f32 %v487_v22, %v483_v14 }
  0x90   :  { %v179_v35 = vmul.f32 %v487_v22, %v136_v15 }
  0x91   :  { %v242_v4 = vperm.slane %v169_v59, %v490_v24  ;;  %v232_v27 = vperm.slane %v159_v11, %v490_v24 }
  0x92   :  { %v252_v41 = vperm.slane %v179_v35, %v490_v24 }
  0x93   :  { %v278_v16 = vsel %vm259_vm4, %v242_v4, %v277_v8  ;;  %v269_v36 = vsel %vm255_vm2, %v232_v27, %v231_v26  ;;  %v182_v8 = vld [vmem:[%s609_s1] sm:$0x7f] }
  0x94   :  { %v287_v50 = vsel %vm263_vm6, %v252_v41, %v286_v48 }
  0x96   :  { %v109_v18 = vpop.xlane.xlu1 %108  ;;  %v485_v19 = vpop.xlane.xlu0 %78 }
  0x97   :  { %v139_v21 = vpop.xlane.xlu2 %138  ;;  %v170_v62 = vmul.f32 %v487_v22, %v109_v18  ;;  %v160_v17 = vmul.f32 %v487_v22, %v485_v19 }
  0x98   :  { %v180_v37 = vmul.f32 %v487_v22, %v139_v21 }
  0x99   :  { %v243_v5 = vperm.slane %v170_v62, %v490_v24  ;;  %v233_v31 = vperm.slane %v160_v17, %v490_v24 }
  0x9a   :  { %v253_v42 = vperm.slane %v180_v37, %v490_v24 }
  0x9b   :  { %v279_v21 = vsel %vm261_vm5, %v243_v5, %v278_v16  ;;  %v270_v41 = vsel %vm257_vm3, %v233_v31, %v269_v36 }
  0x9c   :  { %v288_v51 = vsel %vm265_vm7, %v253_v42, %v287_v50 }
  0x9e   :  { %v495_v28 = vpop.xlane.xlu1 %51  ;;  %v497_v29 = vpop.xlane.xlu0 %48 }
  0x9f   :  { %v501_v32 = vpop.xlane.xlu2 %81  ;;  %v151_v34 = vmul.f32 %v487_v22, %v495_v28  ;;  %v150_v37 = vmul.f32 %v487_v22, %v497_v29 }
  0xa0   :  { %v161_v10 = vmul.f32 %v487_v22, %v501_v32 }
  0xa1   :  { %v224_v29 = vperm.slane %v151_v34, %v490_v24 }
  0xa2   :  { %v234_v32 = vperm.slane %v161_v10, %v490_v24 }
  0xa4   :  { %v271_v28 = vsel %vm259_vm4, %v234_v32, %v270_v41 }
  0xa6   :  { %v142_v43 = vpop.xlane.xlu1 %141  ;;  %v112_v44 = vpop.xlane.xlu0 %111 }
  0xa7   :  { %v514_v46 = vpop.xlane.xlu2 %54  ;;  %v181_v47 = vmul.f32 %v487_v22, %v142_v43  ;;  %v171_v1 = vmul.f32 %v487_v22, %v112_v44 }
  0xa8   :  { %v152_v42 = vmul.f32 %v487_v22, %v514_v46 }
  0xa9   :  { %v254_v49 = vperm.slane %v181_v47, %v490_v24  ;;  %v244_v7 = vperm.slane %v171_v1, %v490_v24 }
  0xaa   :  { %v225_v54 = vperm.slane %v152_v42, %v490_v24 }
  0xab   :  { %v289_v52 = vsel %vm267_vm8, %v254_v49, %v288_v51  ;;  %v280_v25 = vsel %vm263_vm6, %v244_v7, %v279_v21  ;;  %v223_v51 = vperm.slane %v150_v37, %v490_v24 }
  0xac   :  { %310 = vmatpush.msra.mxu0 %v289_v52 }
  0xad   :  { %v256_v59 = vsel %vm255_vm2, %v224_v29, %v223_v51 }
  0xae   :  { %v115_v56 = vpop.xlane.xlu1 %114  ;;  %v85_v57 = vpop.xlane.xlu0 %84  ;;  %v258_v63 = vsel %vm257_vm3, %v225_v54, %v256_v59 }
  0xaf   :  { %v58_v60 = vpop.xlane.xlu2 %57  ;;  %v172_v3 = vmul.f32 %v487_v22, %v115_v56  ;;  %v162_v23 = vmul.f32 %v487_v22, %v85_v57 }
  0xb0   :  { %v153_v45 = vmul.f32 %v487_v22, %v58_v60 }
  0xb1   :  { %v245_v12 = vperm.slane %v172_v3, %v490_v24  ;;  %v235_v35 = vperm.slane %v162_v23, %v490_v24 }
  0xb2   :  { %v226_v56 = vperm.slane %v153_v45, %v490_v24 }
  0xb3   :  { %v281_v30 = vsel %vm265_vm7, %v245_v12, %v280_v25  ;;  %v272_v48 = vsel %vm261_vm5, %v235_v35, %v271_v28 }
  0xb4   :  { %v260_v2 = vsel %vm259_vm4, %v226_v56, %v258_v63 }
  0xb6   :  { %v118_v13 = vpop.xlane.xlu1 %117  ;;  %v88_v15 = vpop.xlane.xlu0 %87 }
  0xb7   :  { %v61_v18 = vpop.xlane.xlu2 %60  ;;  %v173_v20 = vmul.f32 %v487_v22, %v118_v13  ;;  %v163_v19 = vmul.f32 %v487_v22, %v88_v15 }
  0xb8   :  { %v154_v49 = vmul.f32 %v487_v22, %v61_v18 }
  0xb9   :  { %v246_v14 = vperm.slane %v173_v20, %v490_v24  ;;  %v236_v38 = vperm.slane %v163_v19, %v490_v24 }
  0xba   :  { %v227_v58 = vperm.slane %v154_v49, %v490_v24 }
  0xbb   :  { %v282_v33 = vsel %vm267_vm8, %v246_v14, %v281_v30  ;;  %v273_v53 = vsel %vm263_vm6, %v236_v38, %v272_v48 }
  0xbc   :  { %311 = vmatpush.msra.mxu0 %v282_v33  ;;  %v262_v3 = vsel %vm261_vm5, %v227_v58, %v260_v2 }
  0xbe   :  { %v64_v39 = vpop.xlane.xlu1 %63  ;;  %v91_v40 = vpop.xlane.xlu0 %90 }
  0xbf   :  { %v164_v43 = vmul.f32 %v487_v22, %v91_v40  ;;  %v94_v44 = vpop.xlane.xlu2 %93  ;;  %v155_v46 = vmul.f32 %v487_v22, %v64_v39 }
  0xc0   :  { %v165_v47 = vmul.f32 %v487_v22, %v94_v44 }
  0xc1   :  { %v237_v50 = vperm.slane %v164_v43, %v490_v24  ;;  %v228_v60 = vperm.slane %v155_v46, %v490_v24 }
  0xc2   :  { %v238_v52 = vperm.slane %v165_v47, %v490_v24 }
  0xc3   :  { %v274_v55 = vsel %vm265_vm7, %v237_v50, %v273_v53  ;;  %v264_v6 = vsel %vm263_vm6, %v228_v60, %v262_v3 }
  0xc4   :  { %v275_v57 = vsel %vm267_vm8, %v238_v52, %v274_v55 }
  0xc5   :  { %312 = vmatpush.msra.mxu0 %v275_v57 }
  0xc6   :  { %v67_v61 = vpop.xlane.xlu0 %66  ;;  %v70_v62 = vpop.xlane.xlu1 %69 }
  0xc7   :  { %v156_v0 = vmul.f32 %v487_v22, %v67_v61  ;;  %v157_v1 = vmul.f32 %v487_v22, %v70_v62  ;;  %v187_v22 = vpop.permute.xlu2 %186 }
  0xc9   :  { %v229_v4 = vperm.slane %v156_v0, %v490_v24  ;;  %v230_v5 = vperm.slane %v157_v1, %v490_v24 }
  0xcb   :  { %v266_v7 = vsel %vm265_vm7, %v229_v4, %v264_v6 }
  0xcc   :  { %v268_v9 = vsel %vm267_vm8, %v230_v5, %v266_v7 }
  0xcd   :  { %313 = vmatpush.msra.mxu0 %v268_v9 }
  0xce   :  { %324 = vmatmul.msk.f32.vlgmr.msra.gmra.mxu0 %vm294_vm9, %v182_v8 }
 0x14b   :  { %v315_v11 = vpop.f32.mrf.mxu0 }
 0x14c   :  { %v316_v12 = vadd.f32 %v315_v11, %v187_v22 }
 0x14e   :  { %319 = vst.msk [vmem:[%s610_s3] sm:$0x7f] %vm318_vm10, %v316_v12 }

</bundles_post_ra>
